<compile_context>
chip_gen: v6e
topology: v6e:2x2x1
jax: 0.10.0
libtpu: 0.0.40
codegen_flags: <defaults>
</compile_context>

<pallas_src>
import jax
import jax.numpy as jnp
from jax.experimental import pallas as pl
from jax.experimental.pallas import tpu as pltpu


def _decoder_block_kernel(x_ref, smat_ref, mask_ref, w1_ref, b1_ref,
                          w2_ref, b2_ref, o_ref, b1buf, b2buf):
    """Fused upsample(2x, nearest) + conv3x3+ReLU + conv3x3+ReLU, one batch elem.

    x_ref    : (1, Cin, H, W)        input tile (NCHW)
    smat_ref : (W, 2W)               constant 0/1 column-duplication matrix
    mask_ref : (2, S)                lane masks (S = 2H*2W): row0 kills col 0,
                                     row1 kills col 2W-1 (row-wrap fix)
    w1_ref   : (Cout, 9*Cin_p)       conv1 weights, (ky,kx,c) packed on axis 1
    b1_ref   : (Cout, 1)
    w2_ref   : (Cout, 9*Cout)        conv2 weights
    b2_ref   : (Cout, 1)
    o_ref    : (1, Cout, S)          lane-dense flattened output
    b1buf    : (Cin_p, L) VMEM       flattened zero-padded upsampled image
    b2buf    : (Cout,  L) VMEM       flattened zero-padded conv1 output
                                     with L = (2H+2)*2W + 2
    """
    _, cin, H, W = x_ref.shape
    cin_p = b1buf.shape[0]
    _, cout, S = o_ref.shape
    W2 = smat_ref.shape[1]            # 2*W
    H2 = 2 * H
    f32 = jnp.float32

    # ---- nearest-neighbour 2x upsample, entirely in VMEM -----------------
    x = x_ref[0]                                          # (Cin, H, W)
    if cin_p > cin:                                       # pad channels -> x8
        x = jnp.concatenate(
            [x, jnp.zeros((cin_p - cin, H, W), x.dtype)], axis=0)
    x2d = x.reshape(cin_p * H, W).astype(f32)             # merge leading dims
    # column duplication as a constant matmul on the MXU: up[:, q] = x[:, q//2]
    up = jnp.dot(x2d, smat_ref[...], preferred_element_type=f32)  # (Cin_p*H, 2W)
    up = up.reshape(cin_p, H, W2)

    # ---- flattened zero-padded image for conv1 ---------------------------
    # b1buf[c, 1 + r*2W + q] = U_vpad[c, r, q]  (U_vpad = U with one zero row
    # above/below); element 0 and element L-1 are extra zeros so every tap is
    # an in-bounds contiguous slice.
    b1buf[...] = jnp.zeros_like(b1buf)
    for a in range(H2):               # 2x row duplication folded into stores
        b1buf[:, 1 + (a + 1) * W2: 1 + (a + 2) * W2] = up[:, a // 2, :]

    mask_l = mask_ref[0:1, :]         # zero where output column == 0
    mask_r = mask_ref[1:2, :]         # zero where output column == 2W-1

    def conv_taps(buf):
        """Build the (9*C, S) im2col strip from a flattened padded buffer."""
        parts = []
        for ky in range(3):
            for kx in range(3):
                off = ky * W2 + kx
                sl = buf[:, off:off + S]                  # (C, S) lane slice
                if kx == 0:
                    sl = sl * mask_l                      # fix row wrap-around
                elif kx == 2:
                    sl = sl * mask_r
                parts.append(sl)
        return jnp.concatenate(parts, axis=0)             # (9*C, S)

    # ---- conv1 + bias + ReLU: single matmul, K = 9*Cin_p -----------------
    p1 = conv_taps(b1buf)                                 # (9*Cin_p, S)
    y1 = jnp.dot(w1_ref[...], p1, preferred_element_type=f32)    # (Cout, S)
    y1 = jnp.maximum(y1 + b1_ref[...], 0.0)

    # ---- conv2 input: one interior store into its padded flat buffer -----
    b2buf[...] = jnp.zeros_like(b2buf)
    b2buf[:, 1 + W2: 1 + (H2 + 1) * W2] = y1

    # ---- conv2 + bias + ReLU: single matmul, K = 9*Cout -------------------
    p2 = conv_taps(b2buf)                                 # (9*Cout, S)
    y2 = jnp.dot(w2_ref[...], p2, preferred_element_type=f32)    # (Cout, S)
    y2 = jnp.maximum(y2 + b2_ref[...], 0.0)

    o_ref[0] = y2.astype(o_ref.dtype)                     # lane-dense store


def _pack_weights(w, cin_pad):
    """(Cout, Cin, 3, 3) PyTorch layout -> (Cout, 9*cin_pad), order (ky,kx,c)."""
    cout, cin, kh, kw = w.shape
    if cin_pad > cin:
        w = jnp.pad(w, ((0, 0), (0, cin_pad - cin), (0, 0), (0, 0)))
    return (jnp.transpose(w, (0, 2, 3, 1))
            .reshape(cout, kh * kw * cin_pad).astype(jnp.float32))


def decoder_block_forward(x_nchw, params):
    """DecoderBlock(is_deconv=False).forward: (N,Cin,H,W) -> (N,Cout,2H,2W)."""
    w1, b1, w2, b2 = params            # PyTorch layouts: (O,I,3,3), (O,)
    N, Cin, H, W = x_nchw.shape
    Cout = w1.shape[0]
    assert Cout % 8 == 0, "kernel assumes Cout is a multiple of 8"
    H2, W2 = 2 * H, 2 * W
    S = H2 * W2                        # flattened output spatial (lane axis)
    Cin_p = -(-Cin // 8) * 8           # pad input channels to a multiple of 8
    L = (H2 + 2) * W2 + 2              # flattened padded-image length

    # tiny constant operands (built once, outside the kernel)
    smat = (jnp.arange(W2)[None, :] // 2 ==
            jnp.arange(W)[:, None]).astype(jnp.float32)             # (W, 2W)
    col = jnp.arange(S, dtype=jnp.int32) % W2
    masks = jnp.stack([col != 0, col != W2 - 1]).astype(jnp.float32)  # (2, S)

    w1r = _pack_weights(w1, Cin_p)                                   # (Cout, 9*Cin_p)
    w2r = _pack_weights(w2, Cout)                                    # (Cout, 9*Cout)
    b1r = b1.reshape(Cout, 1).astype(jnp.float32)
    b2r = b2.reshape(Cout, 1).astype(jnp.float32)

    out_flat = pl.pallas_call(
        _decoder_block_kernel,
        out_shape=jax.ShapeDtypeStruct((N, Cout, S), x_nchw.dtype),
        grid=(N,),
        in_specs=[
            pl.BlockSpec((1, Cin, H, W), lambda n: (n, 0, 0, 0)),
            pl.BlockSpec((W, W2), lambda n: (0, 0)),
            pl.BlockSpec((2, S), lambda n: (0, 0)),
            pl.BlockSpec((Cout, 9 * Cin_p), lambda n: (0, 0)),
            pl.BlockSpec((Cout, 1), lambda n: (0, 0)),
            pl.BlockSpec((Cout, 9 * Cout), lambda n: (0, 0)),
            pl.BlockSpec((Cout, 1), lambda n: (0, 0)),
        ],
        out_specs=pl.BlockSpec((1, Cout, S), lambda n: (n, 0, 0)),
        scratch_shapes=[
            pltpu.VMEM((Cin_p, L), jnp.float32),   # padded upsampled input
            pltpu.VMEM((Cout, L), jnp.float32),    # padded conv1 output
        ],
        compiler_params=pltpu.CompilerParams(
            dimension_semantics=("parallel",),     # batch shards across TCs
            vmem_limit_bytes=48 * 1024 * 1024,
        ),
    )(x_nchw, smat, masks, w1r, b1r, w2r, b2r)

    # contiguous (free) reshape back to NCHW spatial
    return out_flat.reshape(N, Cout, H2, W2)


def init_params(key, in_, out, dtype=jnp.float32):
    """Deterministic synthetic init (PyTorch-like uniform fan-in bounds)."""
    k1, k2, k3, k4 = jax.random.split(key, 4)
    bound1 = 1.0 / (in_ * 9) ** 0.5
    bound2 = 1.0 / (out * 9) ** 0.5
    w1 = jax.random.uniform(k1, (out, in_, 3, 3), dtype, -bound1, bound1)
    b1 = jax.random.uniform(k2, (out,), dtype, -bound1, bound1)
    w2 = jax.random.uniform(k3, (out, out, 3, 3), dtype, -bound2, bound2)
    b2 = jax.random.uniform(k4, (out,), dtype, -bound2, bound2)
    return (w1, b1, w2, b2)


def _reference_forward(x_nchw, params):
    """Pure-JAX reference (lax conv, NCHW/OIHW) for the correctness check."""
    w1, b1, w2, b2 = params
    x = jnp.repeat(jnp.repeat(x_nchw, 2, axis=2), 2, axis=3)

    def conv(t, w, b):
        y = jax.lax.conv_general_dilated(
            t, w, window_strides=(1, 1), padding=((1, 1), (1, 1)),
            dimension_numbers=("NCHW", "OIHW", "NCHW"))
        return jnp.maximum(y + b.reshape(1, -1, 1, 1), 0.0)

    return conv(conv(x, w1, b1), w2, b2)


if __name__ == "__main__":
    key = jax.random.PRNGKey(0)
    k_x, k_p = jax.random.split(key)

    # Small shapes consistent with DecoderBlock(in_=4, out=8)
    N, C_in, C_out, H, W = 2, 4, 8, 16, 16
    x = jax.random.normal(k_x, (N, C_in, H, W), jnp.float32)
    params = init_params(k_p, C_in, C_out)

    out = jax.block_until_ready(decoder_block_forward(x, params))
    assert out.shape == (N, C_out, 2 * H, 2 * W), out.shape

    ref = jax.block_until_ready(_reference_forward(x, params))
    err = float(jnp.max(jnp.abs(out - ref)))
    assert jnp.allclose(out, ref, atol=1e-4, rtol=1e-4), f"mismatch, max err {err}"

    print("KERNEL_OK")
</pallas_src>

<mosaic_0001>
module attributes {stable_mosaic.version = 11 : i64} {
  func.func @_decoder_block_kernel(%arg0: i32, %arg1: memref<1x4x16x16xf32, #tpu.memory_space<vmem>>, %arg2: memref<16x32xf32, #tpu.memory_space<vmem>>, %arg3: memref<2x1024xf32, #tpu.memory_space<vmem>>, %arg4: memref<8x72xf32, #tpu.memory_space<vmem>>, %arg5: memref<8x1xf32, #tpu.memory_space<vmem>>, %arg6: memref<8x72xf32, #tpu.memory_space<vmem>>, %arg7: memref<8x1xf32, #tpu.memory_space<vmem>>, %arg8: memref<1x8x1024xf32, #tpu.memory_space<vmem>>, %arg9: memref<8x1090xf32, #tpu.memory_space<vmem>>, %arg10: memref<8x1090xf32, #tpu.memory_space<vmem>>) attributes {dimension_semantics = [#tpu.dimension_semantics<parallel>], iteration_bounds = array<i64: 2>, scalar_prefetch = 0 : i64, scratch_operands = 2 : i64, tpu.core_type = #tpu.core_type<tc>, window_params = [{transform_indices = @transform_0, window_bounds = array<i64: 1, 4, 16, 16>}, {pipeline_mode = #tpu.pipeline_mode<synchronous>, transform_indices = @transform_1, window_bounds = array<i64: 16, 32>}, {pipeline_mode = #tpu.pipeline_mode<synchronous>, transform_indices = @transform_2, window_bounds = array<i64: 2, 1024>}, {pipeline_mode = #tpu.pipeline_mode<synchronous>, transform_indices = @transform_3, window_bounds = array<i64: 8, 72>}, {pipeline_mode = #tpu.pipeline_mode<synchronous>, transform_indices = @transform_4, window_bounds = array<i64: 8, 1>}, {pipeline_mode = #tpu.pipeline_mode<synchronous>, transform_indices = @transform_5, window_bounds = array<i64: 8, 72>}, {pipeline_mode = #tpu.pipeline_mode<synchronous>, transform_indices = @transform_6, window_bounds = array<i64: 8, 1>}, {transform_indices = @transform_7, window_bounds = array<i64: 1, 8, 1024>}]} {
    %c0 = arith.constant 0 : index
    %c0_0 = arith.constant 0 : index
    %c0_1 = arith.constant 0 : index
    %c0_2 = arith.constant 0 : index
    %0 = vector.load %arg1[%c0, %c0_0, %c0_1, %c0_2] : memref<1x4x16x16xf32, #tpu.memory_space<vmem>>, vector<1x4x16x16xf32>
    %1 = vector.shape_cast %0 : vector<1x4x16x16xf32> to vector<4x16x16xf32>
    %cst = arith.constant 0.000000e+00 : f32
    %2 = vector.broadcast %cst : f32 to vector<4x16x16xf32>
    %3 = tpu.concatenate %1, %2 in 0 : vector<4x16x16xf32>, vector<4x16x16xf32> -> vector<8x16x16xf32>
    %4 = vector.shape_cast %3 : vector<8x16x16xf32> to vector<128x16xf32>
    %c0_3 = arith.constant 0 : index
    %c0_4 = arith.constant 0 : index
    %5 = vector.load %arg2[%c0_3, %c0_4] : memref<16x32xf32, #tpu.memory_space<vmem>>, vector<16x32xf32>
    %cst_5 = arith.constant dense<0.000000e+00> : vector<128x32xf32>
    %6 = tpu.matmul %4, %5, %cst_5 {dimension_numbers = #tpu.dot_dimension_numbers<[1], [0], [0], [1], [0, 0, 1, 1], [], []>} : vector<128x16xf32>, vector<16x32xf32>, vector<128x32xf32> -> vector<128x32xf32>
    %7 = vector.shape_cast %6 : vector<128x32xf32> to vector<8x16x32xf32>
    %cst_6 = arith.constant 0.000000e+00 : f32
    %8 = vector.broadcast %cst_6 : f32 to vector<8x1090xf32>
    %c0_7 = arith.constant 0 : index
    %c0_8 = arith.constant 0 : index
    %9 = vector.load %arg9[%c0_7, %c0_8] : memref<8x1090xf32, #tpu.memory_space<vmem>>, vector<8x1090xf32>
    tpu.vector_store %arg9[%c0_7, %c0_8], %8 {strides = array<i32>} : memref<8x1090xf32, #tpu.memory_space<vmem>>, vector<8x1090xf32>,
    %10 = vector.extract_strided_slice %7 {offsets = [0, 0, 0], sizes = [8, 1, 32], strides = [1, 1, 1]} : vector<8x16x32xf32> to vector<8x1x32xf32>
    %11 = vector.shape_cast %10 : vector<8x1x32xf32> to vector<8x32xf32>
    %c0_9 = arith.constant 0 : index
    %c33 = arith.constant 33 : index
    %12 = vector.load %arg9[%c0_9, %c33] : memref<8x1090xf32, #tpu.memory_space<vmem>>, vector<8x32xf32>
    tpu.vector_store %arg9[%c0_9, %c33], %11 {strides = array<i32>} : memref<8x1090xf32, #tpu.memory_space<vmem>>, vector<8x32xf32>,
    %13 = vector.extract_strided_slice %7 {offsets = [0, 0, 0], sizes = [8, 1, 32], strides = [1, 1, 1]} : vector<8x16x32xf32> to vector<8x1x32xf32>
    %14 = vector.shape_cast %13 : vector<8x1x32xf32> to vector<8x32xf32>
    %c0_10 = arith.constant 0 : index
    %c65 = arith.constant 65 : index
    %15 = vector.load %arg9[%c0_10, %c65] : memref<8x1090xf32, #tpu.memory_space<vmem>>, vector<8x32xf32>
    tpu.vector_store %arg9[%c0_10, %c65], %14 {strides = array<i32>} : memref<8x1090xf32, #tpu.memory_space<vmem>>, vector<8x32xf32>,
    %16 = vector.extract_strided_slice %7 {offsets = [0, 1, 0], sizes = [8, 1, 32], strides = [1, 1, 1]} : vector<8x16x32xf32> to vector<8x1x32xf32>
    %17 = vector.shape_cast %16 : vector<8x1x32xf32> to vector<8x32xf32>
    %c0_11 = arith.constant 0 : index
    %c97 = arith.constant 97 : index
    %18 = vector.load %arg9[%c0_11, %c97] : memref<8x1090xf32, #tpu.memory_space<vmem>>, vector<8x32xf32>
    tpu.vector_store %arg9[%c0_11, %c97], %17 {strides = array<i32>} : memref<8x1090xf32, #tpu.memory_space<vmem>>, vector<8x32xf32>,
    %19 = vector.extract_strided_slice %7 {offsets = [0, 1, 0], sizes = [8, 1, 32], strides = [1, 1, 1]} : vector<8x16x32xf32> to vector<8x1x32xf32>
    %20 = vector.shape_cast %19 : vector<8x1x32xf32> to vector<8x32xf32>
    %c0_12 = arith.constant 0 : index
    %c129 = arith.constant 129 : index
    %21 = vector.load %arg9[%c0_12, %c129] : memref<8x1090xf32, #tpu.memory_space<vmem>>, vector<8x32xf32>
    tpu.vector_store %arg9[%c0_12, %c129], %20 {strides = array<i32>} : memref<8x1090xf32, #tpu.memory_space<vmem>>, vector<8x32xf32>,
    %22 = vector.extract_strided_slice %7 {offsets = [0, 2, 0], sizes = [8, 1, 32], strides = [1, 1, 1]} : vector<8x16x32xf32> to vector<8x1x32xf32>
    %23 = vector.shape_cast %22 : vector<8x1x32xf32> to vector<8x32xf32>
    %c0_13 = arith.constant 0 : index
    %c161 = arith.constant 161 : index
    %24 = vector.load %arg9[%c0_13, %c161] : memref<8x1090xf32, #tpu.memory_space<vmem>>, vector<8x32xf32>
    tpu.vector_store %arg9[%c0_13, %c161], %23 {strides = array<i32>} : memref<8x1090xf32, #tpu.memory_space<vmem>>, vector<8x32xf32>,
    %25 = vector.extract_strided_slice %7 {offsets = [0, 2, 0], sizes = [8, 1, 32], strides = [1, 1, 1]} : vector<8x16x32xf32> to vector<8x1x32xf32>
    %26 = vector.shape_cast %25 : vector<8x1x32xf32> to vector<8x32xf32>
    %c0_14 = arith.constant 0 : index
    %c193 = arith.constant 193 : index
    %27 = vector.load %arg9[%c0_14, %c193] : memref<8x1090xf32, #tpu.memory_space<vmem>>, vector<8x32xf32>
    tpu.vector_store %arg9[%c0_14, %c193], %26 {strides = array<i32>} : memref<8x1090xf32, #tpu.memory_space<vmem>>, vector<8x32xf32>,
    %28 = vector.extract_strided_slice %7 {offsets = [0, 3, 0], sizes = [8, 1, 32], strides = [1, 1, 1]} : vector<8x16x32xf32> to vector<8x1x32xf32>
    %29 = vector.shape_cast %28 : vector<8x1x32xf32> to vector<8x32xf32>
    %c0_15 = arith.constant 0 : index
    %c225 = arith.constant 225 : index
    %30 = vector.load %arg9[%c0_15, %c225] : memref<8x1090xf32, #tpu.memory_space<vmem>>, vector<8x32xf32>
    tpu.vector_store %arg9[%c0_15, %c225], %29 {strides = array<i32>} : memref<8x1090xf32, #tpu.memory_space<vmem>>, vector<8x32xf32>,
    %31 = vector.extract_strided_slice %7 {offsets = [0, 3, 0], sizes = [8, 1, 32], strides = [1, 1, 1]} : vector<8x16x32xf32> to vector<8x1x32xf32>
    %32 = vector.shape_cast %31 : vector<8x1x32xf32> to vector<8x32xf32>
    %c0_16 = arith.constant 0 : index
    %c257 = arith.constant 257 : index
    %33 = vector.load %arg9[%c0_16, %c257] : memref<8x1090xf32, #tpu.memory_space<vmem>>, vector<8x32xf32>
    tpu.vector_store %arg9[%c0_16, %c257], %32 {strides = array<i32>} : memref<8x1090xf32, #tpu.memory_space<vmem>>, vector<8x32xf32>,
    %34 = vector.extract_strided_slice %7 {offsets = [0, 4, 0], sizes = [8, 1, 32], strides = [1, 1, 1]} : vector<8x16x32xf32> to vector<8x1x32xf32>
    %35 = vector.shape_cast %34 : vector<8x1x32xf32> to vector<8x32xf32>
    %c0_17 = arith.constant 0 : index
    %c289 = arith.constant 289 : index
    %36 = vector.load %arg9[%c0_17, %c289] : memref<8x1090xf32, #tpu.memory_space<vmem>>, vector<8x32xf32>
    tpu.vector_store %arg9[%c0_17, %c289], %35 {strides = array<i32>} : memref<8x1090xf32, #tpu.memory_space<vmem>>, vector<8x32xf32>,
    %37 = vector.extract_strided_slice %7 {offsets = [0, 4, 0], sizes = [8, 1, 32], strides = [1, 1, 1]} : vector<8x16x32xf32> to vector<8x1x32xf32>
    %38 = vector.shape_cast %37 : vector<8x1x32xf32> to vector<8x32xf32>
    %c0_18 = arith.constant 0 : index
    %c321 = arith.constant 321 : index
    %39 = vector.load %arg9[%c0_18, %c321] : memref<8x1090xf32, #tpu.memory_space<vmem>>, vector<8x32xf32>
    tpu.vector_store %arg9[%c0_18, %c321], %38 {strides = array<i32>} : memref<8x1090xf32, #tpu.memory_space<vmem>>, vector<8x32xf32>,
    %40 = vector.extract_strided_slice %7 {offsets = [0, 5, 0], sizes = [8, 1, 32], strides = [1, 1, 1]} : vector<8x16x32xf32> to vector<8x1x32xf32>
    %41 = vector.shape_cast %40 : vector<8x1x32xf32> to vector<8x32xf32>
    %c0_19 = arith.constant 0 : index
    %c353 = arith.constant 353 : index
    %42 = vector.load %arg9[%c0_19, %c353] : memref<8x1090xf32, #tpu.memory_space<vmem>>, vector<8x32xf32>
    tpu.vector_store %arg9[%c0_19, %c353], %41 {strides = array<i32>} : memref<8x1090xf32, #tpu.memory_space<vmem>>, vector<8x32xf32>,
    %43 = vector.extract_strided_slice %7 {offsets = [0, 5, 0], sizes = [8, 1, 32], strides = [1, 1, 1]} : vector<8x16x32xf32> to vector<8x1x32xf32>
    %44 = vector.shape_cast %43 : vector<8x1x32xf32> to vector<8x32xf32>
    %c0_20 = arith.constant 0 : index
    %c385 = arith.constant 385 : index
    %45 = vector.load %arg9[%c0_20, %c385] : memref<8x1090xf32, #tpu.memory_space<vmem>>, vector<8x32xf32>
    tpu.vector_store %arg9[%c0_20, %c385], %44 {strides = array<i32>} : memref<8x1090xf32, #tpu.memory_space<vmem>>, vector<8x32xf32>,
    %46 = vector.extract_strided_slice %7 {offsets = [0, 6, 0], sizes = [8, 1, 32], strides = [1, 1, 1]} : vector<8x16x32xf32> to vector<8x1x32xf32>
    %47 = vector.shape_cast %46 : vector<8x1x32xf32> to vector<8x32xf32>
    %c0_21 = arith.constant 0 : index
    %c417 = arith.constant 417 : index
    %48 = vector.load %arg9[%c0_21, %c417] : memref<8x1090xf32, #tpu.memory_space<vmem>>, vector<8x32xf32>
    tpu.vector_store %arg9[%c0_21, %c417], %47 {strides = array<i32>} : memref<8x1090xf32, #tpu.memory_space<vmem>>, vector<8x32xf32>,
    %49 = vector.extract_strided_slice %7 {offsets = [0, 6, 0], sizes = [8, 1, 32], strides = [1, 1, 1]} : vector<8x16x32xf32> to vector<8x1x32xf32>
    %50 = vector.shape_cast %49 : vector<8x1x32xf32> to vector<8x32xf32>
    %c0_22 = arith.constant 0 : index
    %c449 = arith.constant 449 : index
    %51 = vector.load %arg9[%c0_22, %c449] : memref<8x1090xf32, #tpu.memory_space<vmem>>, vector<8x32xf32>
    tpu.vector_store %arg9[%c0_22, %c449], %50 {strides = array<i32>} : memref<8x1090xf32, #tpu.memory_space<vmem>>, vector<8x32xf32>,
    %52 = vector.extract_strided_slice %7 {offsets = [0, 7, 0], sizes = [8, 1, 32], strides = [1, 1, 1]} : vector<8x16x32xf32> to vector<8x1x32xf32>
    %53 = vector.shape_cast %52 : vector<8x1x32xf32> to vector<8x32xf32>
    %c0_23 = arith.constant 0 : index
    %c481 = arith.constant 481 : index
    %54 = vector.load %arg9[%c0_23, %c481] : memref<8x1090xf32, #tpu.memory_space<vmem>>, vector<8x32xf32>
    tpu.vector_store %arg9[%c0_23, %c481], %53 {strides = array<i32>} : memref<8x1090xf32, #tpu.memory_space<vmem>>, vector<8x32xf32>,
    %55 = vector.extract_strided_slice %7 {offsets = [0, 7, 0], sizes = [8, 1, 32], strides = [1, 1, 1]} : vector<8x16x32xf32> to vector<8x1x32xf32>
    %56 = vector.shape_cast %55 : vector<8x1x32xf32> to vector<8x32xf32>
    %c0_24 = arith.constant 0 : index
    %c513 = arith.constant 513 : index
    %57 = vector.load %arg9[%c0_24, %c513] : memref<8x1090xf32, #tpu.memory_space<vmem>>, vector<8x32xf32>
    tpu.vector_store %arg9[%c0_24, %c513], %56 {strides = array<i32>} : memref<8x1090xf32, #tpu.memory_space<vmem>>, vector<8x32xf32>,
    %58 = vector.extract_strided_slice %7 {offsets = [0, 8, 0], sizes = [8, 1, 32], strides = [1, 1, 1]} : vector<8x16x32xf32> to vector<8x1x32xf32>
    %59 = vector.shape_cast %58 : vector<8x1x32xf32> to vector<8x32xf32>
    %c0_25 = arith.constant 0 : index
    %c545 = arith.constant 545 : index
    %60 = vector.load %arg9[%c0_25, %c545] : memref<8x1090xf32, #tpu.memory_space<vmem>>, vector<8x32xf32>
    tpu.vector_store %arg9[%c0_25, %c545], %59 {strides = array<i32>} : memref<8x1090xf32, #tpu.memory_space<vmem>>, vector<8x32xf32>,
    %61 = vector.extract_strided_slice %7 {offsets = [0, 8, 0], sizes = [8, 1, 32], strides = [1, 1, 1]} : vector<8x16x32xf32> to vector<8x1x32xf32>
    %62 = vector.shape_cast %61 : vector<8x1x32xf32> to vector<8x32xf32>
    %c0_26 = arith.constant 0 : index
    %c577 = arith.constant 577 : index
    %63 = vector.load %arg9[%c0_26, %c577] : memref<8x1090xf32, #tpu.memory_space<vmem>>, vector<8x32xf32>
    tpu.vector_store %arg9[%c0_26, %c577], %62 {strides = array<i32>} : memref<8x1090xf32, #tpu.memory_space<vmem>>, vector<8x32xf32>,
    %64 = vector.extract_strided_slice %7 {offsets = [0, 9, 0], sizes = [8, 1, 32], strides = [1, 1, 1]} : vector<8x16x32xf32> to vector<8x1x32xf32>
    %65 = vector.shape_cast %64 : vector<8x1x32xf32> to vector<8x32xf32>
    %c0_27 = arith.constant 0 : index
    %c609 = arith.constant 609 : index
    %66 = vector.load %arg9[%c0_27, %c609] : memref<8x1090xf32, #tpu.memory_space<vmem>>, vector<8x32xf32>
    tpu.vector_store %arg9[%c0_27, %c609], %65 {strides = array<i32>} : memref<8x1090xf32, #tpu.memory_space<vmem>>, vector<8x32xf32>,
    %67 = vector.extract_strided_slice %7 {offsets = [0, 9, 0], sizes = [8, 1, 32], strides = [1, 1, 1]} : vector<8x16x32xf32> to vector<8x1x32xf32>
    %68 = vector.shape_cast %67 : vector<8x1x32xf32> to vector<8x32xf32>
    %c0_28 = arith.constant 0 : index
    %c641 = arith.constant 641 : index
    %69 = vector.load %arg9[%c0_28, %c641] : memref<8x1090xf32, #tpu.memory_space<vmem>>, vector<8x32xf32>
    tpu.vector_store %arg9[%c0_28, %c641], %68 {strides = array<i32>} : memref<8x1090xf32, #tpu.memory_space<vmem>>, vector<8x32xf32>,
    %70 = vector.extract_strided_slice %7 {offsets = [0, 10, 0], sizes = [8, 1, 32], strides = [1, 1, 1]} : vector<8x16x32xf32> to vector<8x1x32xf32>
    %71 = vector.shape_cast %70 : vector<8x1x32xf32> to vector<8x32xf32>
    %c0_29 = arith.constant 0 : index
    %c673 = arith.constant 673 : index
    %72 = vector.load %arg9[%c0_29, %c673] : memref<8x1090xf32, #tpu.memory_space<vmem>>, vector<8x32xf32>
    tpu.vector_store %arg9[%c0_29, %c673], %71 {strides = array<i32>} : memref<8x1090xf32, #tpu.memory_space<vmem>>, vector<8x32xf32>,
    %73 = vector.extract_strided_slice %7 {offsets = [0, 10, 0], sizes = [8, 1, 32], strides = [1, 1, 1]} : vector<8x16x32xf32> to vector<8x1x32xf32>
    %74 = vector.shape_cast %73 : vector<8x1x32xf32> to vector<8x32xf32>
    %c0_30 = arith.constant 0 : index
    %c705 = arith.constant 705 : index
    %75 = vector.load %arg9[%c0_30, %c705] : memref<8x1090xf32, #tpu.memory_space<vmem>>, vector<8x32xf32>
    tpu.vector_store %arg9[%c0_30, %c705], %74 {strides = array<i32>} : memref<8x1090xf32, #tpu.memory_space<vmem>>, vector<8x32xf32>,
    %76 = vector.extract_strided_slice %7 {offsets = [0, 11, 0], sizes = [8, 1, 32], strides = [1, 1, 1]} : vector<8x16x32xf32> to vector<8x1x32xf32>
    %77 = vector.shape_cast %76 : vector<8x1x32xf32> to vector<8x32xf32>
    %c0_31 = arith.constant 0 : index
    %c737 = arith.constant 737 : index
    %78 = vector.load %arg9[%c0_31, %c737] : memref<8x1090xf32, #tpu.memory_space<vmem>>, vector<8x32xf32>
    tpu.vector_store %arg9[%c0_31, %c737], %77 {strides = array<i32>} : memref<8x1090xf32, #tpu.memory_space<vmem>>, vector<8x32xf32>,
    %79 = vector.extract_strided_slice %7 {offsets = [0, 11, 0], sizes = [8, 1, 32], strides = [1, 1, 1]} : vector<8x16x32xf32> to vector<8x1x32xf32>
    %80 = vector.shape_cast %79 : vector<8x1x32xf32> to vector<8x32xf32>
    %c0_32 = arith.constant 0 : index
    %c769 = arith.constant 769 : index
    %81 = vector.load %arg9[%c0_32, %c769] : memref<8x1090xf32, #tpu.memory_space<vmem>>, vector<8x32xf32>
    tpu.vector_store %arg9[%c0_32, %c769], %80 {strides = array<i32>} : memref<8x1090xf32, #tpu.memory_space<vmem>>, vector<8x32xf32>,
    %82 = vector.extract_strided_slice %7 {offsets = [0, 12, 0], sizes = [8, 1, 32], strides = [1, 1, 1]} : vector<8x16x32xf32> to vector<8x1x32xf32>
    %83 = vector.shape_cast %82 : vector<8x1x32xf32> to vector<8x32xf32>
    %c0_33 = arith.constant 0 : index
    %c801 = arith.constant 801 : index
    %84 = vector.load %arg9[%c0_33, %c801] : memref<8x1090xf32, #tpu.memory_space<vmem>>, vector<8x32xf32>
    tpu.vector_store %arg9[%c0_33, %c801], %83 {strides = array<i32>} : memref<8x1090xf32, #tpu.memory_space<vmem>>, vector<8x32xf32>,
    %85 = vector.extract_strided_slice %7 {offsets = [0, 12, 0], sizes = [8, 1, 32], strides = [1, 1, 1]} : vector<8x16x32xf32> to vector<8x1x32xf32>
    %86 = vector.shape_cast %85 : vector<8x1x32xf32> to vector<8x32xf32>
    %c0_34 = arith.constant 0 : index
    %c833 = arith.constant 833 : index
    %87 = vector.load %arg9[%c0_34, %c833] : memref<8x1090xf32, #tpu.memory_space<vmem>>, vector<8x32xf32>
    tpu.vector_store %arg9[%c0_34, %c833], %86 {strides = array<i32>} : memref<8x1090xf32, #tpu.memory_space<vmem>>, vector<8x32xf32>,
    %88 = vector.extract_strided_slice %7 {offsets = [0, 13, 0], sizes = [8, 1, 32], strides = [1, 1, 1]} : vector<8x16x32xf32> to vector<8x1x32xf32>
    %89 = vector.shape_cast %88 : vector<8x1x32xf32> to vector<8x32xf32>
    %c0_35 = arith.constant 0 : index
    %c865 = arith.constant 865 : index
    %90 = vector.load %arg9[%c0_35, %c865] : memref<8x1090xf32, #tpu.memory_space<vmem>>, vector<8x32xf32>
    tpu.vector_store %arg9[%c0_35, %c865], %89 {strides = array<i32>} : memref<8x1090xf32, #tpu.memory_space<vmem>>, vector<8x32xf32>,
    %91 = vector.extract_strided_slice %7 {offsets = [0, 13, 0], sizes = [8, 1, 32], strides = [1, 1, 1]} : vector<8x16x32xf32> to vector<8x1x32xf32>
    %92 = vector.shape_cast %91 : vector<8x1x32xf32> to vector<8x32xf32>
    %c0_36 = arith.constant 0 : index
    %c897 = arith.constant 897 : index
    %93 = vector.load %arg9[%c0_36, %c897] : memref<8x1090xf32, #tpu.memory_space<vmem>>, vector<8x32xf32>
    tpu.vector_store %arg9[%c0_36, %c897], %92 {strides = array<i32>} : memref<8x1090xf32, #tpu.memory_space<vmem>>, vector<8x32xf32>,
    %94 = vector.extract_strided_slice %7 {offsets = [0, 14, 0], sizes = [8, 1, 32], strides = [1, 1, 1]} : vector<8x16x32xf32> to vector<8x1x32xf32>
    %95 = vector.shape_cast %94 : vector<8x1x32xf32> to vector<8x32xf32>
    %c0_37 = arith.constant 0 : index
    %c929 = arith.constant 929 : index
    %96 = vector.load %arg9[%c0_37, %c929] : memref<8x1090xf32, #tpu.memory_space<vmem>>, vector<8x32xf32>
    tpu.vector_store %arg9[%c0_37, %c929], %95 {strides = array<i32>} : memref<8x1090xf32, #tpu.memory_space<vmem>>, vector<8x32xf32>,
    %97 = vector.extract_strided_slice %7 {offsets = [0, 14, 0], sizes = [8, 1, 32], strides = [1, 1, 1]} : vector<8x16x32xf32> to vector<8x1x32xf32>
    %98 = vector.shape_cast %97 : vector<8x1x32xf32> to vector<8x32xf32>
    %c0_38 = arith.constant 0 : index
    %c961 = arith.constant 961 : index
    %99 = vector.load %arg9[%c0_38, %c961] : memref<8x1090xf32, #tpu.memory_space<vmem>>, vector<8x32xf32>
    tpu.vector_store %arg9[%c0_38, %c961], %98 {strides = array<i32>} : memref<8x1090xf32, #tpu.memory_space<vmem>>, vector<8x32xf32>,
    %100 = vector.extract_strided_slice %7 {offsets = [0, 15, 0], sizes = [8, 1, 32], strides = [1, 1, 1]} : vector<8x16x32xf32> to vector<8x1x32xf32>
    %101 = vector.shape_cast %100 : vector<8x1x32xf32> to vector<8x32xf32>
    %c0_39 = arith.constant 0 : index
    %c993 = arith.constant 993 : index
    %102 = vector.load %arg9[%c0_39, %c993] : memref<8x1090xf32, #tpu.memory_space<vmem>>, vector<8x32xf32>
    tpu.vector_store %arg9[%c0_39, %c993], %101 {strides = array<i32>} : memref<8x1090xf32, #tpu.memory_space<vmem>>, vector<8x32xf32>,
    %103 = vector.extract_strided_slice %7 {offsets = [0, 15, 0], sizes = [8, 1, 32], strides = [1, 1, 1]} : vector<8x16x32xf32> to vector<8x1x32xf32>
    %104 = vector.shape_cast %103 : vector<8x1x32xf32> to vector<8x32xf32>
    %c0_40 = arith.constant 0 : index
    %c1025 = arith.constant 1025 : index
    %105 = vector.load %arg9[%c0_40, %c1025] : memref<8x1090xf32, #tpu.memory_space<vmem>>, vector<8x32xf32>
    tpu.vector_store %arg9[%c0_40, %c1025], %104 {strides = array<i32>} : memref<8x1090xf32, #tpu.memory_space<vmem>>, vector<8x32xf32>,
    %c0_41 = arith.constant 0 : index
    %c0_42 = arith.constant 0 : index
    %106 = vector.load %arg3[%c0_41, %c0_42] : memref<2x1024xf32, #tpu.memory_space<vmem>>, vector<1x1024xf32>
    %c1 = arith.constant 1 : index
    %c0_43 = arith.constant 0 : index
    %107 = vector.load %arg3[%c1, %c0_43] : memref<2x1024xf32, #tpu.memory_space<vmem>>, vector<1x1024xf32>
    %c0_44 = arith.constant 0 : index
    %c0_45 = arith.constant 0 : index
    %108 = vector.load %arg9[%c0_44, %c0_45] : memref<8x1090xf32, #tpu.memory_space<vmem>>, vector<8x1024xf32>
    %109 = vector.broadcast %106 : vector<1x1024xf32> to vector<8x1024xf32>
    %110 = arith.mulf %108, %109 : vector<8x1024xf32>
    %c0_46 = arith.constant 0 : index
    %c1_47 = arith.constant 1 : index
    %111 = vector.load %arg9[%c0_46, %c1_47] : memref<8x1090xf32, #tpu.memory_space<vmem>>, vector<8x1024xf32>
    %c0_48 = arith.constant 0 : index
    %c2 = arith.constant 2 : index
    %112 = vector.load %arg9[%c0_48, %c2] : memref<8x1090xf32, #tpu.memory_space<vmem>>, vector<8x1024xf32>
    %113 = vector.broadcast %107 : vector<1x1024xf32> to vector<8x1024xf32>
    %114 = arith.mulf %112, %113 : vector<8x1024xf32>
    %c0_49 = arith.constant 0 : index
    %c32 = arith.constant 32 : index
    %115 = vector.load %arg9[%c0_49, %c32] : memref<8x1090xf32, #tpu.memory_space<vmem>>, vector<8x1024xf32>
    %116 = vector.broadcast %106 : vector<1x1024xf32> to vector<8x1024xf32>
    %117 = arith.mulf %115, %116 : vector<8x1024xf32>
    %c0_50 = arith.constant 0 : index
    %c33_51 = arith.constant 33 : index
    %118 = vector.load %arg9[%c0_50, %c33_51] : memref<8x1090xf32, #tpu.memory_space<vmem>>, vector<8x1024xf32>
    %c0_52 = arith.constant 0 : index
    %c34 = arith.constant 34 : index
    %119 = vector.load %arg9[%c0_52, %c34] : memref<8x1090xf32, #tpu.memory_space<vmem>>, vector<8x1024xf32>
    %120 = vector.broadcast %107 : vector<1x1024xf32> to vector<8x1024xf32>
    %121 = arith.mulf %119, %120 : vector<8x1024xf32>
    %c0_53 = arith.constant 0 : index
    %c64 = arith.constant 64 : index
    %122 = vector.load %arg9[%c0_53, %c64] : memref<8x1090xf32, #tpu.memory_space<vmem>>, vector<8x1024xf32>
    %123 = vector.broadcast %106 : vector<1x1024xf32> to vector<8x1024xf32>
    %124 = arith.mulf %122, %123 : vector<8x1024xf32>
    %c0_54 = arith.constant 0 : index
    %c65_55 = arith.constant 65 : index
    %125 = vector.load %arg9[%c0_54, %c65_55] : memref<8x1090xf32, #tpu.memory_space<vmem>>, vector<8x1024xf32>
    %c0_56 = arith.constant 0 : index
    %c66 = arith.constant 66 : index
    %126 = vector.load %arg9[%c0_56, %c66] : memref<8x1090xf32, #tpu.memory_space<vmem>>, vector<8x1024xf32>
    %127 = vector.broadcast %107 : vector<1x1024xf32> to vector<8x1024xf32>
    %128 = arith.mulf %126, %127 : vector<8x1024xf32>
    %129 = tpu.concatenate %110, %111, %114, %117, %118, %121, %124, %125, %128 in 0 : vector<8x1024xf32>, vector<8x1024xf32>, vector<8x1024xf32>, vector<8x1024xf32>, vector<8x1024xf32>, vector<8x1024xf32>, vector<8x1024xf32>, vector<8x1024xf32>, vector<8x1024xf32> -> vector<72x1024xf32>
    %c0_57 = arith.constant 0 : index
    %c0_58 = arith.constant 0 : index
    %130 = vector.load %arg4[%c0_57, %c0_58] : memref<8x72xf32, #tpu.memory_space<vmem>>, vector<8x72xf32>
    %cst_59 = arith.constant dense<0.000000e+00> : vector<8x1024xf32>
    %131 = tpu.matmul %130, %129, %cst_59 {dimension_numbers = #tpu.dot_dimension_numbers<[1], [0], [0], [1], [0, 0, 1, 1], [], []>} : vector<8x72xf32>, vector<72x1024xf32>, vector<8x1024xf32> -> vector<8x1024xf32>
    %c0_60 = arith.constant 0 : index
    %c0_61 = arith.constant 0 : index
    %132 = vector.load %arg5[%c0_60, %c0_61] : memref<8x1xf32, #tpu.memory_space<vmem>>, vector<8x1xf32>
    %133 = vector.broadcast %132 : vector<8x1xf32> to vector<8x1024xf32>
    %134 = arith.addf %131, %133 : vector<8x1024xf32>
    %cst_62 = arith.constant 0.000000e+00 : f32
    %135 = vector.broadcast %cst_62 : f32 to vector<8x1024xf32>
    %136 = arith.maximumf %134, %135 : vector<8x1024xf32>
    %cst_63 = arith.constant 0.000000e+00 : f32
    %137 = vector.broadcast %cst_63 : f32 to vector<8x1090xf32>
    %c0_64 = arith.constant 0 : index
    %c0_65 = arith.constant 0 : index
    %138 = vector.load %arg10[%c0_64, %c0_65] : memref<8x1090xf32, #tpu.memory_space<vmem>>, vector<8x1090xf32>
    tpu.vector_store %arg10[%c0_64, %c0_65], %137 {strides = array<i32>} : memref<8x1090xf32, #tpu.memory_space<vmem>>, vector<8x1090xf32>,
    %c0_66 = arith.constant 0 : index
    %c33_67 = arith.constant 33 : index
    %139 = vector.load %arg10[%c0_66, %c33_67] : memref<8x1090xf32, #tpu.memory_space<vmem>>, vector<8x1024xf32>
    tpu.vector_store %arg10[%c0_66, %c33_67], %136 {strides = array<i32>} : memref<8x1090xf32, #tpu.memory_space<vmem>>, vector<8x1024xf32>,
    %c0_68 = arith.constant 0 : index
    %c0_69 = arith.constant 0 : index
    %140 = vector.load %arg10[%c0_68, %c0_69] : memref<8x1090xf32, #tpu.memory_space<vmem>>, vector<8x1024xf32>
    %141 = vector.broadcast %106 : vector<1x1024xf32> to vector<8x1024xf32>
    %142 = arith.mulf %140, %141 : vector<8x1024xf32>
    %c0_70 = arith.constant 0 : index
    %c1_71 = arith.constant 1 : index
    %143 = vector.load %arg10[%c0_70, %c1_71] : memref<8x1090xf32, #tpu.memory_space<vmem>>, vector<8x1024xf32>
    %c0_72 = arith.constant 0 : index
    %c2_73 = arith.constant 2 : index
    %144 = vector.load %arg10[%c0_72, %c2_73] : memref<8x1090xf32, #tpu.memory_space<vmem>>, vector<8x1024xf32>
    %145 = vector.broadcast %107 : vector<1x1024xf32> to vector<8x1024xf32>
    %146 = arith.mulf %144, %145 : vector<8x1024xf32>
    %c0_74 = arith.constant 0 : index
    %c32_75 = arith.constant 32 : index
    %147 = vector.load %arg10[%c0_74, %c32_75] : memref<8x1090xf32, #tpu.memory_space<vmem>>, vector<8x1024xf32>
    %148 = vector.broadcast %106 : vector<1x1024xf32> to vector<8x1024xf32>
    %149 = arith.mulf %147, %148 : vector<8x1024xf32>
    %c0_76 = arith.constant 0 : index
    %c33_77 = arith.constant 33 : index
    %150 = vector.load %arg10[%c0_76, %c33_77] : memref<8x1090xf32, #tpu.memory_space<vmem>>, vector<8x1024xf32>
    %c0_78 = arith.constant 0 : index
    %c34_79 = arith.constant 34 : index
    %151 = vector.load %arg10[%c0_78, %c34_79] : memref<8x1090xf32, #tpu.memory_space<vmem>>, vector<8x1024xf32>
    %152 = vector.broadcast %107 : vector<1x1024xf32> to vector<8x1024xf32>
    %153 = arith.mulf %151, %152 : vector<8x1024xf32>
    %c0_80 = arith.constant 0 : index
    %c64_81 = arith.constant 64 : index
    %154 = vector.load %arg10[%c0_80, %c64_81] : memref<8x1090xf32, #tpu.memory_space<vmem>>, vector<8x1024xf32>
    %155 = vector.broadcast %106 : vector<1x1024xf32> to vector<8x1024xf32>
    %156 = arith.mulf %154, %155 : vector<8x1024xf32>
    %c0_82 = arith.constant 0 : index
    %c65_83 = arith.constant 65 : index
    %157 = vector.load %arg10[%c0_82, %c65_83] : memref<8x1090xf32, #tpu.memory_space<vmem>>, vector<8x1024xf32>
    %c0_84 = arith.constant 0 : index
    %c66_85 = arith.constant 66 : index
    %158 = vector.load %arg10[%c0_84, %c66_85] : memref<8x1090xf32, #tpu.memory_space<vmem>>, vector<8x1024xf32>
    %159 = vector.broadcast %107 : vector<1x1024xf32> to vector<8x1024xf32>
    %160 = arith.mulf %158, %159 : vector<8x1024xf32>
    %161 = tpu.concatenate %142, %143, %146, %149, %150, %153, %156, %157, %160 in 0 : vector<8x1024xf32>, vector<8x1024xf32>, vector<8x1024xf32>, vector<8x1024xf32>, vector<8x1024xf32>, vector<8x1024xf32>, vector<8x1024xf32>, vector<8x1024xf32>, vector<8x1024xf32> -> vector<72x1024xf32>
    %c0_86 = arith.constant 0 : index
    %c0_87 = arith.constant 0 : index
    %162 = vector.load %arg6[%c0_86, %c0_87] : memref<8x72xf32, #tpu.memory_space<vmem>>, vector<8x72xf32>
    %cst_88 = arith.constant dense<0.000000e+00> : vector<8x1024xf32>
    %163 = tpu.matmul %162, %161, %cst_88 {dimension_numbers = #tpu.dot_dimension_numbers<[1], [0], [0], [1], [0, 0, 1, 1], [], []>} : vector<8x72xf32>, vector<72x1024xf32>, vector<8x1024xf32> -> vector<8x1024xf32>
    %c0_89 = arith.constant 0 : index
    %c0_90 = arith.constant 0 : index
    %164 = vector.load %arg7[%c0_89, %c0_90] : memref<8x1xf32, #tpu.memory_space<vmem>>, vector<8x1xf32>
    %165 = vector.broadcast %164 : vector<8x1xf32> to vector<8x1024xf32>
    %166 = arith.addf %163, %165 : vector<8x1024xf32>
    %cst_91 = arith.constant 0.000000e+00 : f32
    %167 = vector.broadcast %cst_91 : f32 to vector<8x1024xf32>
    %168 = arith.maximumf %166, %167 : vector<8x1024xf32>
    %c0_92 = arith.constant 0 : index
    %c0_93 = arith.constant 0 : index
    %c0_94 = arith.constant 0 : index
    %169 = vector.load %arg8[%c0_92, %c0_93, %c0_94] : memref<1x8x1024xf32, #tpu.memory_space<vmem>>, vector<1x8x1024xf32>
    %170 = vector.shape_cast %169 : vector<1x8x1024xf32> to vector<8x1024xf32>
    %171 = vector.shape_cast %168 : vector<8x1024xf32> to vector<1x8x1024xf32>
    tpu.vector_store %arg8[%c0_92, %c0_93, %c0_94], %171 {strides = array<i32>} : memref<1x8x1024xf32, #tpu.memory_space<vmem>>, vector<1x8x1024xf32>,
    return
  }
  func.func @transform_0(%arg0: i32) -> (i32, i32, i32, i32) {
    %c0_i32 = arith.constant 0 : i32
    %c0_i32_0 = arith.constant 0 : i32
    %c0_i32_1 = arith.constant 0 : i32
    %c0_i32_2 = arith.constant 0 : i32
    return %arg0, %c0_i32, %c0_i32_0, %c0_i32_1 : i32, i32, i32, i32
  }
  func.func @transform_1(%arg0: i32) -> (i32, i32) {
    %c0_i32 = arith.constant 0 : i32
    %c0_i32_0 = arith.constant 0 : i32
    %c0_i32_1 = arith.constant 0 : i32
    return %c0_i32, %c0_i32_0 : i32, i32
  }
  func.func @transform_2(%arg0: i32) -> (i32, i32) {
    %c0_i32 = arith.constant 0 : i32
    %c0_i32_0 = arith.constant 0 : i32
    %c0_i32_1 = arith.constant 0 : i32
    return %c0_i32, %c0_i32_0 : i32, i32
  }
  func.func @transform_3(%arg0: i32) -> (i32, i32) {
    %c0_i32 = arith.constant 0 : i32
    %c0_i32_0 = arith.constant 0 : i32
    %c0_i32_1 = arith.constant 0 : i32
    return %c0_i32, %c0_i32_0 : i32, i32
  }
  func.func @transform_4(%arg0: i32) -> (i32, i32) {
    %c0_i32 = arith.constant 0 : i32
    %c0_i32_0 = arith.constant 0 : i32
    %c0_i32_1 = arith.constant 0 : i32
    return %c0_i32, %c0_i32_0 : i32, i32
  }
  func.func @transform_5(%arg0: i32) -> (i32, i32) {
    %c0_i32 = arith.constant 0 : i32
    %c0_i32_0 = arith.constant 0 : i32
    %c0_i32_1 = arith.constant 0 : i32
    return %c0_i32, %c0_i32_0 : i32, i32
  }
  func.func @transform_6(%arg0: i32) -> (i32, i32) {
    %c0_i32 = arith.constant 0 : i32
    %c0_i32_0 = arith.constant 0 : i32
    %c0_i32_1 = arith.constant 0 : i32
    return %c0_i32, %c0_i32_0 : i32, i32
  }
  func.func @transform_7(%arg0: i32) -> (i32, i32, i32) {
    %c0_i32 = arith.constant 0 : i32
    %c0_i32_0 = arith.constant 0 : i32
    %c0_i32_1 = arith.constant 0 : i32
    return %arg0, %c0_i32, %c0_i32_0 : i32, i32, i32
  }
}

</mosaic_0001>

<bundles_post_ra>
// kernel: tpu_custom_call.1
= control target key start
LH: loop header
LB: loop body
LE: loop exit
PB: predicated region body
PF: predicated region fallthrough
CT: control target
= control target key end

     0   :  { %s4945_s0 = inlined_call_operand.hbm [shape: f32[2,4,16,16], index: 0, kind: input, shape index: {}]   ;;  %s4946_s1 = inlined_call_operand.vmem [shape: f32[16,32], index: 1, kind: input, shape index: {}]   ;;  %s4947_s2 = inlined_call_operand.hbm [shape: f32[2,1024], index: 2, kind: input, shape index: {}]   ;;  %s4948_s3 = inlined_call_operand.hbm [shape: f32[8,72], index: 3, kind: input, shape index: {}]   ;;  %s4949_s4 = inlined_call_operand.vmem [shape: f32[8,1], index: 4, kind: input, shape index: {}]   ;;  %s4950_s5 = inlined_call_operand.vmem [shape: f32[8,72], index: 5, kind: input, shape index: {}]   ;;  %s4951_s6 = inlined_call_operand.vmem [shape: f32[8,1], index: 6, kind: input, shape index: {}]   ;;  %s4952_s7 = inlined_call_operand.hbm [shape: f32[2,8,1024], index: 7, kind: output, shape index: {}]  }
   0x1   :  { %5010 = sst [smem:[#allocation66_spill]] %s4947_s2 }
   0x2   :  { %12 = vsyncpa [#allocation5], 0 }
   0x3   :  { %14 = vsyncpa [#allocation5 + $0x1], 0 }
   0x4   :  { %15 = vsyncpa [#allocation8], 0 }
   0x5   :  { %16 = vsyncpa [#allocation6], 0 }
   0x6   :  { %18 = vsyncpa [#allocation6 + $0x1], 0  ;;  %s3093_s24 = smov 0   ;;  %s3095_s25 = smov 0  }
   0x7   :  { %s3097_s26 = smov 0   ;;  %s3099_s27 = smov 0  }
   0x8 LB: > { %s3114_s28 = sadd.s32 4294967295, %s3027_s27   ;;  %s2704_s29 = sadd.s32 4294967294, %s3027_s27   ;;  %s3027_s27 = sphi %s3099_s27, %s5134_s27   ;;  %s3023_s26 = sphi %s3097_s26, %s5133_s26   ;;  %s3019_s25 = sphi %s3095_s25, %s5132_s25   ;;  %s3015_s24 = sphi %s3093_s24, %s5131_s24  }
   0x9   : > { %s3118_s30 = sadd.s32 1, %s3027_s27   ;;  %s31_s8 = sadd.s32 1, %s3023_s26 }
   0xa   : > { %s28_s9 = ssub.s32 %s3027_s27, %s3118_s30  ;;  %p38_p0 = scmp.ne.s32.totalorder %s3023_s26, %s3019_s25 }
   0xb   : > { %p29_p1 = scmp.eq.s32.totalorder %s28_s9, 0  ;;  %p39_p2 = scmp.eq.s32.totalorder %s3027_s27, 0 }
   0xc   : > { %p44_p3 = scmp.ne.s32.totalorder %s3019_s25, %s3015_s24  ;;  %p4953_p4 = scmp.eq.s32.totalorder %s3114_s28, 0 }
   0xd   : > { %s3130_s10 = scalar_select %p29_p1, %s3023_s26, %s31_s8  }
   0xe   : > { %p3132_p5 = por %p39_p2, %p38_p0  ;;  %p3138_p6 = por %p4953_p4, %p44_p3 }
   0xf   : > { %p194_p7 = scmp.eq.s32.totalorder %s3114_s28, 1  ;;  %p200_p8 = scmp.eq.s32.totalorder %s2704_s29, 1 }
  0x10   : > { %s5012_s12 = scalar_select %p3138_p6, 1, 0 }
  0x11   : > { %p2705_p9 = scmp.ge.s32.totalorder %s3027_s27, 1  ;;  %p207_p10 = scmp.lt.s32.totalorder %s3027_s27, 3 }
  0x12   : > { %p3145_p11 = por %p194_p7, %p38_p0  ;;  %p3149_p12 = por %p200_p8, %p44_p3 }
  0x13   : > { %p3153_p13 = pnand %p2705_p9, %p207_p10  ;;  %s3029_s16 = smov [#allocation7]  }
  0x14   : > { %s5013_s13 = scalar_select %p3145_p11, 1, 0 }
  0x15   : > { %s5014_s14 = scalar_select %p3149_p12, 1, 0 }
  0x16   : > { %s5015_s15 = scalar_select %p3153_p13, 1, 0 }
  0x17   : > { %p2802_p2 = pneg %p3153_p13  ;;  %s223_s17 = sshll.u32 %s3029_s16, 4  ;;  %s224_s17 = int_to_ptr.vmem [resolvable:$true] %s223_s17 }
  0x18   : > { %p2819_p4 = scmp.lt.s32.totalorder %s3027_s27, 2  ;;  %p5016_p0 = scmp.eq.s32.totalorder %s3114_s28, 0 }
  0x19   : > { %s3030_s20 = smov [#allocation9]   ;;  %s2890_s22 = scalar_lea.vmem %s224_s17, 256 }
  0x1a   : > { %p3163_p7 = pnand %p2802_p2, %p5016_p0  ;;  %p3169_p3 = pnand %p2819_p4, %p3132_p5 }
  0x1b   : > { %s234_s21 = sshll.u32 %s3030_s20, 4  ;;  %p2891_p9 = scmp.ne.s32.totalorder %s224_s17, %s2890_s22  ;;  %s235_s21 = int_to_ptr.vmem [resolvable:$true] %s234_s21 }
  0x1c   : > { %p2881_p8 = pneg %p3163_p7  ;;  %p2898_p0 = scmp.lt.s32.totalorder %s224_s17, %s224_s17 }
  0x1d   : > { %p2899_p1 = scmp.lt.s32.totalorder %s2890_s22, %s2890_s22 }
  0x1e   : > { %p2893_p10 = pnand %p2891_p9, %p2881_p8 }
  0x1f   : > { %p2900_p12 = por %p2899_p1, %p2898_p0 }
  0x20   : > { %p2894_p2 = pneg %p2893_p10 }
  0x22   : > { %p2901_p11 = pnand %p2900_p12, %p2894_p2 }
  0x24   : > { %2904 = shalt.err (!%p2901_p11)
}
  0x25   : > { %s5019_s2 = sld [smem:[#allocation66_spill]]  ;;  %s254_s8 = sand.u32 1, %s3023_s26  }
  0x26   : > { %s2916_s9 = scalar_lea.vmem %s235_s21, 128  ;;  %p2924_p10 = scmp.lt.s32.totalorder %s235_s21, %s235_s21 }
  0x27   : > { %p2917_p4 = scmp.ne.s32.totalorder %s235_s21, %s2916_s9  ;;  %p2925_p6 = scmp.lt.s32.totalorder %s2916_s9, %s2916_s9 }
  0x29   : > { %p2919_p5 = pnand %p2917_p4, %p2881_p8  ;;  %p2926_p1 = por %p2925_p6, %p2924_p10 }
  0x2b   : > { %2805 = dma.hbm_to_vmem [thread:$0]  (!%p3163_p7), %s5019_s2, 256, %s224_s17, [#allocation8]  }
  0x2c   : > { %p2920_p9 = pneg %p2919_p5 }
  0x2e   : > { %p2927_p12 = pnand %p2926_p1, %p2920_p9 }
  0x30   : > { %2930 = shalt.err (!%p2927_p12)
}
  0x31   : > { %2808 = dma.hbm_to_vmem [thread:$0]  (!%p3163_p7), %s4948_s3, 128, %s235_s21, [#allocation8]  }
  0x32   : > { %s2709_s17 = sshll.u32 %s254_s8, 6  ;;  %s2738_s20 = sshll.u32 %s3027_s27, 10 }
  0x33   : > { %s3196_s29 = scalar_lea.hbm %s4945_s0, %s2738_s20  ;;  %s258_s9 = scalar_lea.vmem [#allocation4], %s2709_s17 }
  0x34   : > { %s265_s2 = sshll.u32 %s258_s9, 4  ;;  %s3200_s18 = scalar_lea.sflag [#allocation5], %s254_s8  ;;  %s3198_s2 = int_to_ptr.vmem [resolvable:$true] %s265_s2 }
  0x35   : > { %s2931_s11 = scalar_lea.hbm %s3196_s29, 1024  ;;  %p2933_p11 = pneg %p3169_p3 }
  0x36   : > { %p2932_p6 = scmp.ne.s32.totalorder %s3196_s29, %s2931_s11  ;;  %s2936_s20 = scalar_lea.hbm %s4945_s0, 2048 }
  0x37   : > { %p2937_p2 = scmp.lt.s32.totalorder %s3196_s29, %s4945_s0  ;;  %p2938_p0 = scmp.lt.s32.totalorder %s2936_s20, %s2931_s11 }
  0x38   : > { %p2934_p7 = pnand %p2933_p11, %p2932_p6 }
  0x39   : > { %p2939_p4 = por %p2938_p0, %p2937_p2 }
  0x3a   : > { %p2935_p8 = pneg %p2934_p7 }
  0x3c   : > { %p2940_p5 = pnand %p2939_p4, %p2935_p8 }
  0x3e   : > { %2943 = shalt.err (!%p2940_p5)
}
  0x3f   : > { %s2944_s8 = scalar_lea.vmem %s3198_s2, 1024  ;;  %s3031_s17 = smov [#allocation4]  }
  0x40   : > { %p2945_p9 = scmp.ne.s32.totalorder %s3198_s2, %s2944_s8  ;;  %s2949_s9 = sshll.u32 %s3031_s17, 4  ;;  %s2950_s9 = int_to_ptr.vmem [resolvable:$false] %s2949_s9 }
  0x41   : > { %s2951_s21 = scalar_lea.vmem %s2950_s9, 2048  ;;  %p2952_p12 = scmp.lt.s32.totalorder %s3198_s2, %s2950_s9 }
  0x42   : > { %p2947_p10 = pnand %p2945_p9, %p2933_p11  ;;  %p2953_p6 = scmp.lt.s32.totalorder %s2951_s21, %s2944_s8 }
  0x44   : > { %p2948_p1 = pneg %p2947_p10  ;;  %p2954_p7 = por %p2953_p6, %p2952_p12 }
  0x46   : > { %p2955_p13 = pnand %p2954_p7, %p2948_p1 }
  0x48   : > { %2958 = shalt.err (!%p2955_p13)
}
  0x49   : > { %s3032_s11 = smov 128   ;;  %s3033_s16 = smov 8  }
  0x4a   : > { %2812 = dma.hbm_to_vmem [thread:$0]  (!%p3169_p3), %s3196_s29, 1024, %s3198_s2, %s3200_s18, %s3032_s11, %s3032_s11, %s3033_s16  }
  0x4b   : > { %p5020_p11 = scmp.ne.s32.totalorder %s5015_s15, 0 }
  0x4d   : > { %277 = sbr.rel (%p5020_p11) target bundleno = 1502 (0x5de), region = 48 }
  0x52   : > { %s3224_s20 = sand.u32 1, %s3019_s25   ;;  %p5021_p13 = scmp.ne.s32.totalorder %s5012_s12, 0 }
  0x53   : > { %s2713_s22 = sshll.u32 %s3224_s20, 6  ;;  %s280_s23 = scalar_lea.sflag [#allocation5], %s3224_s20 }
  0x54   : > { %s3230_s8 = scalar_lea.vmem [#allocation4], %s2713_s22 }
  0x55   : > { %3002 = dma.done.wait (%p5021_p13), %s280_s23, 1024  }
  0x56   : > { %3004 = vsyncadd (%p5021_p13), %s280_s23, 4294966272  ;;  %p5022_p3 = scmp.eq.s32.totalorder %s3114_s28, 0 }
  0x58   : > { %3006 = dma.done.wait (%p5022_p3), [#allocation8], 384   ;;  %p5023_p8 = pmov %p5022_p3 }
  0x59   : > { %v915_v0 = vlaneseq  ;;  %v3034_v1 = vmov 0.0   ;;  %vm332_vm0 = vcmask 130048   ;;  %v331_v3 = vld [vmem:[%s4946_s1 + $0x8] sm:$0xff]  ;;  %v330_v4 = vld [vmem:[%s4946_s1] sm:$0xff]  ;;  %v322_v5 = vld [vmem:[%s3230_s8] sm:$0xff]  ;;  %s3035_s29 = smov 66  }
  0x5a   : > { %3008 = vsyncadd (%p5023_p8), [#allocation8], 4294966912  ;;  %2777 = vmatprep.mubr.f32.mxu1 %v3034_v1  ;;  %505 = vst [vmem:[#allocation2] sm:$0xff] %v3034_v1  ;;  %2758 = vmatprep.subr.mxu0 %v331_v3  ;;  %v323_v8 = vld [vmem:[%s3230_s8 + $0x8] sm:$0xff]  ;;  %v324_v9 = vld [vmem:[%s3230_s8 + $0x10] sm:$0xff]  ;;  %s3036_s18 = smov 64  }
  0x5b   : > { %506 = vst [vmem:[#allocation2 + $0x8] sm:$0xff] %v3034_v1  ;;  %507 = vst [vmem:[#allocation2 + $0x10] sm:$0xff] %v3034_v1  ;;  %v3250_v2 = vshrl.u32 %v915_v0, 7  ;;  %2762 = vmatprep.mubr.msk.f32.mxu0 %vm332_vm0, %v322_v5  ;;  %2759 = vmatpush3.msra.mxu0 %v331_v3  ;;  %v3264_v10 = vld [vmem:[#allocation7 + $0x1] ss:$2 sm:$0xff]  ;;  %v325_v16 = vld [vmem:[%s3230_s8 + $0x18] sm:$0xff] }
  0x5c   : > { %508 = vst [vmem:[#allocation2 + $0x18] sm:$0xff] %v3034_v1  ;;  %509 = vst [vmem:[#allocation2 + $0x20] sm:$0xff] %v3034_v1  ;;  %2786 = vmatprep.subr.mxu1 %v331_v3  ;;  %2760 = vmatprep.subr.mxu0 %v330_v4  ;;  %v3269_v14 = vld [vmem:[#allocation7] ss:$2 sm:$0xff]  ;;  %v328_v22 = vld [vmem:[%s3230_s8 + $0x30] sm:$0xff]  ;;  %s3037_s17 = smov 34  }
  0x5d   : > { %510 = vst [vmem:[#allocation2 + $0x28] sm:$0xff] %v3034_v1  ;;  %511 = vst [vmem:[#allocation2 + $0x30] sm:$0xff] %v3034_v1  ;;  %v921_v6 = vsub.s32 1, %v3250_v2  ;;  %v917_v7 = vsub.s32 0, %v3250_v2  ;;  %2788 = vmatpush3.msra.mxu1 %v331_v3  ;;  %2761 = vmatpush3.msra.mxu0 %v330_v4  ;;  %v925_v13 = vsub.s32 2, %v3250_v2  ;;  %v945_v15 = vsub.s32 7, %v3250_v2 }
  0x5e   : > { %512 = vst [vmem:[#allocation2 + $0x38] sm:$0xff] %v3034_v1  ;;  %1842 = vst [vmem:[#allocation3] sm:$0xff] %v3034_v1  ;;  %2787 = vmatprep.subr.mxu1 %v330_v4  ;;  %2763 = vmatmul.mubr.msk.f32.vlgmr.msra.gmra.mxu0 %vm332_vm0, %v323_v8  ;;  %v326_v17 = vld [vmem:[%s3230_s8 + $0x20] sm:$0xff]  ;;  %v327_v21 = vld [vmem:[%s3230_s8 + $0x28] sm:$0xff]  ;;  %s3038_s9 = smov 32   ;;  %v929_v26 = vsub.s32 3, %v3250_v2 }
  0x5f   : > { %v972_v11 = vrot.slane %v3264_v10, %v921_v6  ;;  %v968_v12 = vrot.slane %v3264_v10, %v917_v7  ;;  %2789 = vmatpush3.msra.mxu1 %v330_v4  ;;  %2765 = vmatprep.mubr.msk.f32.mxu0 %vm332_vm0, %v324_v9  ;;  %v3280_v18 = vrot.slane %v3269_v14, %v917_v7  ;;  %v329_v25 = vld [vmem:[%s3230_s8 + $0x38] sm:$0xff]  ;;  %s3039_s21 = smov 2   ;;  %v937_v28 = vsub.s32 5, %v3250_v2  ;;  %s3040_s11 = smov 33  }
  0x60   : > { %2778 = vmatmul.mubr.f32.vlgmr.msra.gmra.mxu1 %v3034_v1  ;;  %v976_v19 = vrot.slane %v3264_v10, %v925_v13  ;;  %v3287_v20 = vrot.slane %v3264_v10, %v945_v15  ;;  %v3298_v23 = vrot.slane %v3269_v14, %v925_v13  ;;  %v3302_v24 = vrot.slane %v3269_v14, %v921_v6  ;;  %s3041_s16 = smov 65   ;;  %s3042_s23 = smov 97  }
  0x61   : > { %2780 = vmatprep.mubr.f32.mxu1 %v3034_v1  ;;  %1167 = vrot.lane.b32.xlu0 %v972_v11, %s3035_s29  ;;  %v980_v27 = vrot.slane %v3264_v10, %v929_v26  ;;  %v933_v29 = vsub.s32 4, %v3250_v2  ;;  %v988_v30 = vrot.slane %v3264_v10, %v937_v28  ;;  %v941_v32 = vsub.s32 6, %v3250_v2  ;;  %s3043_s8 = smov 1   ;;  %s3044_s2 = smov 63  }
  0x62   : > { %1165 = vrot.lane.b32.xlu1 %v968_v12, %s3035_s29  ;;  %2766 = vmatmul.mubr.msk.f32.gmra.mxu0 %vm332_vm0, %v325_v16  ;;  %v3339_v33 = vrot.slane %v3269_v14, %v929_v26  ;;  %v3351_v36 = vrot.slane %v3269_v14, %v937_v28  ;;  %v3376_v38 = vrot.slane %v3269_v14, %v945_v15  ;;  %vm513_vm1 = vcmask 539648   ;;  %s3045_s12 = smov 62   ;;  %s3046_s15 = smov 95  }
  0x63   : > { %2768 = vmatprep.mubr.msk.f32.mxu0 %vm332_vm0, %v326_v17  ;;  %v984_v31 = vrot.slane %v3264_v10, %v933_v29  ;;  %v992_v34 = vrot.slane %v3264_v10, %v941_v32  ;;  %v3347_v35 = vrot.slane %v3269_v14, %v933_v29  ;;  %v3359_v37 = vrot.slane %v3269_v14, %v941_v32  ;;  %s3047_s19 = smov 127   ;;  %p5128_p0 = scmp.ne.s32.totalorder %s5013_s13, 0 }
  0x64   : > { %2781 = vmatmul.mubr.f32.gmra.mxu1 %v3034_v1  ;;  %5025 = vst [vmem:[#allocation15_spill] sm:$0xff] %v3376_v38  ;;  %514 = vst.msk [vmem:[#allocation2 + $0x40] sm:$0xff] %vm513_vm1, %v3034_v1  ;;  %vm524_vm2 = vcmask 1041409   ;;  %vm527_vm3 = vcmask 1042434   ;;  %vm530_vm4 = vcmask 1043459   ;;  %vm533_vm5 = vcmask 1044484  }
  0x65   : > { %2783 = vmatprep.mubr.f32.mxu1 %v3034_v1  ;;  %1123 = vrot.lane.b32.xlu0 %v3280_v18, %s3036_s18  ;;  %5024 = vst [vmem:[#allocation14_spill] sm:$0xff] %v3359_v37  ;;  %1850 = vst.msk [vmem:[#allocation3 + $0x40] sm:$0xff] %vm513_vm1, %v3034_v1  ;;  %vm536_vm6 = vcmask 1045509   ;;  %vm539_vm7 = vcmask 1046534   ;;  %vm542_vm8 = vcmask 1047559   ;;  %vm573_vm9 = vcmask 7168  }
  0x66   : > { %1169 = vrot.lane.b32.xlu1 %v976_v19, %s3035_s29  ;;  %2769 = vmatmul.mubr.msk.f32.gmra.mxu0 %vm332_vm0, %v327_v21  ;;  %vm578_vm10 = vcmask 269320   ;;  %vm547_vm11 = vcmask 531720   ;;  %vm552_vm12 = vcmask 794120   ;;  %vm571_vm13 = vcmask 1048328  }
  0x67   : > { %2771 = vmatprep.mubr.msk.f32.mxu0 %vm332_vm0, %v328_v22  ;;  %vm1139_vm14 = vcmask 523264   ;;  %vm1097_vm15 = vcmask 277504  }
  0x68   : > { %2784 = vmatmul.mubr.f32.gmra.mxu1 %v3034_v1 }
  0x69   : > { %1127 = vrot.lane.b32.xlu0 %v3298_v23, %s3036_s18  ;;  %1614 = vmatprep.mubr.f32.mxu1 %v3034_v1 }
  0x6a   : > { %1125 = vrot.lane.b32.xlu1 %v3302_v24, %s3036_s18  ;;  %2772 = vmatmul.mubr.msk.f32.gmra.mxu0 %vm332_vm0, %v329_v25  ;;  %vm1055_vm0 = vcmask 261120  }
  0x6b   : > { %2774 = vmatprep.mubr.f32.mxu0 %v3034_v1 }
  0x6d   : > { %1081 = vrot.lane.b32.xlu0 %v968_v12, %s3037_s17 }
  0x6e   : > { %1083 = vrot.lane.b32.xlu1 %v972_v11, %s3037_s17  ;;  %2775 = vmatmul.mubr.f32.gmra.mxu0 %v3034_v1 }
  0x6f   : > { %1685 = vmatprep.mubr.f32.mxu0 %v3034_v1 }
  0x71   : > { %1085 = vrot.lane.b32.xlu0 %v976_v19, %s3037_s17 }
  0x72   : > { %1039 = vrot.lane.b32.xlu1 %v3280_v18, %s3038_s9 }
  0x75   : > { %1041 = vrot.lane.b32.xlu0 %v3302_v24, %s3038_s9 }
  0x76   : > { %1043 = vrot.lane.b32.xlu1 %v3298_v23, %s3038_s9 }
  0x79   : > { %999 = vrot.lane.b32.xlu0 %v972_v11, %s3039_s21 }
  0x7a   : > { %997 = vrot.lane.b32.xlu1 %v968_v12, %s3039_s21 }
  0x7d   : > { %1171 = vrot.lane.b32.xlu0 %v980_v27, %s3035_s29 }
  0x7e   : > { %1001 = vrot.lane.b32.xlu1 %v976_v19, %s3039_s21 }
  0x81   : > { %1175 = vrot.lane.b32.xlu0 %v988_v30, %s3035_s29 }
  0x82   : > { %1173 = vrot.lane.b32.xlu1 %v984_v31, %s3035_s29 }
  0x85   : > { %1129 = vrot.lane.b32.xlu0 %v3339_v33, %s3036_s18 }
  0x86   : > { %1177 = vrot.lane.b32.xlu1 %v992_v34, %s3035_s29 }
  0x89   : > { %1087 = vrot.lane.b32.xlu0 %v980_v27, %s3037_s17 }
  0x8a   : > { %1131 = vrot.lane.b32.xlu1 %v3347_v35, %s3036_s18 }
  0x8d   : > { %1133 = vrot.lane.b32.xlu0 %v3351_v36, %s3036_s18 }
  0x8e   : > { %1089 = vrot.lane.b32.xlu1 %v984_v31, %s3037_s17 }
  0x91   : > { %1093 = vrot.lane.b32.xlu0 %v992_v34, %s3037_s17 }
  0x92   : > { %1135 = vrot.lane.b32.xlu1 %v3359_v37, %s3036_s18 }
  0x95   : > { %1045 = vrot.lane.b32.xlu0 %v3339_v33, %s3038_s9 }
  0x96   : > { %1091 = vrot.lane.b32.xlu1 %v988_v30, %s3037_s17 }
  0x99   : > { %1005 = vrot.lane.b32.xlu0 %v984_v31, %s3039_s21 }
  0x9a   : > { %1047 = vrot.lane.b32.xlu1 %v3347_v35, %s3038_s9 }
  0x9d   : > { %1051 = vrot.lane.b32.xlu0 %v3359_v37, %s3038_s9 }
  0x9e   : > { %1003 = vrot.lane.b32.xlu1 %v980_v27, %s3039_s21 }
  0xa1   : > { %1009 = vrot.lane.b32.xlu0 %v992_v34, %s3039_s21 }
  0xa2   : > { %1049 = vrot.lane.b32.xlu1 %v3351_v36, %s3038_s9 }
  0xa5   : > { %1137 = vrot.lane.b32.xlu0 %v3376_v38, %s3036_s18 }
  0xa6   : > { %1007 = vrot.lane.b32.xlu1 %v988_v30, %s3039_s21 }
  0xa9   : > { %1053 = vrot.lane.b32.xlu0 %v3376_v38, %s3038_s9  ;;  %s3050_s9 = smov 126  }
  0xaa   : > { %1179 = vrot.lane.b32.xlu1 %v3287_v20, %s3035_s29  ;;  %s3048_s29 = smov 94  }
  0xae   : > { %1095 = vrot.lane.b32.xlu1 %v3287_v20, %s3037_s17  ;;  %s3049_s17 = smov 96  }
  0xb2   : > { %1011 = vrot.lane.b32.xlu1 %v3287_v20, %s3039_s21 }
  0xd4   : > { %v3459_v25 = vpop.permute.xlu1 %1165 }
  0xd5   : > { %5026 = vst [vmem:[#allocation16_spill] sm:$0xff] %v3459_v25 }
 0x11e   : > { %v3396_v39 = vpop.f32.mrf.mxu0 }
 0x11f   : > { %v813_v47 = vrot.slane %v3396_v39, 4  ;;  %v745_v50 = vrot.slane %v3396_v39, 1  ;;  %v768_v52 = vrot.slane %v3396_v39, 2  ;;  %v790_v57 = vrot.slane %v3396_v39, 3 }
 0x120   : > { %v3398_v40 = vpop.f32.mrf.mxu1  ;;  %v3400_v41 = vpop.f32.mrf.mxu0 }
 0x121   : > { %v821_v54 = vrot.slane %v3398_v40, 7  ;;  %v625_v60 = vrot.slane %v3400_v41, 4  ;;  %v753_v61 = vrot.slane %v3398_v40, 4  ;;  %v731_v62 = vrot.slane %v3398_v40, 3 }
 0x122   : > { %v3402_v42 = vpop.f32.mrf.mxu1  ;;  %v3404_v43 = vpop.f32.mrf.mxu0 }
 0x123   : > { %v814_v49 = vrot.slane %v3404_v43, 3  ;;  %v723_v51 = vrot.slane %v3404_v43, 7  ;;  %v769_v56 = vrot.slane %v3404_v43, 1  ;;  %v633_v0 = vrot.slane %v3402_v42, 7 }
 0x124   : > { %v3406_v44 = vpop.f32.mrf.mxu1  ;;  %v3408_v45 = vpop.f32.mrf.mxu0  ;;  %v746_v1 = vsel %vm524_vm2, %v3404_v43, %v745_v50  ;;  %v791_v7 = vrot.slane %v3404_v43, 2 }
 0x125   : > { %v626_v55 = vrot.slane %v3408_v45, 3  ;;  %v823_v63 = vrot.slane %v3406_v44, 6  ;;  %v815_v4 = vsel %vm524_vm2, %v814_v49, %v813_v47  ;;  %v724_v6 = vsel %vm524_vm2, %v723_v51, %v3396_v39 }
 0x126   : > { %v3410_v46 = vpop.f32.mrf.mxu1  ;;  %v3413_v48 = vpop.f32.mrf.mxu0  ;;  %v770_v12 = vsel %vm524_vm2, %v769_v56, %v768_v52  ;;  %v792_v30 = vsel %vm524_vm2, %v791_v7, %v790_v57 }
 0x127   : > { %v816_v59 = vrot.slane %v3413_v48, 2  ;;  %v747_v2 = vrot.slane %v3413_v48, 7  ;;  %v627_v10 = vsel %vm524_vm2, %v626_v55, %v625_v60  ;;  %v635_v11 = vrot.slane %v3410_v46, 6 }
 0x128   : > { %v3419_v53 = vpop.f32.mrf.mxu1  ;;  %v3425_v58 = vpop.f32.mrf.mxu0  ;;  %v725_v16 = vrot.slane %v3413_v48, 6  ;;  %v793_v17 = vrot.slane %v3413_v48, 1 }
 0x129   : > { %v628_v5 = vrot.slane %v3425_v58, 2  ;;  %v817_v14 = vsel %vm527_vm3, %v816_v59, %v815_v4  ;;  %v825_v20 = vrot.slane %v3419_v53, 5  ;;  %v748_v22 = vsel %vm527_vm3, %v747_v2, %v746_v1 }
 0x12a   : > { %v3436_v3 = vpop.f32.mrf.mxu0  ;;  %v3443_v8 = vpop.f32.mrf.mxu1  ;;  %v794_v55 = vsel %vm527_vm3, %v793_v17, %v792_v30  ;;  %v726_v7 = vsel %vm527_vm3, %v725_v16, %v724_v6 }
 0x12b   : > { %v818_v9 = vrot.slane %v3436_v3, 1  ;;  %v749_v15 = vrot.slane %v3436_v3, 6  ;;  %v629_v27 = vsel %vm527_vm3, %v628_v5, %v627_v10  ;;  %v637_v28 = vrot.slane %v3443_v8, 5 }
 0x12c   : > { %v3449_v13 = vpop.f32.mrf.mxu0  ;;  %v727_v29 = vrot.slane %v3436_v3, 5  ;;  %v772_v47 = vrot.slane %v3436_v3, 7  ;;  %v755_v5 = vrot.slane %v3406_v44, 3  ;;  %v776_v10 = vrot.slane %v3398_v40, 5 }
 0x12d   : > { %v819_v19 = vsel %vm530_vm4, %v818_v9, %v817_v14  ;;  %v630_v21 = vrot.slane %v3449_v13, 1  ;;  %v750_v51 = vsel %vm530_vm4, %v749_v15, %v748_v22  ;;  %v3491_v9 = vpop.permute.xlu1 %1169  ;;  %v798_v15 = vrot.slane %v3398_v40, 6 }
 0x12e   : > { %v3461_v26 = vpop.f32.mrf.mxu0  ;;  %v795_v16 = vsel %vm530_vm4, %v3436_v3, %v794_v55  ;;  %v858_v22 = vrot.slane %v3396_v39, 6 }
 0x12f   : > { %v820_v31 = vsel %vm533_vm5, %v3461_v26, %v819_v19  ;;  %v631_v32 = vsel %vm530_vm4, %v630_v21, %v629_v27  ;;  %v751_v34 = vrot.slane %v3461_v26, 5  ;;  %v729_v52 = vrot.slane %v3461_v26, 4 }
 0x130   : > { %v3472_v49 = vpop.f32.mrf.mxu0  ;;  %v822_v50 = vsel %vm536_vm6, %v821_v54, %v820_v31  ;;  %v774_v60 = vrot.slane %v3461_v26, 6  ;;  %v796_v4 = vrot.slane %v3461_v26, 7  ;;  %v757_v19 = vrot.slane %v3419_v53, 2 }
 0x131   : > { %v824_v56 = vsel %vm539_vm7, %v823_v63, %v822_v50  ;;  %v632_v57 = vsel %vm533_vm5, %v3472_v49, %v631_v32  ;;  %v752_v59 = vsel %vm533_vm5, %v751_v34, %v750_v51  ;;  %v861_v27 = vrot.slane %v3413_v48, 4  ;;  %v3526_v55 = vpop.permute.xlu1 %1125 }
 0x132   : > { %v826_v1 = vsel %vm542_vm8, %v825_v20, %v824_v56  ;;  %v634_v2 = vsel %vm536_vm6, %v633_v0, %v632_v57  ;;  %v754_v54 = vsel %vm536_vm6, %v753_v61, %v752_v59  ;;  %v728_v0 = vsel %vm530_vm4, %v727_v29, %v726_v7 }
 0x133   : > { %827 = vrot.lane.b32.xlu0 %v826_v1, %s3040_s11  ;;  %v636_v63 = vsel %vm539_vm7, %v635_v11, %v634_v2  ;;  %v771_v61 = vsel %vm527_vm3, %v3413_v48, %v770_v12  ;;  %v756_v11 = vsel %vm539_vm7, %v755_v5, %v754_v54  ;;  %v730_v17 = vsel %vm533_vm5, %v729_v52, %v728_v0 }
 0x134   : > { %v638_v14 = vsel %vm542_vm8, %v637_v28, %v636_v63  ;;  %v773_v6 = vsel %vm530_vm4, %v772_v47, %v771_v61  ;;  %v797_v21 = vsel %vm533_vm5, %v796_v4, %v795_v16  ;;  %v859_v12 = vrot.slane %v3404_v43, 5  ;;  %v3521_v47 = vpop.permute.xlu0 %1167 }
 0x135   : > { %639 = vrot.lane.b32.xlu1 %v638_v14, %s3040_s11  ;;  %v775_v20 = vsel %vm533_vm5, %v774_v60, %v773_v6  ;;  %v867_v28 = vrot.slane %v3398_v40, 1  ;;  %v880_v29 = vrot.slane %v3396_v39, 7  ;;  %v758_v30 = vsel %vm542_vm8, %v757_v19, %v756_v11 }
 0x136   : > { %v732_v31 = vsel %vm536_vm6, %v731_v62, %v730_v17  ;;  %v863_v32 = vrot.slane %v3436_v3, 3  ;;  %v889_v34 = vrot.slane %v3398_v40, 2  ;;  %v733_v50 = vrot.slane %v3406_v44, 2 }
 0x137   : > { %831 = vrot.lane.b32.xlu0 %v826_v1, %s3041_s16  ;;  %v777_v51 = vsel %vm536_vm6, %v776_v10, %v775_v20  ;;  %v799_v52 = vsel %vm536_vm6, %v798_v15, %v797_v21  ;;  %v865_v56 = vrot.slane %v3461_v26, 2  ;;  %v778_v62 = vrot.slane %v3406_v44, 4 }
 0x138   : > { %v800_v57 = vrot.slane %v3406_v44, 5  ;;  %v860_v59 = vsel %vm524_vm2, %v859_v12, %v858_v22  ;;  %v881_v60 = vrot.slane %v3404_v43, 6  ;;  %v734_v1 = vsel %vm539_vm7, %v733_v50, %v732_v31  ;;  %v3552_v19 = vpop.permute.xlu0 %1123  ;;  %v3556_v12 = vpop.permute.xlu1 %1083 }
 0x139   : > { %759 = vrot.lane.b32.xlu1 %v758_v30, %s3042_s23  ;;  %v735_v2 = vrot.slane %v3419_v53, 1  ;;  %v862_v54 = vsel %vm527_vm3, %v861_v27, %v860_v59  ;;  %v883_v4 = vrot.slane %v3413_v48, 5  ;;  %v779_v63 = vsel %vm539_vm7, %v778_v62, %v777_v51  ;;  %5027 = vst [vmem:[#allocation17_spill] sm:$0xff] %v3552_v19 }
 0x13a   : > { %v801_v5 = vsel %vm539_vm7, %v800_v57, %v799_v52  ;;  %v864_v7 = vsel %vm530_vm4, %v863_v32, %v862_v54  ;;  %v885_v10 = vrot.slane %v3436_v3, 4  ;;  %v802_v0 = vrot.slane %v3419_v53, 4 }
 0x13b   : > { %643 = vrot.lane.b32.xlu0 %v638_v14, %s3041_s16  ;;  %v780_v14 = vrot.slane %v3419_v53, 3  ;;  %v866_v61 = vsel %vm533_vm5, %v865_v56, %v864_v7  ;;  %v835_v15 = vrot.slane %v3396_v39, 5  ;;  %v736_v11 = vsel %vm542_vm8, %v735_v2, %v734_v1 }
 0x13c   : > { %v882_v17 = vsel %vm524_vm2, %v881_v60, %v880_v29  ;;  %v887_v6 = vrot.slane %v3461_v26, 3  ;;  %v836_v16 = vrot.slane %v3404_v43, 4  ;;  %v803_v21 = vsel %vm542_vm8, %v802_v0, %v801_v5  ;;  %v3584_v54 = vpop.permute.xlu0 %1127 }
 0x13d   : > { %764 = vrot.lane.b32.xlu1 %v758_v30, %s3043_s8  ;;  %v781_v20 = vsel %vm542_vm8, %v780_v14, %v779_v63  ;;  %v884_v39 = vsel %vm527_vm3, %v883_v4, %v882_v17  ;;  %v838_v22 = vrot.slane %v3413_v48, 3  ;;  %v868_v27 = vsel %vm536_vm6, %v867_v28, %v866_v61  ;;  %v3587_v4 = vpop.permute.xlu1 %1039 }
 0x13e   : > { %v886_v29 = vsel %vm530_vm4, %v885_v10, %v884_v39  ;;  %v840_v43 = vrot.slane %v3436_v3, 2  ;;  %v556_v30 = vrot.slane %v3425_v58, 7  ;;  %v842_v31 = vrot.slane %v3461_v26, 1  ;;  %5028 = vst [vmem:[#allocation18_spill] sm:$0xff] %v3587_v4 }
 0x13f   : > { %737 = vrot.lane.b32.xlu0 %v736_v11, %s3040_s11  ;;  %v554_v32 = vrot.slane %v3400_v41, 1  ;;  %v558_v50 = vrot.slane %v3449_v13, 6  ;;  %v603_v51 = vrot.slane %v3408_v45, 2  ;;  %v888_v48 = vsel %vm533_vm5, %v887_v6, %v886_v29 }
 0x140   : > { %v837_v28 = vsel %vm524_vm2, %v836_v16, %v835_v15  ;;  %v560_v52 = vrot.slane %v3472_v49, 5  ;;  %v605_v3 = vrot.slane %v3425_v58, 1  ;;  %v870_v56 = vrot.slane %v3419_v53, 7 }
 0x141   : > { %782 = vrot.lane.b32.xlu1 %v781_v20, %s3040_s11  ;;  %v839_v26 = vsel %vm527_vm3, %v838_v22, %v837_v28  ;;  %v555_v62 = vsel %vm524_vm2, %v3408_v45, %v554_v32  ;;  %v602_v57 = vrot.slane %v3400_v41, 3  ;;  %v869_v59 = vsel %vm539_vm7, %v3406_v44, %v868_v27 }
 0x142   : > { %v841_v60 = vsel %vm530_vm4, %v840_v43, %v839_v26  ;;  %v557_v1 = vsel %vm527_vm3, %v556_v30, %v555_v62  ;;  %v581_v2 = vrot.slane %v3408_v45, 1  ;;  %v890_v63 = vsel %vm536_vm6, %v889_v34, %v888_v48 }
 0x143   : > { %804 = vrot.lane.b32.xlu0 %v803_v21, %s3042_s23  ;;  %v843_v5 = vsel %vm533_vm5, %v842_v31, %v841_v60  ;;  %v559_v7 = vsel %vm530_vm4, %v558_v50, %v557_v1  ;;  %v604_v10 = vsel %vm524_vm2, %v603_v51, %v602_v57  ;;  %v608_v61 = vrot.slane %v3472_v49, 7  ;;  %v3620_v31 = vpop.permute.xlu0 %1081  ;;  %v3624_v50 = vpop.permute.xlu1 %1043 }
 0x144   : > { %v561_v14 = vsel %vm533_vm5, %v560_v52, %v559_v7  ;;  %v606_v0 = vsel %vm527_vm3, %v605_v3, %v604_v10  ;;  %v580_v15 = vrot.slane %v3400_v41, 2  ;;  %v3601_v17 = vsel %vm542_vm8, %v870_v56, %v869_v59  ;;  %5029 = vst [vmem:[#allocation19_spill] sm:$0xff] %v3620_v31 }
 0x145   : > { %786 = vrot.lane.b32.xlu1 %v781_v20, %s3041_s16  ;;  %v891_v34 = vrot.slane %v3406_v44, 1  ;;  %v562_v6 = vrot.slane %v3402_v42, 4  ;;  %v844_v16 = vsel %vm536_vm6, %v3398_v40, %v843_v5  ;;  %v845_v20 = vrot.slane %v3406_v44, 7 }
 0x146   : > { %v582_v39 = vsel %vm524_vm2, %v581_v2, %v580_v15  ;;  %v584_v22 = vrot.slane %v3449_v13, 7  ;;  %v607_v29 = vsel %vm530_vm4, %v3449_v13, %v606_v0  ;;  %v586_v43 = vrot.slane %v3472_v49, 6 }
 0x147   : > { %741 = vrot.lane.b32.xlu0 %v736_v11, %s3041_s16  ;;  %v892_v11 = vsel %vm539_vm7, %v891_v34, %v890_v63  ;;  %v563_v27 = vsel %vm536_vm6, %v562_v6, %v561_v14  ;;  %v847_v40 = vrot.slane %v3419_v53, 6  ;;  %v564_v44 = vrot.slane %v3410_v46, 3  ;;  %v3659_v34 = vpop.permute.xlu0 %1085  ;;  %v3663_v6 = vpop.permute.xlu1 %997 }
 0x148   : > { %v609_v30 = vsel %vm533_vm5, %v608_v61, %v607_v29  ;;  %v846_v32 = vsel %vm539_vm7, %v845_v20, %v844_v16  ;;  %v610_v51 = vrot.slane %v3402_v42, 6  ;;  %v583_v48 = vsel %vm527_vm3, %v3425_v58, %v582_v39  ;;  %5030 = vst [vmem:[#allocation20_spill] sm:$0xff] %v3663_v6 }
 0x149   : > { %872 = vrot.lane.b32.xlu1 %v3601_v17, %s3040_s11  ;;  %v523_v28 = vrot.slane %v3408_v45, 7  ;;  %v3632_v52 = vsel %vm542_vm8, %v3419_v53, %v892_v11  ;;  %v565_v3 = vsel %vm539_vm7, %v564_v44, %v563_v27  ;;  %v585_v56 = vsel %vm530_vm4, %v584_v22, %v583_v48 }
 0x14a   : > { %v566_v26 = vrot.slane %v3443_v8, 2  ;;  %v611_v62 = vsel %vm536_vm6, %v610_v51, %v609_v30  ;;  %v587_v57 = vsel %vm533_vm5, %v586_v43, %v585_v56  ;;  %v529_v59 = vrot.slane %v3449_v13, 5 }
 0x14b   : > { %809 = vrot.lane.b32.xlu0 %v803_v21, %s3043_s8  ;;  %v526_v21 = vrot.slane %v3425_v58, 6  ;;  %v848_v53 = vsel %vm542_vm8, %v847_v40, %v846_v32  ;;  %v612_v60 = vrot.slane %v3410_v46, 5  ;;  %v614_v1 = vrot.slane %v3443_v8, 4 }
 0x14c   : > { %v588_v2 = vrot.slane %v3402_v42, 5  ;;  %v3649_v63 = vsel %vm542_vm8, %v566_v26, %v565_v3  ;;  %v590_v5 = vrot.slane %v3410_v46, 4  ;;  %v525_v7 = vsel %vm524_vm2, %v523_v28, %v3400_v41 }
 0x14d   : > { %894 = vrot.lane.b32.xlu1 %v3632_v52, %s3042_s23  ;;  %v532_v10 = vrot.slane %v3472_v49, 4  ;;  %v613_v14 = vsel %vm539_vm7, %v612_v60, %v611_v62  ;;  %v528_v61 = vsel %vm527_vm3, %v526_v21, %v525_v7  ;;  %v693_v15 = vrot.slane %v3408_v45, 6  ;;  %v3690_v60 = vpop.permute.xlu0 %1041 }
 0x14e   : > { %v589_v0 = vsel %vm536_vm6, %v588_v2, %v587_v57  ;;  %v531_v16 = vsel %vm530_vm4, %v529_v59, %v528_v61  ;;  %v695_v20 = vrot.slane %v3425_v58, 5  ;;  %v647_v39 = vrot.slane %v3400_v41, 5 }
 0x14f   : > { %849 = vrot.lane.b32.xlu0 %v848_v53, %s3042_s23  ;;  %v648_v22 = vrot.slane %v3408_v45, 4  ;;  %v692_v11 = vrot.slane %v3400_v41, 7  ;;  %v697_v27 = vrot.slane %v3449_v13, 4  ;;  %v650_v29 = vrot.slane %v3425_v58, 3 }
 0x150   : > { %v652_v43 = vrot.slane %v3449_v13, 2  ;;  %v534_v40 = vsel %vm533_vm5, %v532_v10, %v531_v16  ;;  %v699_v44 = vrot.slane %v3472_v49, 3  ;;  %v654_v32 = vrot.slane %v3472_v49, 1 }
 0x151   : > { %575 = vrot.lane.b32.xlu1 %v3649_v63, %s3043_s8  ;;  %v649_v30 = vsel %vm524_vm2, %v648_v22, %v647_v39  ;;  %v615_v51 = vsel %vm542_vm8, %v614_v1, %v613_v14  ;;  %v535_v48 = vrot.slane %v3402_v42, 3  ;;  %v694_v28 = vsel %vm524_vm2, %v693_v15, %v692_v11  ;;  %v3694_v1 = vpop.permute.xlu1 %1001 }
 0x152   : > { %v651_v3 = vsel %vm527_vm3, %v650_v29, %v649_v30  ;;  %v591_v56 = vsel %vm539_vm7, %v590_v5, %v589_v0  ;;  %v696_v21 = vsel %vm527_vm3, %v695_v20, %v694_v28  ;;  %v592_v62 = vrot.slane %v3443_v8, 3 }
 0x153   : > { %854 = vrot.lane.b32.xlu0 %v848_v53, %s3043_s8  ;;  %v653_v26 = vsel %vm530_vm4, %v652_v43, %v651_v3  ;;  %v537_v57 = vsel %vm536_vm6, %v535_v48, %v534_v40  ;;  %v698_v59 = vsel %vm530_vm4, %v697_v27, %v696_v21  ;;  %v538_v2 = vrot.slane %v3410_v46, 2 }
 0x154   : > { %v655_v53 = vsel %vm533_vm5, %v654_v32, %v653_v26  ;;  %v700_v5 = vsel %vm533_vm5, %v699_v44, %v698_v59  ;;  %v593_v10 = vsel %vm542_vm8, %v592_v62, %v591_v56  ;;  %v701_v14 = vrot.slane %v3402_v42, 2 }
 0x155   : > { %621 = vrot.lane.b32.xlu1 %v615_v51, %s3043_s8  ;;  %v656_v7 = vsel %vm536_vm6, %v3402_v42, %v655_v53  ;;  %v671_v0 = vrot.slane %v3408_v45, 5  ;;  %v540_v61 = vsel %vm539_vm7, %v538_v2, %v537_v57  ;;  %v541_v15 = vrot.slane %v3443_v8, 1  ;;  %v3718_v29 = vpop.permute.xlu1 %1173 }
 0x156   : > { %v702_v16 = vsel %vm536_vm6, %v701_v14, %v700_v5  ;;  %v670_v20 = vrot.slane %v3400_v41, 6  ;;  %v675_v39 = vrot.slane %v3449_v13, 3  ;;  %v703_v22 = vrot.slane %v3410_v46, 1 }
 0x157   : > { %876 = vrot.lane.b32.xlu0 %v3601_v17, %s3041_s16  ;;  %v673_v17 = vrot.slane %v3425_v58, 4  ;;  %v677_v45 = vrot.slane %v3472_v49, 2  ;;  %v543_v11 = vsel %vm542_vm8, %v541_v15, %v540_v61  ;;  %v3716_v58 = vpop.permute.xlu0 %999  ;;  %v679_v40 = vrot.slane %v3402_v42, 1 }
 0x158   : > { %v672_v27 = vsel %vm524_vm2, %v671_v0, %v670_v20  ;;  %v704_v41 = vsel %vm539_vm7, %v703_v22, %v702_v16  ;;  %v682_v48 = vrot.slane %v3443_v8, 7  ;;  %v657_v56 = vrot.slane %v3410_v46, 7 }
 0x159   : > { %598 = vrot.lane.b32.xlu1 %v593_v10, %s3041_s16  ;;  %v674_v13 = vsel %vm527_vm3, %v673_v17, %v672_v27  ;;  %v705_v43 = vsel %vm542_vm8, %v3443_v8, %v704_v41  ;;  %v3734_v32 = vpop.permute.xlu1 %1177  ;;  %v659_v21 = vrot.slane %v3443_v8, 6  ;;  %vm1013_vm2 = vcmask 15360  }
 0x15a   : > { %vm1478_vm3 = vcmask 515072  }
 0x15b   : > { %899 = vrot.lane.b32.xlu0 %v3632_v52, %s3043_s8  ;;  %v676_v52 = vsel %vm530_vm4, %v675_v39, %v674_v13  ;;  %v3732_v30 = vpop.permute.xlu0 %1171  ;;  %vm1400_vm4 = vcmask 769024  }
 0x15c   : > { %v678_v49 = vsel %vm533_vm5, %v677_v45, %v676_v52  ;;  %vm1356_vm5 = vcmask 777216  }
 0x15d   : > { %549 = vrot.lane.b32.xlu1 %v543_v11, %s3041_s16  ;;  %v680_v44 = vsel %vm536_vm6, %v679_v40, %v678_v49  ;;  %v3745_v3 = vpop.permute.xlu1 %1131  ;;  %vm1321_vm6 = vcmask 785408  }
 0x15f   : > { %568 = vrot.lane.b32.xlu0 %v3649_v63, %s3042_s23  ;;  %v681_v63 = vsel %vm539_vm7, %v3410_v46, %v680_v44  ;;  %v3743_v28 = vpop.permute.xlu0 %1175 }
 0x160   : > { %v683_v42 = vsel %vm542_vm8, %v682_v48, %v681_v63 }
 0x161   : > { %706 = vrot.lane.b32.xlu1 %v705_v43, %s3042_s23  ;;  %v3756_v57 = vpop.permute.xlu1 %1089 }
 0x163   : > { %616 = vrot.lane.b32.xlu0 %v615_v51, %s3042_s23  ;;  %v658_v51 = vsel %vm539_vm7, %v657_v56, %v656_v7  ;;  %v3754_v62 = vpop.permute.xlu0 %1129  ;;  %vm1277_vm7 = vcmask 1031168  }
 0x164   : > { %v660_v26 = vsel %vm542_vm8, %v659_v21, %v658_v51  ;;  %vm1233_vm8 = vcmask 1039360  }
 0x165   : > { %711 = vrot.lane.b32.xlu1 %v705_v43, %s3043_s8  ;;  %v3762_v46 = vpop.permute.xlu1 %1135 }
 0x167   : > { %594 = vrot.lane.b32.xlu0 %v593_v10, %s3040_s11  ;;  %v3759_v59 = vpop.permute.xlu0 %1087 }
 0x169   : > { %684 = vrot.lane.b32.xlu1 %v683_v42, %s3040_s11  ;;  %v3766_v2 = vpop.permute.xlu1 %1091 }
 0x16b   : > { %544 = vrot.lane.b32.xlu0 %v543_v11, %s3040_s11  ;;  %v3764_v53 = vpop.permute.xlu0 %1133 }
 0x16d   : > { %688 = vrot.lane.b32.xlu1 %v683_v42, %s3041_s16  ;;  %v3770_v5 = vpop.permute.xlu1 %1047 }
 0x16f   : > { %661 = vrot.lane.b32.xlu0 %v660_v26, %s3042_s23  ;;  %v3768_v8 = vpop.permute.xlu0 %1093 }
 0x171   : > { %v3774_v10 = vpop.permute.xlu1 %1003 }
 0x173   : > { %666 = vrot.lane.b32.xlu0 %v660_v26, %s3043_s8  ;;  %v3772_v7 = vpop.permute.xlu0 %1045 }
 0x175   : > { %v3778_v0 = vpop.permute.xlu1 %1049 }
 0x177   : > { %v3776_v14 = vpop.permute.xlu0 %1005 }
 0x179   : > { %v3782_v17 = vpop.permute.xlu1 %1007 }
 0x17b   : > { %v3780_v61 = vpop.permute.xlu0 %1051 }
 0x17d   : > { %v3786_v16 = vpop.permute.xlu1 %1179 }
 0x17e   : > { %5031 = vst [vmem:[#allocation21_spill] sm:$0xff] %v3786_v16 }
 0x17f   : > { %v3784_v15 = vpop.permute.xlu0 %1009 }
 0x181   : > { %v3790_v39 = vpop.permute.xlu1 %1095 }
 0x182   : > { %5033 = vst [vmem:[#allocation23_spill] sm:$0xff] %v3790_v39 }
 0x183   : > { %v3788_v20 = vpop.permute.xlu0 %1137 }
 0x184   : > { %5032 = vst [vmem:[#allocation22_spill] sm:$0xff] %v3788_v20 }
 0x185   : > { %v3794_v45 = vpop.permute.xlu1 %1011 }
 0x186   : > { %5035 = vst [vmem:[#allocation25_spill] sm:$0xff] %v3794_v45 }
 0x187   : > { %v3792_v22 = vpop.permute.xlu0 %1053 }
 0x188   : > { %5034 = vst [vmem:[#allocation24_spill] sm:$0xff] %v3792_v22 }
 0x1a5   : > { %v828_v11 = vpop.permute.xlu0 %827 }
 0x1a7   : > { %v640_v27 = vpop.permute.xlu1 %639 }
 0x1a9   : > { %v832_v41 = vpop.permute.xlu0 %831 }
 0x1ab   : > { %v760_v13 = vpop.permute.xlu1 %759 }
 0x1ac   : > { %763 = vst.msk [vmem:[#allocation2 + $0x28] sm:$0xff] %vm573_vm9, %v760_v13 }
 0x1ad   : > { %v644_v52 = vpop.permute.xlu0 %643 }
 0x1af   : > { %v765_v49 = vpop.permute.xlu1 %764 }
 0x1b0   : > { %767 = vst.msk [vmem:[#allocation2 + $0x28] sm:$0xff] %vm578_vm10, %v765_v49 }
 0x1b1   : > { %v738_v43 = vpop.permute.xlu0 %737 }
 0x1b3   : > { %v783_v40 = vpop.permute.xlu1 %782 }
 0x1b4   : > { %785 = vst.msk [vmem:[#allocation2 + $0x28] sm:$0xff] %vm547_vm11, %v783_v40 }
 0x1b5   : > { %v805_v44 = vpop.permute.xlu0 %804 }
 0x1b6   : > { %808 = vst.msk [vmem:[#allocation2 + $0x30] sm:$0xff] %vm573_vm9, %v805_v44 }
 0x1b7   : > { %v787_v63 = vpop.permute.xlu1 %786 }
 0x1b8   : > { %789 = vst.msk [vmem:[#allocation2 + $0x28] sm:$0xff] %vm552_vm12, %v787_v63 }
 0x1b9   : > { %807 = vst.msk [vmem:[#allocation2 + $0x28] sm:$0xff] %vm571_vm13, %v805_v44  ;;  %v742_v48 = vpop.permute.xlu0 %741 }
 0x1bb   : > { %v873_v42 = vpop.permute.xlu1 %872 }
 0x1bd   : > { %v810_v56 = vpop.permute.xlu0 %809 }
 0x1be   : > { %812 = vst.msk [vmem:[#allocation2 + $0x30] sm:$0xff] %vm578_vm10, %v810_v56 }
 0x1bf   : > { %830 = vst.msk [vmem:[#allocation2 + $0x30] sm:$0xff] %vm547_vm11, %v828_v11  ;;  %v895_v51 = vpop.permute.xlu1 %894 }
 0x1c0   : > { %834 = vst.msk [vmem:[#allocation2 + $0x30] sm:$0xff] %vm552_vm12, %v832_v41 }
 0x1c1   : > { %898 = vst.msk [vmem:[#allocation2 + $0x40] sm:$0xff] %vm573_vm9, %v895_v51  ;;  %v850_v21 = vpop.permute.xlu0 %849 }
 0x1c2   : > { %852 = vst.msk [vmem:[#allocation2 + $0x30] sm:$0xff] %vm571_vm13, %v850_v21 }
 0x1c3   : > { %853 = vst.msk [vmem:[#allocation2 + $0x38] sm:$0xff] %vm573_vm9, %v850_v21  ;;  %v576_v26 = vpop.permute.xlu1 %575 }
 0x1c5   : > { %v855_v49 = vpop.permute.xlu0 %854 }
 0x1c6   : > { %857 = vst.msk [vmem:[#allocation2 + $0x38] sm:$0xff] %vm578_vm10, %v855_v49 }
 0x1c7   : > { %875 = vst.msk [vmem:[#allocation2 + $0x38] sm:$0xff] %vm547_vm11, %v873_v42  ;;  %v622_v40 = vpop.permute.xlu1 %621 }
 0x1c9   : > { %v877_v44 = vpop.permute.xlu0 %876 }
 0x1ca   : > { %879 = vst.msk [vmem:[#allocation2 + $0x38] sm:$0xff] %vm552_vm12, %v877_v44 }
 0x1cb   : > { %897 = vst.msk [vmem:[#allocation2 + $0x38] sm:$0xff] %vm571_vm13, %v895_v51  ;;  %v599_v11 = vpop.permute.xlu1 %598 }
 0x1cd   : > { %v900_v41 = vpop.permute.xlu0 %899 }
 0x1ce   : > { %902 = vst.msk [vmem:[#allocation2 + $0x40] sm:$0xff] %vm578_vm10, %v900_v41  ;;  %v3852_v41 = vld [vmem:[#allocation2 + $0x28] sm:$0xff] }
 0x1cf   : > { %v550_v63 = vpop.permute.xlu1 %549 }
 0x1d1   : > { %v569_v56 = vpop.permute.xlu0 %568 }
 0x1d2   : > { %574 = vst.msk [vmem:[#allocation2 + $0x8] sm:$0xff] %vm573_vm9, %v569_v56 }
 0x1d3   : > { %579 = vst.msk [vmem:[#allocation2 + $0x8] sm:$0xff] %vm578_vm10, %v576_v26  ;;  %v707_v21 = vpop.permute.xlu1 %706 }
 0x1d4   : > { %710 = vst.msk [vmem:[#allocation2 + $0x20] sm:$0xff] %vm573_vm9, %v707_v21 }
 0x1d5   : > { %v617_v42 = vpop.permute.xlu0 %616  ;;  %v3816_v49 = vld [vmem:[#allocation2 + $0x40] sm:$0xff] }
 0x1d6   : > { %620 = vst.msk [vmem:[#allocation2 + $0x10] sm:$0xff] %vm573_vm9, %v617_v42  ;;  %1476 = vrot.lane.b32.xlu1 %v3816_v49, %s3044_s2  ;;  %v1205_v26 = vmul.f32 %v3786_v16, %v3816_v49 }
 0x1d7   : > { %624 = vst.msk [vmem:[#allocation2 + $0x10] sm:$0xff] %vm578_vm10, %v622_v40  ;;  %v712_v51 = vpop.permute.xlu1 %711 }
 0x1d8   : > { %642 = vst.msk [vmem:[#allocation2 + $0x10] sm:$0xff] %vm547_vm11, %v640_v27  ;;  %v1164_v27 = vmul.f32 %v3788_v20, %v3816_v49 }
 0x1d9   : > { %714 = vst.msk [vmem:[#allocation2 + $0x20] sm:$0xff] %vm578_vm10, %v712_v51  ;;  %v595_v44 = vpop.permute.xlu0 %594 }
 0x1da   : > { %646 = vst.msk [vmem:[#allocation2 + $0x10] sm:$0xff] %vm552_vm12, %v644_v52  ;;  %1520 = vrot.lane.b32.xlu1 %v1205_v26, %s3045_s12 }
 0x1db   : > { %740 = vst.msk [vmem:[#allocation2 + $0x20] sm:$0xff] %vm547_vm11, %v738_v43  ;;  %597 = vst.msk [vmem:[#allocation2 + $0x8] sm:$0xff] %vm547_vm11, %v595_v44  ;;  %v685_v43 = vpop.permute.xlu1 %684 }
 0x1dc   : > { %744 = vst.msk [vmem:[#allocation2 + $0x20] sm:$0xff] %vm552_vm12, %v742_v48  ;;  %601 = vst.msk [vmem:[#allocation2 + $0x8] sm:$0xff] %vm552_vm12, %v599_v11 }
 0x1dd   : > { %762 = vst.msk [vmem:[#allocation2 + $0x20] sm:$0xff] %vm571_vm13, %v760_v13  ;;  %619 = vst.msk [vmem:[#allocation2 + $0x8] sm:$0xff] %vm571_vm13, %v617_v42  ;;  %v545_v52 = vpop.permute.xlu0 %544 }
 0x1de   : > { %548 = vst.msk [vmem:[#allocation2] sm:$0xff] %vm547_vm11, %v545_v52  ;;  %1442 = vrot.lane.b32.xlu1 %v1164_v27, %s3036_s18 }
 0x1df   : > { %553 = vst.msk [vmem:[#allocation2] sm:$0xff] %vm552_vm12, %v550_v63  ;;  %v689_v40 = vpop.permute.xlu1 %688  ;;  %v3858_v63 = vld [vmem:[#allocation2 + $0x30] sm:$0xff] }
 0x1e0   : > { %572 = vst.msk [vmem:[#allocation2] sm:$0xff] %vm571_vm13, %v569_v56  ;;  %5036 = vst [vmem:[#allocation26_spill] sm:$0xff] %v3858_v63  ;;  %v3868_v56 = vld [vmem:[#allocation2 + $0x38] sm:$0xff] }
 0x1e1   : > { %v662_v48 = vpop.permute.xlu0 %661  ;;  %5037 = vst [vmem:[#allocation27_spill] sm:$0xff] %v3868_v56 }
 0x1e2   : > { %664 = vst.msk [vmem:[#allocation2 + $0x10] sm:$0xff] %vm571_vm13, %v662_v48 }
 0x1e3   : > { %665 = vst.msk [vmem:[#allocation2 + $0x18] sm:$0xff] %vm573_vm9, %v662_v48  ;;  %v3912_v48 = vsel %vm513_vm1, %v3743_v28, %v3734_v32  ;;  %vm1546_vm9 = vcmask 588800  }
 0x1e4   : > { %v3876_v42 = vld [vmem:[#allocation2 + $0x8] sm:$0xff]  ;;  %5038 = vst [vmem:[#allocation28_spill] sm:$0xff] %v3912_v48 }
 0x1e5   : > { %v667_v13 = vpop.permute.xlu0 %666 }
 0x1e6   : > { %669 = vst.msk [vmem:[#allocation2 + $0x18] sm:$0xff] %vm578_vm10, %v667_v13  ;;  %v1203_v13 = vmul.f32 %v3912_v48, %v3858_v63  ;;  %vm1892_vm10 = vcmask 1047816  }
 0x1e7   : > { %687 = vst.msk [vmem:[#allocation2 + $0x18] sm:$0xff] %vm547_vm11, %v685_v43  ;;  %v3844_v11 = vld [vmem:[#allocation2] sm:$0xff]  ;;  %vm1875_vm11 = vcmask 269312  }
 0x1e8   : > { %691 = vst.msk [vmem:[#allocation2 + $0x18] sm:$0xff] %vm552_vm12, %v689_v40  ;;  %1338 = vrot.lane.b32.xlu0 %v3844_v11, %s3046_s15  ;;  %1460 = vrot.lane.b32.xlu1 %v3844_v11, %s3044_s2  ;;  %v1114_v51 = vmul.f32 %v3620_v31, %v3844_v11  ;;  %v1156_v44 = vmul.f32 %v3552_v19, %v3844_v11  ;;  %v3903_v43 = vld [vmem:[#allocation2 + $0x20] sm:$0xff] }
 0x1e9   : > { %709 = vst.msk [vmem:[#allocation2 + $0x18] sm:$0xff] %vm571_vm13, %v707_v21  ;;  %v1197_v21 = vmul.f32 %v3459_v25, %v3844_v11  ;;  %v3883_v26 = vld [vmem:[#allocation2 + $0x10] sm:$0xff]  ;;  %v1072_v27 = vmul.f32 %v3587_v4, %v3844_v11  ;;  %v1030_v52 = vmul.f32 %v3663_v6, %v3844_v11 }
 0x1ec   : > { %1470 = vrot.lane.b32.xlu0 %v3852_v41, %s3044_s2  ;;  %1215 = vrot.lane.b32.xlu1 %v3844_v11, %s3047_s19 }
 0x1f0   : > { %1348 = vrot.lane.b32.xlu0 %v3852_v41, %s3046_s15  ;;  %1472 = vrot.lane.b32.xlu1 %v3858_v63, %s3044_s2  ;;  %v3916_v40 = vld [vmem:[#allocation2 + $0x18] sm:$0xff] }
 0x1f4   : > { %1225 = vrot.lane.b32.xlu0 %v3852_v41, %s3047_s19  ;;  %1350 = vrot.lane.b32.xlu1 %v3858_v63, %s3046_s15 }
 0x1f8   : > { %1474 = vrot.lane.b32.xlu0 %v3868_v56, %s3044_s2  ;;  %1227 = vrot.lane.b32.xlu1 %v3858_v63, %s3047_s19 }
 0x1fc   : > { %1462 = vrot.lane.b32.xlu1 %v3876_v42, %s3044_s2  ;;  %1504 = vrot.lane.b32.xlu0 %v1197_v21, %s3045_s12  ;;  %v3924_v21 = vsel %vm513_vm1, %v3718_v29, %v3743_v28  ;;  %v3940_v28 = vsel %vm1139_vm14, %v3745_v3, %v3764_v53 }
 0x1fd   : > { %5039 = vst [vmem:[#allocation29_spill] sm:$0xff] %v3924_v21  ;;  %5041 = vst [vmem:[#allocation31_spill] sm:$0xff] %v3940_v28 }
 0x200   : > { %1382 = vrot.lane.b32.xlu1 %v1114_v51, %s3048_s29  ;;  %1464 = vrot.lane.b32.xlu0 %v3883_v26, %s3044_s2  ;;  %v3929_v51 = vsel %vm1139_vm14, %v3764_v53, %v3762_v46  ;;  %v3960_v53 = vsel %vm1097_vm15, %v3756_v57, %v3766_v2 }
 0x201   : > { %5040 = vst [vmem:[#allocation30_spill] sm:$0xff] %v3929_v51  ;;  %5043 = vst [vmem:[#allocation33_spill] sm:$0xff] %v3960_v53 }
 0x204   : > { %1342 = vrot.lane.b32.xlu1 %v3883_v26, %s3046_s15  ;;  %1426 = vrot.lane.b32.xlu0 %v1156_v44, %s3036_s18  ;;  %v1162_v44 = vmul.f32 %v3929_v51, %v3858_v63 }
 0x208   : > { %1303 = vrot.lane.b32.xlu1 %v1072_v27, %s3049_s17  ;;  %1340 = vrot.lane.b32.xlu0 %v3876_v42, %s3046_s15  ;;  %v1202_v27 = vmul.f32 %v3924_v21, %v3852_v41 }
 0x20c   : > { %1217 = vrot.lane.b32.xlu1 %v3876_v42, %s3047_s19  ;;  %1259 = vrot.lane.b32.xlu0 %v1030_v52, %s3050_s9  ;;  %v1161_v52 = vmul.f32 %v3940_v28, %v3852_v41 }
 0x210   : > { %1468 = vrot.lane.b32.xlu1 %v3903_v43, %s3044_s2  ;;  %1219 = vrot.lane.b32.xlu0 %v3883_v26, %s3047_s19 }
 0x214   : > { %1516 = vrot.lane.b32.xlu1 %v1203_v13, %s3045_s12  ;;  %1466 = vrot.lane.b32.xlu0 %v3916_v40, %s3044_s2  ;;  %v3950_v13 = vsel %vm1097_vm15, %v3766_v2, %v3768_v8  ;;  %v3976_v2 = vsel %vm1055_vm0, %v3770_v5, %v3778_v0 }
 0x215   : > { %5042 = vst [vmem:[#allocation32_spill] sm:$0xff] %v3950_v13  ;;  %5045 = vst [vmem:[#allocation35_spill] sm:$0xff] %v3976_v2 }
 0x218   : > { %1438 = vrot.lane.b32.xlu1 %v1162_v44, %s3036_s18  ;;  %1514 = vrot.lane.b32.xlu0 %v1202_v27, %s3045_s12  ;;  %v1120_v44 = vmul.f32 %v3950_v13, %v3858_v63  ;;  %v3965_v27 = vsel %vm1055_vm0, %v3778_v0, %v3780_v61  ;;  %v1119_v13 = vmul.f32 %v3960_v53, %v3852_v41 }
 0x219   : > { %5044 = vst [vmem:[#allocation34_spill] sm:$0xff] %v3965_v27  ;;  %v3996_v0 = vsel %vm513_vm1, %v3521_v47, %v3491_v9 }
 0x21a   : > { %5047 = vst [vmem:[#allocation37_spill] sm:$0xff] %v3996_v0 }
 0x21c   : > { %1346 = vrot.lane.b32.xlu1 %v3903_v43, %s3046_s15  ;;  %1436 = vrot.lane.b32.xlu0 %v1161_v52, %s3036_s18  ;;  %v1078_v52 = vmul.f32 %v3965_v27, %v3858_v63  ;;  %v1199_v27 = vmul.f32 %v3996_v0, %v3883_v26 }
 0x220   : > { %1394 = vrot.lane.b32.xlu1 %v1120_v44, %s3048_s29  ;;  %1344 = vrot.lane.b32.xlu0 %v3916_v40, %s3046_s15  ;;  %v1077_v44 = vmul.f32 %v3976_v2, %v3852_v41 }
 0x224   : > { %1315 = vrot.lane.b32.xlu1 %v1078_v52, %s3049_s17  ;;  %1392 = vrot.lane.b32.xlu0 %v1119_v13, %s3048_s29  ;;  %v3986_v52 = vsel %vm1013_vm2, %v3782_v17, %v3784_v15 }
 0x225   : > { %5046 = vst [vmem:[#allocation36_spill] sm:$0xff] %v3986_v52  ;;  %v1036_v13 = vmul.f32 %v3986_v52, %v3858_v63 }
 0x228   : > { %1223 = vrot.lane.b32.xlu1 %v3903_v43, %s3047_s19  ;;  %1313 = vrot.lane.b32.xlu0 %v1077_v44, %s3049_s17  ;;  %v4001_v44 = vsel %vm1013_vm2, %v3776_v14, %v3782_v17  ;;  %v4017_v17 = vsel %vm513_vm1, %v3734_v32, %v3786_v16  ;;  %v4033_v32 = vsel %vm1139_vm14, %v3762_v46, %v3788_v20 }
 0x229   : > { %5048 = vst [vmem:[#allocation38_spill] sm:$0xff] %v4001_v44  ;;  %v1035_v52 = vmul.f32 %v4001_v44, %v3852_v41  ;;  %5050 = vst [vmem:[#allocation40_spill] sm:$0xff] %v4017_v17  ;;  %v1204_v44 = vmul.f32 %v4017_v17, %v3868_v56  ;;  %v1163_v51 = vmul.f32 %v4033_v32, %v3868_v56 }
 0x22a   : > { %5052 = vst [vmem:[#allocation42_spill] sm:$0xff] %v4033_v32  ;;  %v4049_v46 = vsel %vm1055_vm0, %v3587_v4, %v3690_v60 }
 0x22b   : > { %5054 = vst [vmem:[#allocation44_spill] sm:$0xff] %v4049_v46 }
 0x22c   : > { %1271 = vrot.lane.b32.xlu1 %v1036_v13, %s3050_s9  ;;  %1221 = vrot.lane.b32.xlu0 %v3916_v40, %s3047_s19  ;;  %v4012_v13 = vsel %vm1139_vm14, %v3526_v55, %v3584_v54 }
 0x22d   : > { %5049 = vst [vmem:[#allocation39_spill] sm:$0xff] %v4012_v13  ;;  %v1158_v2 = vmul.f32 %v4012_v13, %v3883_v26 }
 0x230   : > { %1508 = vrot.lane.b32.xlu1 %v1199_v27, %s3045_s12  ;;  %1269 = vrot.lane.b32.xlu0 %v1035_v52, %s3050_s9  ;;  %v4028_v27 = vsel %vm1097_vm15, %v3620_v31, %v3556_v12 }
 0x231   : > { %5051 = vst [vmem:[#allocation41_spill] sm:$0xff] %v4028_v27  ;;  %v1115_v52 = vmul.f32 %v4028_v27, %v3876_v42 }
 0x234   : > { %1430 = vrot.lane.b32.xlu1 %v1158_v2, %s3036_s18  ;;  %1518 = vrot.lane.b32.xlu0 %v1204_v44, %s3045_s12  ;;  %v4044_v2 = vsel %vm513_vm1, %v3459_v25, %v3521_v47  ;;  %v1073_v44 = vmul.f32 %v4049_v46, %v3876_v42  ;;  %v4060_v47 = vsel %vm1139_vm14, %v3552_v19, %v3526_v55 }
 0x235   : > { %5053 = vst [vmem:[#allocation43_spill] sm:$0xff] %v4044_v2  ;;  %v1198_v48 = vmul.f32 %v4044_v2, %v3876_v42  ;;  %5055 = vst [vmem:[#allocation45_spill] sm:$0xff] %v4060_v47  ;;  %v1157_v53 = vmul.f32 %v4060_v47, %v3876_v42  ;;  %v4076_v55 = vsel %vm1097_vm15, %v3556_v12, %v3659_v34 }
 0x236   : > { %5057 = vst [vmem:[#allocation47_spill] sm:$0xff] %v4076_v55  ;;  %v1116_v32 = vmul.f32 %v4076_v55, %v3883_v26  ;;  %v4092_v12 = vsel %vm1055_vm0, %v3690_v60, %v3624_v50  ;;  %v4108_v60 = vsel %vm1013_vm2, %v3663_v6, %v3716_v58 }
 0x237   : > { %5059 = vst [vmem:[#allocation49_spill] sm:$0xff] %v4092_v12  ;;  %5061 = vst [vmem:[#allocation51_spill] sm:$0xff] %v4108_v60 }
 0x238   : > { %1384 = vrot.lane.b32.xlu1 %v1115_v52, %s3048_s29  ;;  %1440 = vrot.lane.b32.xlu0 %v1163_v51, %s3036_s18  ;;  %v4065_v51 = vsel %vm1013_vm2, %v3716_v58, %v3694_v1  ;;  %v4126_v58 = vsel %vm513_vm1, %v3491_v9, %v3732_v30  ;;  %v4144_v9 = vsel %vm1139_vm14, %v3584_v54, %v3754_v62 }
 0x239   : > { %5056 = vst [vmem:[#allocation46_spill] sm:$0xff] %v4065_v51  ;;  %v1032_v52 = vmul.f32 %v4065_v51, %v3883_v26  ;;  %5063 = vst [vmem:[#allocation53_spill] sm:$0xff] %v4126_v58  ;;  %v1200_v28 = vmul.f32 %v4126_v58, %v3916_v40  ;;  %v4160_v54 = vsel %vm1097_vm15, %v3659_v34, %v3759_v59 }
 0x23a   : > { %5065 = vst [vmem:[#allocation55_spill] sm:$0xff] %v4144_v9  ;;  %5067 = vst [vmem:[#allocation57_spill] sm:$0xff] %v4160_v54 }
 0x23c   : > { %1305 = vrot.lane.b32.xlu1 %v1073_v44, %s3049_s17  ;;  %1506 = vrot.lane.b32.xlu0 %v1198_v48, %s3045_s12  ;;  %v4081_v48 = vsel %vm513_vm1, %v3732_v30, %v3718_v29  ;;  %v4097_v29 = vsel %vm1139_vm14, %v3754_v62, %v3745_v3  ;;  %v4113_v3 = vsel %vm1097_vm15, %v3759_v59, %v3756_v57  ;;  %vm1522_vm1 = vcmask 506880  }
 0x23d   : > { %5058 = vst [vmem:[#allocation48_spill] sm:$0xff] %v4081_v48  ;;  %v1201_v44 = vmul.f32 %v4081_v48, %v3903_v43  ;;  %5060 = vst [vmem:[#allocation50_spill] sm:$0xff] %v4097_v29  ;;  %v4131_v57 = vsel %vm1055_vm0, %v3772_v7, %v3770_v5  ;;  %v4149_v30 = vsel %vm1013_vm2, %v3774_v10, %v3776_v14 }
 0x23e   : > { %5062 = vst [vmem:[#allocation52_spill] sm:$0xff] %v4113_v3  ;;  %5064 = vst [vmem:[#allocation54_spill] sm:$0xff] %v4131_v57  ;;  %v1034_v5 = vmul.f32 %v4149_v30, %v3903_v43  ;;  %v1122_v14 = vmul.f32 %v3790_v39, %v3816_v49 }
 0x23f   : > { %5066 = vst [vmem:[#allocation56_spill] sm:$0xff] %v4149_v30 }
 0x240   : > { %1263 = vrot.lane.b32.xlu1 %v1032_v52, %s3050_s9  ;;  %1428 = vrot.lane.b32.xlu0 %v1157_v53, %s3036_s18  ;;  %v1160_v53 = vmul.f32 %v4097_v29, %v3903_v43  ;;  %v1074_v52 = vmul.f32 %v4092_v12, %v3883_v26 }
 0x244   : > { %1512 = vrot.lane.b32.xlu1 %v1201_v44, %s3045_s12  ;;  %1386 = vrot.lane.b32.xlu0 %v1116_v32, %s3048_s29  ;;  %v1118_v44 = vmul.f32 %v4113_v3, %v3903_v43 }
 0x248   : > { %1434 = vrot.lane.b32.xlu1 %v1160_v53, %s3036_s18  ;;  %1307 = vrot.lane.b32.xlu0 %v1074_v52, %s3049_s17  ;;  %v4115_v32 = vpop.permute.xlu1 %1476  ;;  %v1031_v53 = vmul.f32 %v4108_v60, %v3876_v42  ;;  %v1076_v52 = vmul.f32 %v4131_v57, %v3903_v43 }
 0x24c   : > { %1390 = vrot.lane.b32.xlu1 %v1118_v44, %s3048_s29  ;;  %1261 = vrot.lane.b32.xlu0 %v1031_v53, %s3050_s9  ;;  %v4137_v17 = vpop.permute.xlu1 %1520  ;;  %v1159_v44 = vmul.f32 %v4144_v9, %v3916_v40  ;;  %v4173_v53 = vsel %vm1055_vm0, %v3624_v50, %v3772_v7  ;;  %v1080_v7 = vmul.f32 %v3792_v22, %v3816_v49 }
 0x24d   : > { %5069 = vst [vmem:[#allocation59_spill] sm:$0xff] %v4173_v53  ;;  %v1075_v59 = vmul.f32 %v4173_v53, %v3916_v40 }
 0x250   : > { %1311 = vrot.lane.b32.xlu1 %v1076_v52, %s3049_s17  ;;  %1510 = vrot.lane.b32.xlu0 %v1200_v28, %s3045_s12  ;;  %v4162_v62 = vpop.permute.xlu1 %1442  ;;  %v1117_v28 = vmul.f32 %v4160_v54, %v3916_v40 }
 0x251   : > { %5068 = vst [vmem:[#allocation58_spill] sm:$0xff] %v4162_v62 }
 0x254   : > { %1267 = vrot.lane.b32.xlu1 %v1034_v5, %s3050_s9  ;;  %1432 = vrot.lane.b32.xlu0 %v1159_v44, %s3036_s18  ;;  %v4187_v5 = vsel %vm1013_vm2, %v3694_v1, %v3774_v10 }
 0x255   : > { %5070 = vst [vmem:[#allocation60_spill] sm:$0xff] %v4187_v5 }
 0x258   : > { %1398 = vrot.lane.b32.xlu1 %v1122_v14, %s3048_s29  ;;  %1388 = vrot.lane.b32.xlu0 %v1117_v28, %s3048_s29  ;;  %v1033_v14 = vmul.f32 %v4187_v5, %v3916_v40  ;;  %v4202_v28 = vsel %vm1097_vm15, %v3768_v8, %v3790_v39  ;;  %v4225_v8 = vsel %vm1055_vm0, %v3780_v61, %v3792_v22  ;;  %v3051_v39 = vmov 0  }
 0x259   : > { %5071 = vst [vmem:[#allocation61_spill] sm:$0xff] %v4202_v28  ;;  %v1121_v20 = vmul.f32 %v4202_v28, %v3868_v56  ;;  %5072 = vst [vmem:[#allocation62_spill] sm:$0xff] %v4225_v8  ;;  %2877 = vset.pattern.permute.xlu0 %v3051_v39 }
 0x25a   : > { %v4175_v52 = vpop.permute.xlu1 %1460  ;;  %v4177_v34 = vpop.permute.xlu0 %1338 }
 0x25c   : > { %1354 = vrot.lane.b32.xlu1 %v3816_v49, %s3046_s15  ;;  %1309 = vrot.lane.b32.xlu0 %v1075_v59, %s3049_s17  ;;  %v1038_v59 = vmul.f32 %v3794_v45, %v3816_v49 }
 0x25e   : > { %v4189_v44 = vpop.permute.xlu1 %1215  ;;  %v4191_v50 = vpop.permute.xlu0 %1470 }
 0x260   : > { %1319 = vrot.lane.b32.xlu1 %v1080_v7, %s3049_s17  ;;  %1265 = vrot.lane.b32.xlu0 %v1033_v14, %s3050_s9 }
 0x262   : > { %v4204_v1 = vpop.permute.xlu1 %1472  ;;  %v4206_v10 = vpop.permute.xlu0 %1348 }
 0x264   : > { %1275 = vrot.lane.b32.xlu1 %v1038_v59, %s3050_s9  ;;  %1396 = vrot.lane.b32.xlu0 %v1121_v20, %s3048_s29  ;;  %v1079_v20 = vmul.f32 %v4225_v8, %v3868_v56 }
 0x266   : > { %v4214_v7 = vpop.permute.xlu1 %1350  ;;  %v4216_v14 = vpop.permute.xlu0 %1225 }
 0x268   : > { %1231 = vrot.lane.b32.xlu1 %v3816_v49, %s3047_s19  ;;  %1352 = vrot.lane.b32.xlu0 %v3868_v56, %s3046_s15  ;;  %v4237_v49 = vsel %vm1013_vm2, %v3784_v15, %v3794_v45  ;;  %v1540_v15 = vld [vmem:[%s4949_s4] sm:$0xff] }
 0x269   : > { %5074 = vst [vmem:[#allocation64_spill] sm:$0xff] %v4237_v49  ;;  %v1037_v61 = vmul.f32 %v4237_v49, %v3868_v56 }
 0x26a   : > { %v4227_v28 = vpop.permute.xlu1 %1227  ;;  %v4229_v59 = vpop.permute.xlu0 %1474 }
 0x26b   : > { %5073 = vst [vmem:[#allocation63_spill] sm:$0xff] %v4229_v59 }
 0x26c   : > { %1317 = vrot.lane.b32.xlu0 %v1079_v20, %s3049_s17 }
 0x26e   : > { %v1463_v21 = vpop.permute.xlu1 %1462  ;;  %v1505_v16 = vpop.permute.xlu0 %1504 }
 0x270   : > { %1273 = vrot.lane.b32.xlu0 %v1037_v61, %s3050_s9 }
 0x272   : > { %v1383_v22 = vpop.permute.xlu1 %1382  ;;  %v4242_v30 = vpop.permute.xlu0 %1464 }
 0x273   : > { %v1480_v63 = vsel %vm1478_vm3, %v1463_v21, %v4242_v30 }
 0x274   : > { %1229 = vrot.lane.b32.xlu0 %v3868_v56, %s3047_s19 }
 0x276   : > { %v4249_v20 = vpop.permute.xlu1 %1342  ;;  %v1427_v39 = vpop.permute.xlu0 %1426 }
 0x278   : > { %1543 = vperm.xlu0 %2877, %v1540_v15  }
 0x27a   : > { %v1304_v8 = vpop.permute.xlu1 %1303  ;;  %v1341_v45 = vpop.permute.xlu0 %1340 }
 0x27e   : > { %v4251_v29 = vpop.permute.xlu1 %1217  ;;  %v4253_v49 = vpop.permute.xlu0 %1259 }
 0x282   : > { %v4255_v61 = vpop.permute.xlu1 %1468  ;;  %v4257_v57 = vpop.permute.xlu0 %1219 }
 0x286   : > { %v4259_v48 = vpop.permute.xlu1 %1516  ;;  %v4261_v3 = vpop.permute.xlu0 %1466 }
 0x28a   : > { %v4263_v5 = vpop.permute.xlu1 %1438  ;;  %v4265_v51 = vpop.permute.xlu0 %1514 }
 0x28e   : > { %v4267_v60 = vpop.permute.xlu1 %1346  ;;  %v4269_v15 = vpop.permute.xlu0 %1436 }
 0x292   : > { %v4271_v53 = vpop.permute.xlu1 %1394  ;;  %v4273_v12 = vpop.permute.xlu0 %1344 }
 0x296   : > { %v4275_v46 = vpop.permute.xlu1 %1315  ;;  %v4277_v55 = vpop.permute.xlu0 %1392 }
 0x29a   : > { %v4279_v54 = vpop.permute.xlu1 %1223  ;;  %v4281_v9 = vpop.permute.xlu0 %1313 }
 0x29e   : > { %v4283_v27 = vpop.permute.xlu1 %1271  ;;  %v4285_v47 = vpop.permute.xlu0 %1221 }
 0x2a2   : > { %v1509_v13 = vpop.permute.xlu1 %1508  ;;  %v4287_v58 = vpop.permute.xlu0 %1269 }
 0x2a6   : > { %v4289_v0 = vpop.permute.xlu1 %1430  ;;  %v4291_v2 = vpop.permute.xlu0 %1518 }
 0x2aa   : > { %v1385_v6 = vpop.permute.xlu1 %1384  ;;  %v4293_v4 = vpop.permute.xlu0 %1440 }
 0x2ab   : > { %5075 = vst [vmem:[#allocation65_spill] sm:$0xff] %v4293_v4  ;;  %v1479_v4 = vsel %vm1478_vm3, %v4175_v52, %v1463_v21  ;;  %v1357_v21 = vsel %vm1356_vm5, %v4177_v34, %v1341_v45 }
 0x2ae   : > { %v1306_v31 = vpop.permute.xlu1 %1305  ;;  %v1507_v19 = vpop.permute.xlu0 %1506 }
 0x2af   : > { %v1524_v25 = vsel %vm1522_vm1, %v1507_v19, %v1509_v13  ;;  %v1523_v37 = vsel %vm1522_vm1, %v1505_v16, %v1507_v19  ;;  %v1401_v16 = vsel %vm1400_vm4, %v1383_v22, %v1385_v6 }
 0x2b0   : > { %1564 = vmatprep.subr.mxu1 %v1524_v25 }
 0x2b1   : > { %1565 = vmatpush1.msra.mxu1 %v1523_v37 }
 0x2b2   : > { %v4299_v38 = vpop.permute.xlu1 %1263  ;;  %1566 = vmatprep.subr.mxu1 %v1480_v63  ;;  %v1429_v56 = vpop.permute.xlu0 %1428 }
 0x2b3   : > { %1567 = vmatpush1.msra.mxu1 %v1479_v4  ;;  %v1445_v62 = vsel %vm1139_vm14, %v1429_v56, %v4289_v0  ;;  %v1444_v59 = vsel %vm1139_vm14, %v1427_v39, %v1429_v56  ;;  %v1358_v4 = vsel %vm1356_vm5, %v1341_v45, %v4249_v20  ;;  %v1235_v45 = vsel %vm1233_vm8, %v4251_v29, %v4257_v57 }
 0x2b4   : > { %1568 = vmatprep.subr.mxu1 %v1445_v62 }
 0x2b5   : > { %1569 = vmatpush1.msra.mxu1 %v1444_v59 }
 0x2b6   : > { %v1513_v25 = vpop.permute.xlu1 %1512  ;;  %v4306_v37 = vpop.permute.xlu0 %1386 }
 0x2b7   : > { %v1402_v19 = vsel %vm1400_vm4, %v1385_v6, %v4306_v37  ;;  %v1322_v6 = vsel %vm1321_vm6, %v1304_v8, %v1306_v31  ;;  %v1234_v8 = vsel %vm1233_vm8, %v4189_v44, %v4251_v29  ;;  %v1482_v29 = vsel %vm1478_vm3, %v4261_v3, %v4255_v61 }
 0x2b8   : > { %1570 = vmatprep.subr.mxu1 %v1402_v19  ;;  %v956_v19 = vmul.f32 %v3302_v24, %v3876_v42  ;;  %v1527_v44 = vsel %vm1522_vm1, %v1513_v25, %v4265_v51 }
 0x2b9   : > { %1571 = vmatpush1.msra.mxu1 %v1401_v16  ;;  %v955_v16 = vmul.f32 %v3280_v18, %v3844_v11  ;;  %v1528_v11 = vsel %vm1522_vm1, %v4265_v51, %v4259_v48  ;;  %v1449_v51 = vsel %vm1139_vm14, %v4269_v15, %v4263_v5 }
 0x2ba   : > { %v1435_v63 = vpop.permute.xlu1 %1434  ;;  %1572 = vmatprep.subr.mxu1 %v1358_v4  ;;  %v4313_v56 = vpop.permute.xlu0 %1307 }
 0x2bb   : > { %1573 = vmatpush1.msra.mxu1 %v1357_v21  ;;  %v1323_v62 = vsel %vm1321_vm6, %v1306_v31, %v4313_v56  ;;  %v4338_v21 = vld [vmem:[#allocation9] sm:$0xff] }
 0x2bc   : > { %1574 = vmatprep.subr.mxu1 %v1323_v62 }
 0x2bd   : > { %1575 = vmatpush1.msra.mxu1 %v1322_v6 }
 0x2be   : > { %v1391_v22 = vpop.permute.xlu1 %1390  ;;  %v1262_v52 = vpop.permute.xlu0 %1261 }
 0x2bf   : > { %v1279_v59 = vsel %vm1277_vm7, %v1262_v52, %v4299_v38  ;;  %v1278_v39 = vsel %vm1277_vm7, %v4253_v49, %v1262_v52 }
 0x2c0   : > { %1576 = vmatprep.subr.mxu1 %v1279_v59  ;;  %v1484_v59 = vsel %vm1478_vm3, %v4191_v50, %v4204_v1 }
 0x2c1   : > { %1577 = vmatpush1.msra.mxu1 %v1278_v39  ;;  %v1448_v39 = vsel %vm1139_vm14, %v1435_v63, %v4269_v15  ;;  %v1362_v15 = vsel %vm1356_vm5, %v4206_v10, %v4214_v7 }
 0x2c2   : > { %v4327_v34 = vpop.permute.xlu1 %1311  ;;  %1578 = vmatprep.subr.mxu1 %v1235_v45  ;;  %v1511_v31 = vpop.permute.xlu0 %1510 }
 0x2c3   : > { %1579 = vmatpush1.msra.mxu1 %v1234_v8  ;;  %v1526_v49 = vsel %vm1522_vm1, %v1511_v31, %v1513_v25  ;;  %v1525_v4 = vsel %vm1522_vm1, %v1509_v13, %v1511_v31  ;;  %v1481_v13 = vsel %vm1478_vm3, %v4242_v30, %v4261_v3  ;;  %v1483_v3 = vsel %vm1478_vm3, %v4255_v61, %v4191_v50 }
 0x2c4   : > { %1580 = vmatprep.subr.mxu1 %v956_v19  ;;  %1635 = vmatprep.subr.mxu0 %v1526_v49  ;;  %v1406_v50 = vsel %vm1400_vm4, %v4277_v55, %v4271_v53  ;;  %v1405_v61 = vsel %vm1400_vm4, %v1391_v22, %v4277_v55  ;;  %v1359_v8 = vsel %vm1356_vm5, %v4249_v20, %v4273_v12 }
 0x2c5   : > { %1581 = vmatpush1.msra.mxu1 %v955_v16  ;;  %1636 = vmatpush1.msra.mxu0 %v1525_v4  ;;  %v1327_v49 = vsel %vm1321_vm6, %v4281_v9, %v4275_v46 }
 0x2c6   : > { %2725 = vmatmul.mubr.msk.f32.vlgmr.msra.gmra.mxu1 %vm1546_vm9, %v4338_v21  ;;  %1637 = vmatprep.subr.mxu0 %v1482_v29  ;;  %v1433_v42 = vpop.permute.xlu0 %1432  ;;  %v1268_v52 = vpop.permute.xlu1 %1267 }
 0x2c7   : > { %1706 = vmatprep.subr.mxu1 %v1528_v11  ;;  %1638 = vmatpush1.msra.mxu0 %v1481_v13  ;;  %v1447_v62 = vsel %vm1139_vm14, %v1433_v42, %v1435_v63  ;;  %v1446_v6 = vsel %vm1139_vm14, %v4289_v0, %v1433_v42  ;;  %v4365_v0 = vld [vmem:[#allocation3] sm:$0xff]  ;;  %v1282_v20 = vsel %vm1277_vm7, %v1268_v52, %v4287_v58 }
 0x2c8   : > { %1707 = vmatpush1.msra.mxu1 %v1527_v44  ;;  %1639 = vmatprep.subr.mxu0 %v1447_v62  ;;  %v1236_v11 = vsel %vm1233_vm8, %v4257_v57, %v4285_v47  ;;  %v959_v42 = vmul.f32 %v3347_v35, %v3903_v43  ;;  %v5077_v13 = vld [vmem:[#allocation58_spill] sm:$0xff]  ;;  %v5078_v44 = vld [vmem:[#allocation65_spill] sm:$0xff] }
 0x2c9   : > { %1708 = vmatprep.subr.mxu1 %v1484_v59  ;;  %1640 = vmatpush1.msra.mxu0 %v1446_v6  ;;  %v1451_v62 = vsel %vm1139_vm14, %v5078_v44, %v5077_v13 }
 0x2ca   : > { %1709 = vmatpush1.msra.mxu1 %v1483_v3  ;;  %v1389_v30 = vpop.permute.xlu0 %1388  ;;  %1756 = vmatprep.mubr.f32.mxu1 %v4365_v0  ;;  %v4381_v31 = vpop.permute.xlu1 %1398 }
 0x2cb   : > { %1710 = vmatprep.subr.mxu1 %v1449_v51  ;;  %v1403_v25 = vsel %vm1400_vm4, %v4306_v37, %v1389_v30  ;;  %v1404_v45 = vsel %vm1400_vm4, %v1389_v30, %v1391_v22  ;;  %v1360_v37 = vsel %vm1356_vm5, %v4273_v12, %v4267_v60  ;;  %v1361_v22 = vsel %vm1356_vm5, %v4267_v60, %v4206_v10 }
 0x2cc   : > { %1711 = vmatpush1.msra.mxu1 %v1448_v39  ;;  %1641 = vmatprep.subr.mxu0 %v1404_v45  ;;  %v1326_v12 = vsel %vm1321_vm6, %v4327_v34, %v4281_v9  ;;  %v1283_v60 = vsel %vm1277_vm7, %v4287_v58, %v4283_v27  ;;  %v1239_v9 = vsel %vm1233_vm8, %v4216_v14, %v4227_v28 }
 0x2cd   : > { %1712 = vmatprep.subr.mxu1 %v1406_v50  ;;  %1642 = vmatpush1.msra.mxu0 %v1403_v25  ;;  %v1237_v58 = vsel %vm1233_vm8, %v4285_v47, %v4279_v54  ;;  %v5079_v50 = vld [vmem:[#allocation27_spill] sm:$0xff] }
 0x2ce   : > { %1713 = vmatpush1.msra.mxu1 %v1405_v61  ;;  %1643 = vmatprep.subr.mxu0 %v1360_v37  ;;  %v1310_v63 = vpop.permute.xlu0 %1309  ;;  %v1355_v4 = vpop.permute.xlu1 %1354  ;;  %v5080_v61 = vld [vmem:[#allocation15_spill] sm:$0xff]  ;;  %v5081_v37 = vld [vmem:[#allocation26_spill] sm:$0xff] }
 0x2cf   : > { %1714 = vmatprep.subr.mxu1 %v1362_v15  ;;  %v1324_v55 = vsel %vm1321_vm6, %v4313_v56, %v1310_v63  ;;  %1644 = vmatpush1.msra.mxu0 %v1359_v8  ;;  %v1325_v19 = vsel %vm1321_vm6, %v1310_v63, %v4327_v34  ;;  %v1238_v34 = vsel %vm1233_vm8, %v4279_v54, %v4216_v14 }
 0x2d0   : > { %1715 = vmatpush1.msra.mxu1 %v1361_v22  ;;  %1645 = vmatprep.subr.mxu0 %v1325_v19  ;;  %v958_v14 = vmul.f32 %v3339_v33, %v3916_v40  ;;  %v957_v54 = vmul.f32 %v3298_v23, %v3883_v26  ;;  %v1529_v26 = vsel %vm1522_vm1, %v4259_v48, %v4291_v2  ;;  %v5076_v40 = vld [vmem:[#allocation63_spill] sm:$0xff] }
 0x2d1   : > { %1716 = vmatprep.subr.mxu1 %v1327_v49  ;;  %1646 = vmatpush1.msra.mxu0 %v1324_v55  ;;  %v1486_v57 = vsel %vm1478_vm3, %v5076_v40, %v4115_v32  ;;  %v1450_v48 = vsel %vm1139_vm14, %v4263_v5, %v5078_v44  ;;  %v5085_v44 = vld [vmem:[#allocation19_spill] sm:$0xff] }
 0x2d2   : > { %1717 = vmatpush1.msra.mxu1 %v1326_v12  ;;  %v1266_v10 = vpop.permute.xlu0 %1265  ;;  %v1320_v47 = vpop.permute.xlu1 %1319 }
 0x2d3   : > { %1718 = vmatprep.subr.mxu1 %v1283_v60  ;;  %v1280_v56 = vsel %vm1277_vm7, %v4299_v38, %v1266_v10  ;;  %v1281_v16 = vsel %vm1277_vm7, %v1266_v10, %v1268_v52  ;;  %v960_v38 = vmul.f32 %v3351_v36, %v3852_v41  ;;  %v1530_v41 = vsel %vm1522_vm1, %v4291_v2, %v4137_v17 }
 0x2d4   : > { %1719 = vmatpush1.msra.mxu1 %v1282_v20  ;;  %1647 = vmatprep.subr.mxu0 %v1281_v16  ;;  %v1485_v17 = vsel %vm1478_vm3, %v4204_v1, %v5076_v40  ;;  %v5083_v40 = vld [vmem:[#allocation16_spill] sm:$0xff] }
 0x2d5   : > { %1720 = vmatprep.subr.mxu1 %v1239_v9  ;;  %1648 = vmatpush1.msra.mxu0 %v1280_v56 }
 0x2d6   : > { %1721 = vmatpush1.msra.mxu1 %v1238_v34  ;;  %1649 = vmatprep.subr.mxu0 %v1237_v58  ;;  %v1397_v29 = vpop.permute.xlu0 %1396  ;;  %v1276_v6 = vpop.permute.xlu1 %1275 }
 0x2d7   : > { %1722 = vmatprep.subr.mxu1 %v960_v38  ;;  %1650 = vmatpush1.msra.mxu0 %v1236_v11  ;;  %v1408_v32 = vsel %vm1400_vm4, %v1397_v29, %v4381_v31  ;;  %v1407_v1 = vsel %vm1400_vm4, %v4271_v53, %v1397_v29  ;;  %v5082_v31 = vld [vmem:[#allocation14_spill] sm:$0xff] }
 0x2d8   : > { %1723 = vmatpush1.msra.mxu1 %v959_v42  ;;  %1651 = vmatprep.subr.mxu0 %v958_v14  ;;  %v961_v15 = vmul.f32 %v5082_v31, %v5081_v37  ;;  %v5089_v37 = vld [vmem:[#allocation37_spill] sm:$0xff] }
 0x2d9   : > { %2727 = vmatmul.mubr.msk.f32.vlgmr.msra.gmra.mxu1 %vm1546_vm9, %v4338_v21  ;;  %1652 = vmatpush1.msra.mxu0 %v957_v54 }
 0x2da   : > { %2726 = vmatmul.mubr.msk.f32.vlgmr.msra.gmra.mxu0 %vm1546_vm9, %v4338_v21  ;;  %1777 = vmatprep.subr.mxu0 %v1530_v41  ;;  %v1353_v43 = vpop.permute.xlu0 %1352  ;;  %v1232_v53 = vpop.permute.xlu1 %1231 }
 0x2db   : > { %1778 = vmatpush1.msra.mxu0 %v1529_v26  ;;  %1827 = vmatprep.mubr.f32.mxu0 %v4365_v0  ;;  %v1364_v52 = vsel %vm1356_vm5, %v1353_v43, %v1355_v4  ;;  %v1363_v59 = vsel %vm1356_vm5, %v4214_v7, %v1353_v43 }
 0x2dc   : > { %1779 = vmatprep.subr.mxu0 %v1486_v57  ;;  %2364 = vmatprep.mubr.f32.mxu1 %v4365_v0 }
 0x2dd   : > { %1780 = vmatpush1.msra.mxu0 %v1485_v17  ;;  %v5084_v17 = vld [vmem:[#allocation17_spill] sm:$0xff] }
 0x2de   : > { %1781 = vmatprep.subr.mxu0 %v1451_v62  ;;  %v1318_v2 = vpop.permute.xlu0 %1317 }
 0x2df   : > { %1782 = vmatpush1.msra.mxu0 %v1450_v48  ;;  %v1329_v5 = vsel %vm1321_vm6, %v1318_v2, %v1320_v47  ;;  %v1328_v51 = vsel %vm1321_vm6, %v4275_v46, %v1318_v2  ;;  %v962_v46 = vmul.f32 %v5080_v61, %v5079_v50  ;;  %v5086_v2 = vld [vmem:[#allocation18_spill] sm:$0xff] }
 0x2e0   : > { %1783 = vmatprep.subr.mxu0 %v1408_v32  ;;  %v5087_v32 = vld [vmem:[#allocation20_spill] sm:$0xff] }
 0x2e1   : > { %1784 = vmatpush1.msra.mxu0 %v1407_v1 }
 0x2e2   : > { %1785 = vmatprep.subr.mxu0 %v1364_v52  ;;  %v1274_v3 = vpop.permute.xlu0 %1273 }
 0x2e3   : > { %1786 = vmatpush1.msra.mxu0 %v1363_v59  ;;  %v1285_v30 = vsel %vm1277_vm7, %v1274_v3, %v1276_v6  ;;  %v1284_v25 = vsel %vm1277_vm7, %v4283_v27, %v1274_v3 }
 0x2e4   : > { %1787 = vmatprep.subr.mxu0 %v1329_v5 }
 0x2e5   : > { %1788 = vmatpush1.msra.mxu0 %v1328_v51 }
 0x2e6   : > { %1789 = vmatprep.subr.mxu0 %v1285_v30  ;;  %v1230_v39 = vpop.permute.xlu0 %1229 }
 0x2e7   : > { %v1240_v7 = vsel %vm1233_vm8, %v4227_v28, %v1230_v39  ;;  %1790 = vmatpush1.msra.mxu0 %v1284_v25  ;;  %v1241_v45 = vsel %vm1233_vm8, %v1230_v39, %v1232_v53 }
 0x2e8   : > { %1791 = vmatprep.subr.mxu0 %v1241_v45 }
 0x2e9   : > { %1792 = vmatpush1.msra.mxu0 %v1240_v7  ;;  %v5088_v7 = vld [vmem:[#allocation43_spill] sm:$0xff] }
 0x2ea   : > { %1793 = vmatprep.subr.mxu0 %v962_v46 }
 0x2eb   : > { %1794 = vmatpush1.msra.mxu0 %v961_v15 }
 0x2ec   : > { %2728 = vmatmul.mubr.msk.f32.vlgmr.msra.gmra.mxu0 %vm1546_vm9, %v4338_v21 }
 0x2ed   : > { %2435 = vmatprep.mubr.f32.mxu0 %v4365_v0 }
 0x2f3   : > { %v1544_v27 = vpop.permute.xlu0 %1543 }
 0x386   : > { %v1616_v28 = vpop.f32.mrf.mxu1 }
 0x387   : > { %v1617_v63 = vadd.f32 %v1616_v28, %v1544_v27 }
 0x388   : > { %v1618_v8 = vpop.f32.mrf.mxu1 }
 0x389   : > { %v1619_v55 = vadd.f32 %v1618_v8, %v1544_v27  ;;  %v1834_v22 = vmax.f32 %v1617_v63, 0.0  ;;  %v5091_v63 = vld [vmem:[#allocation39_spill] sm:$0xff] }
 0x38b   : > { %1859 = vrot.lane.b32.xlu1 %v1834_v22, %s3040_s11  ;;  %v1835_v19 = vmax.f32 %v1619_v55, 0.0  ;;  %v5092_v55 = vld [vmem:[#allocation45_spill] sm:$0xff] }
 0x38f   : > { %1861 = vrot.lane.b32.xlu1 %v1835_v19, %s3040_s11  ;;  %v5093_v19 = vld [vmem:[#allocation41_spill] sm:$0xff] }
 0x399   : > { %v1758_v49 = vpop.f32.mrf.mxu1 }
 0x39a   : > { %v1687_v12 = vpop.f32.mrf.mxu0  ;;  %v1759_v56 = vadd.f32 %v1758_v49, %v1544_v27 }
 0x39b   : > { %v1688_v60 = vadd.f32 %v1687_v12, %v1544_v27  ;;  %v1760_v10 = vpop.f32.mrf.mxu1  ;;  %v5094_v12 = vld [vmem:[#allocation55_spill] sm:$0xff] }
 0x39c   : > { %v1689_v20 = vpop.f32.mrf.mxu0  ;;  %v1761_v4 = vadd.f32 %v1760_v10, %v1544_v27  ;;  %v1838_v34 = vmax.f32 %v1759_v56, 0.0  ;;  %v5095_v10 = vld [vmem:[#allocation57_spill] sm:$0xff]  ;;  %v5096_v56 = vld [vmem:[#allocation47_spill] sm:$0xff] }
 0x39d   : > { %v1836_v21 = vmax.f32 %v1688_v60, 0.0  ;;  %v1690_v16 = vadd.f32 %v1689_v20, %v1544_v27 }
 0x39e   : > { %v1839_v58 = vmax.f32 %v1761_v4, 0.0 }
 0x39f   : > { %v1837_v9 = vmax.f32 %v1690_v16, 0.0  ;;  %1863 = vrot.lane.b32.xlu0 %v1836_v21, %s3040_s11  ;;  %v5097_v16 = vld [vmem:[#allocation44_spill] sm:$0xff] }
 0x3a1   : > { %1865 = vrot.lane.b32.xlu1 %v1837_v9, %s3040_s11  ;;  %v5098_v9 = vld [vmem:[#allocation49_spill] sm:$0xff] }
 0x3a3   : > { %1867 = vrot.lane.b32.xlu0 %v1838_v34, %s3040_s11 }
 0x3a5   : > { %1869 = vrot.lane.b32.xlu1 %v1839_v58, %s3040_s11  ;;  %v5099_v58 = vld [vmem:[#allocation59_spill] sm:$0xff] }
 0x3ac   : > { %v1829_v38 = vpop.f32.mrf.mxu0 }
 0x3ad   : > { %v1830_v29 = vadd.f32 %v1829_v38, %v1544_v27 }
 0x3ae   : > { %v1831_v11 = vpop.f32.mrf.mxu0 }
 0x3af   : > { %v1840_v42 = vmax.f32 %v1830_v29, 0.0  ;;  %v1832_v14 = vadd.f32 %v1831_v11, %v1544_v27  ;;  %v5090_v27 = vld [vmem:[#allocation53_spill] sm:$0xff]  ;;  %v5100_v29 = vld [vmem:[#allocation51_spill] sm:$0xff] }
 0x3b1   : > { %v1841_v54 = vmax.f32 %v1832_v14, 0.0  ;;  %1871 = vrot.lane.b32.xlu0 %v1840_v42, %s3040_s11  ;;  %v5101_v42 = vld [vmem:[#allocation46_spill] sm:$0xff] }
 0x3b3   : > { %1873 = vrot.lane.b32.xlu1 %v1841_v54, %s3040_s11  ;;  %v5102_v54 = vld [vmem:[#allocation60_spill] sm:$0xff] }
 0x3fd   : > { %v1860_v41 = vpop.permute.xlu1 %1859 }
 0x3fe   : > { %1893 = vst.msk [vmem:[#allocation3] sm:$0xff] %vm1892_vm10, %v1860_v41 }
 0x401   : > { %v1862_v47 = vpop.permute.xlu1 %1861 }
 0x402   : > { %v4486_v43 = vsel %vm1875_vm11, %v1860_v41, %v1862_v47 }
 0x403   : > { %v1956_v45 = vmul.f32 %v4486_v43, %v5088_v7  ;;  %v1947_v22 = vmul.f32 %v4486_v43, %v5092_v55  ;;  %v1938_v49 = vmul.f32 %v4486_v43, %v5093_v19  ;;  %v1929_v4 = vmul.f32 %v4486_v43, %v5097_v16  ;;  %v5115_v55 = vld [vmem:[#allocation42_spill] sm:$0xff]  ;;  %v5118_v16 = vld [vmem:[#allocation28_spill] sm:$0xff] }
 0x404   : > { %v1920_v11 = vmul.f32 %v4486_v43, %v5100_v29  ;;  %v5120_v29 = vld [vmem:[#allocation30_spill] sm:$0xff] }
 0x405   : > { %v4488_v26 = vld [vmem:[#allocation3] sm:$0xff] }
 0x406   : > { %2093 = vrot.lane.b32.xlu0 %v4488_v26, %s3046_s15  ;;  %2213 = vrot.lane.b32.xlu1 %v4488_v26, %s3044_s2  ;;  %v1955_v57 = vmul.f32 %v4488_v26, %v5083_v40  ;;  %v1946_v13 = vmul.f32 %v4488_v26, %v5084_v17  ;;  %v1937_v62 = vmul.f32 %v4488_v26, %v5085_v44  ;;  %v5103_v40 = vld [vmem:[#allocation52_spill] sm:$0xff]  ;;  %v5105_v44 = vld [vmem:[#allocation54_spill] sm:$0xff] }
 0x407   : > { %v1928_v48 = vmul.f32 %v4488_v26, %v5086_v2  ;;  %v1919_v6 = vmul.f32 %v4488_v26, %v5087_v32  ;;  %v5104_v17 = vld [vmem:[#allocation48_spill] sm:$0xff]  ;;  %v5106_v2 = vld [vmem:[#allocation50_spill] sm:$0xff] }
 0x408   : > { %v5107_v32 = vld [vmem:[#allocation56_spill] sm:$0xff] }
 0x40a   : > { %1973 = vrot.lane.b32.xlu1 %v4488_v26, %s3047_s19  ;;  %2256 = vrot.lane.b32.xlu0 %v1955_v57, %s3045_s12 }
 0x40e   : > { %2179 = vrot.lane.b32.xlu0 %v1946_v13, %s3036_s18  ;;  %2136 = vrot.lane.b32.xlu1 %v1937_v62, %s3048_s29 }
 0x411   : > { %v1864_v1 = vpop.permute.xlu0 %1863 }
 0x412   : > { %v4510_v52 = vsel %vm1875_vm11, %v1862_v47, %v1864_v1  ;;  %2059 = vrot.lane.b32.xlu1 %v1928_v48, %s3049_s17  ;;  %2016 = vrot.lane.b32.xlu0 %v1919_v6, %s3050_s9 }
 0x413   : > { %v1866_v59 = vpop.permute.xlu1 %1865  ;;  %v1957_v15 = vmul.f32 %v4510_v52, %v5089_v37  ;;  %v1948_v8 = vmul.f32 %v4510_v52, %v5091_v63  ;;  %v1939_v21 = vmul.f32 %v4510_v52, %v5096_v56  ;;  %v1930_v34 = vmul.f32 %v4510_v52, %v5098_v9  ;;  %v5112_v37 = vld [vmem:[#allocation23_spill] sm:$0xff]  ;;  %v5114_v63 = vld [vmem:[#allocation24_spill] sm:$0xff]  ;;  %v5119_v9 = vld [vmem:[#allocation61_spill] sm:$0xff] }
 0x414   : > { %v4515_v3 = vsel %vm1875_vm11, %v1864_v1, %v1866_v59  ;;  %v1921_v14 = vmul.f32 %v4510_v52, %v5101_v42  ;;  %v5108_v1 = vld [vmem:[#allocation21_spill] sm:$0xff]  ;;  %v5121_v42 = vld [vmem:[#allocation35_spill] sm:$0xff] }
 0x415   : > { %v1868_v5 = vpop.permute.xlu0 %1867  ;;  %v1958_v28 = vmul.f32 %v4515_v3, %v5090_v27  ;;  %v1949_v60 = vmul.f32 %v4515_v3, %v5094_v12  ;;  %v1940_v20 = vmul.f32 %v4515_v3, %v5095_v10  ;;  %v1931_v38 = vmul.f32 %v4515_v3, %v5099_v58  ;;  %v5113_v27 = vld [vmem:[#allocation31_spill] sm:$0xff]  ;;  %v5116_v12 = vld [vmem:[#allocation25_spill] sm:$0xff] }
 0x416   : > { %v4518_v51 = vsel %vm1875_vm11, %v1866_v59, %v1868_v5  ;;  %2215 = vrot.lane.b32.xlu1 %v4486_v43, %s3044_s2  ;;  %2217 = vrot.lane.b32.xlu0 %v4510_v52, %s3044_s2  ;;  %v1922_v41 = vmul.f32 %v4515_v3, %v5102_v54  ;;  %v5117_v10 = vld [vmem:[#allocation33_spill] sm:$0xff] }
 0x417   : > { %v1870_v30 = vpop.permute.xlu1 %1869  ;;  %v1941_v57 = vmul.f32 %v4518_v51, %v5103_v40  ;;  %v1959_v13 = vmul.f32 %v4518_v51, %v5104_v17  ;;  %v1932_v62 = vmul.f32 %v4518_v51, %v5105_v44  ;;  %v1950_v48 = vmul.f32 %v4518_v51, %v5106_v2  ;;  %v5122_v40 = vld [vmem:[#allocation32_spill] sm:$0xff]  ;;  %v5123_v17 = vld [vmem:[#allocation62_spill] sm:$0xff] }
 0x418   : > { %v4525_v53 = vsel %vm1875_vm11, %v1868_v5, %v1870_v30  ;;  %v1923_v6 = vmul.f32 %v4518_v51, %v5107_v32  ;;  %v5109_v5 = vld [vmem:[#allocation29_spill] sm:$0xff]  ;;  %v5124_v2 = vld [vmem:[#allocation34_spill] sm:$0xff] }
 0x419   : > { %v5125_v32 = vld [vmem:[#allocation38_spill] sm:$0xff] }
 0x41a   : > { %2219 = vrot.lane.b32.xlu1 %v4515_v3, %s3044_s2  ;;  %2095 = vrot.lane.b32.xlu0 %v4486_v43, %s3046_s15 }
 0x41e   : > { %2097 = vrot.lane.b32.xlu1 %v4510_v52, %s3046_s15  ;;  %2099 = vrot.lane.b32.xlu0 %v4515_v3, %s3046_s15 }
 0x422   : > { %1975 = vrot.lane.b32.xlu1 %v4486_v43, %s3047_s19  ;;  %1977 = vrot.lane.b32.xlu0 %v4510_v52, %s3047_s19 }
 0x423   : > { %v1872_v25 = vpop.permute.xlu0 %1871 }
 0x424   : > { %v4540_v39 = vsel %vm1875_vm11, %v1870_v30, %v1872_v25  ;;  %v1960_v30 = vmul.f32 %v4525_v53, %v5109_v5  ;;  %v5126_v5 = vld [vmem:[#allocation36_spill] sm:$0xff] }
 0x425   : > { %v1874_v50 = vpop.permute.xlu1 %1873 }
 0x426   : > { %v4545_v46 = vsel %vm1875_vm11, %v1872_v25, %v1874_v50  ;;  %1901 = vst.msk [vmem:[#allocation3 + $0x40] sm:$0xff] %vm1875_vm11, %v1874_v50  ;;  %1979 = vrot.lane.b32.xlu1 %v4515_v3, %s3047_s19  ;;  %2258 = vrot.lane.b32.xlu0 %v1956_v45, %s3045_s12  ;;  %v5110_v25 = vld [vmem:[#allocation22_spill] sm:$0xff]  ;;  %v5111_v45 = vld [vmem:[#allocation40_spill] sm:$0xff] }
 0x427   : > { %v1962_v50 = vmul.f32 %v4545_v46, %v5111_v45 }
 0x42a   : > { %2260 = vrot.lane.b32.xlu1 %v1957_v15, %s3045_s12  ;;  %2262 = vrot.lane.b32.xlu0 %v1958_v28, %s3045_s12  ;;  %v1951_v28 = vmul.f32 %v4525_v53, %v5113_v27 }
 0x42d   : > { %v4597_v47 = vld [vmem:[#allocation3 + $0x40] sm:$0xff] }
 0x42e   : > { %2183 = vrot.lane.b32.xlu1 %v1948_v8, %s3036_s18  ;;  %2181 = vrot.lane.b32.xlu0 %v1947_v22, %s3036_s18  ;;  %v1963_v59 = vmul.f32 %v4597_v47, %v5108_v1  ;;  %v1954_v7 = vmul.f32 %v4597_v47, %v5110_v25  ;;  %v1945_v15 = vmul.f32 %v4597_v47, %v5112_v37  ;;  %v5127_v25 = vld [vmem:[#allocation64_spill] sm:$0xff]  ;;  %v2291_v37 = vld [vmem:[%s4951_s6] sm:$0xff] }
 0x42f   : > { %v1936_v8 = vmul.f32 %v4597_v47, %v5114_v63  ;;  %v1953_v22 = vmul.f32 %v4545_v46, %v5115_v55 }
 0x432   : > { %2138 = vrot.lane.b32.xlu1 %v1938_v49, %s3048_s29  ;;  %2185 = vrot.lane.b32.xlu0 %v1949_v60, %s3036_s18  ;;  %v1927_v60 = vmul.f32 %v4597_v47, %v5116_v12 }
 0x436   : > { %2142 = vrot.lane.b32.xlu1 %v1940_v20, %s3048_s29  ;;  %2140 = vrot.lane.b32.xlu0 %v1939_v21, %s3048_s29  ;;  %v1942_v20 = vmul.f32 %v4525_v53, %v5117_v10 }
 0x43a   : > { %2061 = vrot.lane.b32.xlu1 %v1929_v4, %s3049_s17  ;;  %2063 = vrot.lane.b32.xlu0 %v1930_v34, %s3049_s17  ;;  %v1961_v4 = vmul.f32 %v4540_v39, %v5118_v16  ;;  %v1944_v34 = vmul.f32 %v4545_v46, %v5119_v9 }
 0x43e   : > { %2065 = vrot.lane.b32.xlu1 %v1931_v38, %s3049_s17  ;;  %2018 = vrot.lane.b32.xlu0 %v1920_v11, %s3050_s9  ;;  %v1952_v11 = vmul.f32 %v4540_v39, %v5120_v29 }
 0x442   : > { %2020 = vrot.lane.b32.xlu1 %v1921_v14, %s3050_s9  ;;  %2022 = vrot.lane.b32.xlu0 %v1922_v41, %s3050_s9  ;;  %v1933_v14 = vmul.f32 %v4525_v53, %v5121_v42 }
 0x446   : > { %2101 = vrot.lane.b32.xlu1 %v4518_v51, %s3046_s15  ;;  %2221 = vrot.lane.b32.xlu0 %v4518_v51, %s3044_s2 }
 0x44a   : > { %2229 = vrot.lane.b32.xlu1 %v4597_v47, %s3044_s2  ;;  %1981 = vrot.lane.b32.xlu0 %v4518_v51, %s3047_s19 }
 0x44e   : > { %2109 = vrot.lane.b32.xlu1 %v4597_v47, %s3046_s15  ;;  %2144 = vrot.lane.b32.xlu0 %v1941_v57, %s3048_s29  ;;  %v1943_v57 = vmul.f32 %v4540_v39, %v5122_v40 }
 0x452   : > { %2264 = vrot.lane.b32.xlu1 %v1959_v13, %s3045_s12  ;;  %2067 = vrot.lane.b32.xlu0 %v1932_v62, %s3049_s17  ;;  %v1935_v13 = vmul.f32 %v4545_v46, %v5123_v17 }
 0x456   : > { %2187 = vrot.lane.b32.xlu1 %v1950_v48, %s3036_s18  ;;  %2223 = vrot.lane.b32.xlu0 %v4525_v53, %s3044_s2  ;;  %v1934_v48 = vmul.f32 %v4540_v39, %v5124_v2 }
 0x45a   : > { %2024 = vrot.lane.b32.xlu1 %v1923_v6, %s3050_s9  ;;  %2227 = vrot.lane.b32.xlu0 %v4545_v46, %s3044_s2  ;;  %v1924_v6 = vmul.f32 %v4525_v53, %v5125_v32 }
 0x45e   : > { %2225 = vrot.lane.b32.xlu1 %v4540_v39, %s3044_s2  ;;  %2103 = vrot.lane.b32.xlu0 %v4525_v53, %s3046_s15  ;;  %s4899_s2 = scalar_lea.vmem [#allocation10], %s2713_s22  ;;  %s2739_s22 = sshll.u32 %s3114_s28, 10 }
 0x45f   : > { %s3052_s28 = smov [#allocation10]  }
 0x460   : > { %s2963_s21 = sshll.u32 %s3052_s28, 4  ;;  %s2964_s21 = int_to_ptr.vmem [resolvable:$false] %s2963_s21 }
 0x461   : > { %s2965_s16 = scalar_lea.vmem %s2964_s21, 2048 }
 0x462   : > { %2105 = vrot.lane.b32.xlu1 %v4540_v39, %s3046_s15  ;;  %2107 = vrot.lane.b32.xlu0 %v4545_v46, %s3046_s15 }
 0x466   : > { %1985 = vrot.lane.b32.xlu1 %v4540_v39, %s3047_s19  ;;  %1983 = vrot.lane.b32.xlu0 %v4525_v53, %s3047_s19 }
 0x46a   : > { %2272 = vrot.lane.b32.xlu1 %v1963_v59, %s3045_s12  ;;  %2266 = vrot.lane.b32.xlu0 %v1960_v30, %s3045_s12  ;;  %v1925_v30 = vmul.f32 %v4540_v39, %v5126_v5  ;;  %v1911_v5 = vmul.f32 %v4486_v43, %v3302_v24 }
 0x46e   : > { %2195 = vrot.lane.b32.xlu1 %v1954_v7, %s3036_s18  ;;  %2270 = vrot.lane.b32.xlu0 %v1962_v50, %s3045_s12  ;;  %v1926_v7 = vmul.f32 %v4545_v46, %v5127_v25 }
 0x472   : > { %2152 = vrot.lane.b32.xlu1 %v1945_v15, %s3048_s29  ;;  %2189 = vrot.lane.b32.xlu0 %v1951_v28, %s3036_s18 }
 0x476   : > { %2075 = vrot.lane.b32.xlu1 %v1936_v8, %s3049_s17  ;;  %2193 = vrot.lane.b32.xlu0 %v1953_v22, %s3036_s18 }
 0x478   : > { %v4660_v19 = vpop.permute.xlu0 %2093  ;;  %v2214_v49 = vpop.permute.xlu1 %2213 }
 0x47a   : > { %2032 = vrot.lane.b32.xlu1 %v1927_v60, %s3050_s9  ;;  %2146 = vrot.lane.b32.xlu0 %v1942_v20, %s3048_s29 }
 0x47c   : > { %v2257_v56 = vpop.permute.xlu0 %2256  ;;  %v4668_v21 = vpop.permute.xlu1 %1973 }
 0x47e   : > { %2268 = vrot.lane.b32.xlu1 %v1961_v4, %s3045_s12  ;;  %2150 = vrot.lane.b32.xlu0 %v1944_v34, %s3048_s29  ;;  %s2615_s12 = sshll.u32 %s4899_s2, 4  ;;  %s2616_s12 = int_to_ptr.vmem [resolvable:$true] %s2615_s12 }
 0x47f   : > { %p2966_p9 = scmp.lt.s32.totalorder %s2616_s12, %s2964_s21 }
 0x480   : > { %v2180_v58 = vpop.permute.xlu0 %2179  ;;  %v2137_v38 = vpop.permute.xlu1 %2136 }
 0x482   : > { %2191 = vrot.lane.b32.xlu1 %v1952_v11, %s3036_s18  ;;  %2069 = vrot.lane.b32.xlu0 %v1933_v14, %s3049_s17 }
 0x484   : > { %v4682_v54 = vpop.permute.xlu0 %2016  ;;  %v2060_v41 = vpop.permute.xlu1 %2059 }
 0x486   : > { %2148 = vrot.lane.b32.xlu1 %v1943_v57, %s3048_s29  ;;  %2073 = vrot.lane.b32.xlu0 %v1935_v13, %s3049_s17  ;;  %s2613_s29 = scalar_lea.hbm %s4952_s7, %s2739_s22 }
 0x488   : > { %v2216_v44 = vpop.permute.xlu1 %2215  ;;  %v4690_v62 = vpop.permute.xlu0 %2217 }
 0x489   : > { %v2232_v12 = vsel %vm1478_vm3, %v2216_v44, %v4690_v62  ;;  %v2231_v60 = vsel %vm1478_vm3, %v2214_v49, %v2216_v44 }
 0x48a   : > { %2071 = vrot.lane.b32.xlu1 %v1934_v48, %s3049_s17  ;;  %2026 = vrot.lane.b32.xlu0 %v1924_v6, %s3050_s9  ;;  %s2601_s17 = scalar_lea.sflag [#allocation6], %s3224_s20 }
 0x48c   : > { %v4698_v1 = vpop.permute.xlu1 %2219  ;;  %v2096_v59 = vpop.permute.xlu0 %2095 }
 0x48e   : > { %2028 = vrot.lane.b32.xlu1 %v1925_v30, %s3050_s9  ;;  %2030 = vrot.lane.b32.xlu0 %v1926_v7, %s3050_s9  ;;  %v4760_v30 = vld [vmem:[%s4950_s5] sm:$0xff]  ;;  %s2959_s9 = scalar_lea.vmem %s2616_s12, 1024 }
 0x48f   : > { %p2960_p2 = scmp.ne.s32.totalorder %s2616_s12, %s2959_s9  ;;  %p2967_p10 = scmp.lt.s32.totalorder %s2965_s16, %s2959_s9 }
 0x490   : > { %v4706_v45 = vpop.permute.xlu1 %2097  ;;  %v4708_v50 = vpop.permute.xlu0 %2099 }
 0x491   : > { %v2112_v42 = vsel %vm1356_vm5, %v2096_v59, %v4706_v45  ;;  %p2961_p4 = pnand %p2960_p2, %p5128_p0  ;;  %p2968_p1 = por %p2967_p10, %p2966_p9 }
 0x492   : > { %1989 = vrot.lane.b32.xlu1 %v4597_v47, %s3047_s19  ;;  %1987 = vrot.lane.b32.xlu0 %v4545_v46, %s3047_s19 }
 0x493   : > { %p2962_p5 = pneg %p2961_p4 }
 0x494   : > { %v1976_v15 = vpop.permute.xlu1 %1975  ;;  %v4717_v27 = vpop.permute.xlu0 %1977 }
 0x495   : > { %p2969_p12 = pnand %p2968_p1, %p2962_p5 }
 0x496   : > { %2294 = vperm.xlu0 %2877, %v2291_v37  }
 0x498   : > { %v4719_v28 = vpop.permute.xlu1 %1979  ;;  %v2259_v63 = vpop.permute.xlu0 %2258 }
 0x499   : > { %v2274_v22 = vsel %vm1522_vm1, %v2257_v56, %v2259_v63 }
 0x49c   : > { %v4721_v8 = vpop.permute.xlu1 %2260  ;;  %v2263_v55 = vpop.permute.xlu0 %2262 }
 0x49d   : > { %v2275_v47 = vsel %vm1522_vm1, %v2259_v63, %v4721_v8  ;;  %v2276_v37 = vsel %vm1522_vm1, %v4721_v8, %v2263_v55  ;;  %v2233_v63 = vsel %vm1478_vm3, %v4690_v62, %v4698_v1 }
 0x49e   : > { %2314 = vmatprep.subr.mxu1 %v2275_v47 }
 0x49f   : > { %2315 = vmatpush1.msra.mxu1 %v2274_v22 }
 0x4a0   : > { %2316 = vmatprep.subr.mxu1 %v2232_v12  ;;  %v4729_v10 = vpop.permute.xlu1 %2183  ;;  %v2182_v20 = vpop.permute.xlu0 %2181 }
 0x4a1   : > { %2317 = vmatpush1.msra.mxu1 %v2231_v60  ;;  %v2197_v16 = vsel %vm1139_vm14, %v2180_v58, %v2182_v20  ;;  %v2198_v4 = vsel %vm1139_vm14, %v2182_v20, %v4729_v10  ;;  %v2111_v58 = vsel %vm1356_vm5, %v4660_v19, %v2096_v59  ;;  %v1992_v19 = vsel %vm1233_vm8, %v1976_v15, %v4717_v27 }
 0x4a2   : > { %2318 = vmatprep.subr.mxu1 %v2198_v4 }
 0x4a3   : > { %2319 = vmatpush1.msra.mxu1 %v2197_v16 }
 0x4a4   : > { %v2139_v56 = vpop.permute.xlu1 %2138  ;;  %v2186_v9 = vpop.permute.xlu0 %2185 }
 0x4a5   : > { %v2154_v49 = vsel %vm1400_vm4, %v2137_v38, %v2139_v56  ;;  %v2199_v8 = vsel %vm1139_vm14, %v4729_v10, %v2186_v9  ;;  %v2113_v10 = vsel %vm1356_vm5, %v4706_v45, %v4708_v50 }
 0x4a8   : > { %v2143_v34 = vpop.permute.xlu1 %2142  ;;  %v2141_v29 = vpop.permute.xlu0 %2140 }
 0x4a9   : > { %v2155_v11 = vsel %vm1400_vm4, %v2139_v56, %v2141_v29  ;;  %v2156_v60 = vsel %vm1400_vm4, %v2141_v29, %v2143_v34 }
 0x4aa   : > { %2320 = vmatprep.subr.mxu1 %v2155_v11 }
 0x4ab   : > { %2321 = vmatpush1.msra.mxu1 %v2154_v49 }
 0x4ac   : > { %v2062_v14 = vpop.permute.xlu1 %2061  ;;  %v2064_v40 = vpop.permute.xlu0 %2063  ;;  %2322 = vmatprep.subr.mxu1 %v2112_v42  ;;  %v1913_v42 = vmul.f32 %v4515_v3, %v3339_v33 }
 0x4ad   : > { %v2077_v57 = vsel %vm1321_vm6, %v2060_v41, %v2062_v14  ;;  %2323 = vmatpush1.msra.mxu1 %v2111_v58  ;;  %v2078_v17 = vsel %vm1321_vm6, %v2062_v14, %v2064_v40  ;;  %v1991_v41 = vsel %vm1233_vm8, %v4668_v21, %v1976_v15  ;;  %v1912_v58 = vmul.f32 %v4510_v52, %v3298_v23 }
 0x4ae   : > { %2324 = vmatprep.subr.mxu1 %v2078_v17 }
 0x4af   : > { %2325 = vmatpush1.msra.mxu1 %v2077_v57 }
 0x4b0   : > { %v2066_v13 = vpop.permute.xlu1 %2065  ;;  %v2019_v38 = vpop.permute.xlu0 %2018 }
 0x4b1   : > { %v2034_v32 = vsel %vm1277_vm7, %v4682_v54, %v2019_v38  ;;  %v1910_v54 = vmul.f32 %v4488_v26, %v3280_v18  ;;  %v2079_v4 = vsel %vm1321_vm6, %v2064_v40, %v2066_v13 }
 0x4b4   : > { %v2021_v44 = vpop.permute.xlu1 %2020  ;;  %v2023_v2 = vpop.permute.xlu0 %2022 }
 0x4b5   : > { %v2035_v48 = vsel %vm1277_vm7, %v2019_v38, %v2021_v44  ;;  %v2036_v29 = vsel %vm1277_vm7, %v2021_v44, %v2023_v2 }
 0x4b6   : > { %2326 = vmatprep.subr.mxu1 %v2035_v48 }
 0x4b7   : > { %2327 = vmatpush1.msra.mxu1 %v2034_v32 }
 0x4b8   : > { %2328 = vmatprep.subr.mxu1 %v1992_v19  ;;  %v4749_v6 = vpop.permute.xlu1 %2101  ;;  %v4751_v59 = vpop.permute.xlu0 %2221 }
 0x4b9   : > { %2329 = vmatpush1.msra.mxu1 %v1991_v41  ;;  %v2234_v15 = vsel %vm1478_vm3, %v4698_v1, %v4751_v59  ;;  %v2114_v20 = vsel %vm1356_vm5, %v4708_v50, %v4749_v6  ;;  %v1993_v50 = vsel %vm1233_vm8, %v4717_v27, %v4719_v28 }
 0x4ba   : > { %2330 = vmatprep.subr.mxu1 %v1911_v5 }
 0x4bb   : > { %2331 = vmatpush1.msra.mxu1 %v1910_v54 }
 0x4bc   : > { %2729 = vmatmul.mubr.msk.f32.vlgmr.msra.gmra.mxu1 %vm1546_vm9, %v4760_v30  ;;  %v4764_v21 = vpop.permute.xlu1 %2229  ;;  %v4766_v25 = vpop.permute.xlu0 %1981 }
 0x4bd   : > { %2506 = vmatprep.mubr.f32.mxu1 %v4365_v0  ;;  %v1994_v45 = vsel %vm1233_vm8, %v4719_v28, %v4766_v25 }
 0x4c0   : > { %v4769_v24 = vpop.permute.xlu1 %2109  ;;  %v4771_v43 = vpop.permute.xlu0 %2144 }
 0x4c4   : > { %v4773_v18 = vpop.permute.xlu1 %2264  ;;  %v4775_v26 = vpop.permute.xlu0 %2067 }
 0x4c5   : > { %v2277_v7 = vsel %vm1522_vm1, %v2263_v55, %v4773_v18  ;;  %v2157_v55 = vsel %vm1400_vm4, %v2143_v34, %v4771_v43  ;;  %v2080_v16 = vsel %vm1321_vm6, %v2066_v13, %v4775_v26 }
 0x4c6   : > { %2385 = vmatprep.subr.mxu0 %v2277_v7 }
 0x4c7   : > { %2386 = vmatpush1.msra.mxu0 %v2276_v37 }
 0x4c8   : > { %2387 = vmatprep.subr.mxu0 %v2234_v15  ;;  %v4787_v47 = vpop.permute.xlu1 %2187  ;;  %v4789_v22 = vpop.permute.xlu0 %2223 }
 0x4c9   : > { %2388 = vmatpush1.msra.mxu0 %v2233_v63  ;;  %v2200_v12 = vsel %vm1139_vm14, %v2186_v9, %v4787_v47  ;;  %v2235_v7 = vsel %vm1478_vm3, %v4751_v59, %v4789_v22 }
 0x4ca   : > { %2389 = vmatprep.subr.mxu0 %v2200_v12 }
 0x4cb   : > { %2390 = vmatpush1.msra.mxu0 %v2199_v8 }
 0x4cc   : > { %2391 = vmatprep.subr.mxu0 %v2157_v55  ;;  %v4798_v62 = vpop.permute.xlu1 %2024  ;;  %v2228_v1 = vpop.permute.xlu0 %2227 }
 0x4cd   : > { %2392 = vmatpush1.msra.mxu0 %v2156_v60  ;;  %v2037_v34 = vsel %vm1277_vm7, %v2023_v2, %v4798_v62  ;;  %v2238_v41 = vsel %vm1478_vm3, %v2228_v1, %v4764_v21 }
 0x4ce   : > { %2393 = vmatprep.subr.mxu0 %v2114_v20 }
 0x4cf   : > { %2394 = vmatpush1.msra.mxu0 %v2113_v10 }
 0x4d0   : > { %2395 = vmatprep.subr.mxu0 %v2080_v16  ;;  %v2226_v56 = vpop.permute.xlu1 %2225  ;;  %v4809_v9 = vpop.permute.xlu0 %2103 }
 0x4d1   : > { %2396 = vmatpush1.msra.mxu0 %v2079_v4  ;;  %v2237_v5 = vsel %vm1478_vm3, %v2226_v56, %v2228_v1  ;;  %v2236_v54 = vsel %vm1478_vm3, %v4789_v22, %v2226_v56  ;;  %v2115_v16 = vsel %vm1356_vm5, %v4749_v6, %v4809_v9 }
 0x4d2   : > { %2397 = vmatprep.subr.mxu0 %v2037_v34 }
 0x4d3   : > { %2398 = vmatpush1.msra.mxu0 %v2036_v29 }
 0x4d4   : > { %2399 = vmatprep.subr.mxu0 %v1994_v45  ;;  %v4820_v11 = vpop.permute.xlu1 %2105  ;;  %v2108_v49 = vpop.permute.xlu0 %2107 }
 0x4d5   : > { %2400 = vmatpush1.msra.mxu0 %v1993_v50  ;;  %v2117_v20 = vsel %vm1356_vm5, %v4820_v11, %v2108_v49  ;;  %v2116_v10 = vsel %vm1356_vm5, %v4809_v9, %v4820_v11 }
 0x4d6   : > { %2401 = vmatprep.subr.mxu0 %v1913_v42 }
 0x4d7   : > { %2402 = vmatpush1.msra.mxu0 %v1912_v58 }
 0x4d8   : > { %2730 = vmatmul.mubr.msk.f32.vlgmr.msra.gmra.mxu0 %vm1546_vm9, %v4760_v30  ;;  %v4828_v14 = vpop.permute.xlu1 %1985  ;;  %v4830_v40 = vpop.permute.xlu0 %1983 }
 0x4d9   : > { %2577 = vmatprep.mubr.f32.mxu0 %v4365_v0  ;;  %v1995_v42 = vsel %vm1233_vm8, %v4766_v25, %v4830_v40  ;;  %v1917_v25 = vmul.f32 %v4545_v46, %v5080_v61 }
 0x4dc   : > { %v2273_v27 = vpop.permute.xlu1 %2272  ;;  %v2267_v28 = vpop.permute.xlu0 %2266 }
 0x4dd   : > { %v2278_v0 = vsel %vm1522_vm1, %v4773_v18, %v2267_v28 }
 0x4e0   : > { %v2196_v57 = vpop.permute.xlu1 %2195  ;;  %v2271_v17 = vpop.permute.xlu0 %2270 }
 0x4e1   : > { %v2281_v33 = vsel %vm1522_vm1, %v2271_v17, %v2273_v27 }
 0x4e2   : > { %2527 = vmatprep.subr.mxu0 %v2281_v33 }
 0x4e4   : > { %v2153_v3 = vpop.permute.xlu1 %2152  ;;  %v2190_v23 = vpop.permute.xlu0 %2189 }
 0x4e5   : > { %v2201_v12 = vsel %vm1139_vm14, %v4787_v47, %v2190_v23  ;;  %v2118_v47 = vsel %vm1356_vm5, %v2108_v49, %v4769_v24 }
 0x4e8   : > { %v2076_v52 = vpop.permute.xlu1 %2075  ;;  %v2194_v13 = vpop.permute.xlu0 %2193 }
 0x4e9   : > { %v2204_v18 = vsel %vm1139_vm14, %v2194_v13, %v2196_v57  ;;  %v1914_v57 = vmul.f32 %v4518_v51, %v3347_v35 }
 0x4ec   : > { %v2033_v38 = vpop.permute.xlu1 %2032  ;;  %v2147_v44 = vpop.permute.xlu0 %2146 }
 0x4ed   : > { %v2158_v1 = vsel %vm1400_vm4, %v4771_v43, %v2147_v44 }
 0x4f0   : > { %v2269_v2 = vpop.permute.xlu1 %2268  ;;  %v2151_v48 = vpop.permute.xlu0 %2150 }
 0x4f1   : > { %v2280_v32 = vsel %vm1522_vm1, %v2269_v2, %v2271_v17  ;;  %v2279_v19 = vsel %vm1522_vm1, %v2267_v28, %v2269_v2  ;;  %v2161_v8 = vsel %vm1400_vm4, %v2151_v48, %v2153_v3  ;;  %v1915_v28 = vmul.f32 %v4525_v53, %v3351_v36 }
 0x4f2   : > { %2456 = vmatprep.subr.mxu1 %v2279_v19  ;;  %2528 = vmatpush1.msra.mxu0 %v2280_v32  ;;  %v1916_v36 = vmul.f32 %v4540_v39, %v5082_v31 }
 0x4f3   : > { %2457 = vmatpush1.msra.mxu1 %v2278_v0  ;;  %2529 = vmatprep.subr.mxu0 %v2238_v41 }
 0x4f4   : > { %2458 = vmatprep.subr.mxu1 %v2236_v54  ;;  %2530 = vmatpush1.msra.mxu0 %v2237_v5  ;;  %v2192_v37 = vpop.permute.xlu1 %2191  ;;  %v2070_v15 = vpop.permute.xlu0 %2069 }
 0x4f5   : > { %v2203_v63 = vsel %vm1139_vm14, %v2192_v37, %v2194_v13  ;;  %2459 = vmatpush1.msra.mxu1 %v2235_v7  ;;  %2531 = vmatprep.subr.mxu0 %v2204_v18  ;;  %v2202_v21 = vsel %vm1139_vm14, %v2190_v23, %v2192_v37  ;;  %v2081_v29 = vsel %vm1321_vm6, %v4775_v26, %v2070_v15 }
 0x4f6   : > { %2460 = vmatprep.subr.mxu1 %v2202_v21  ;;  %2532 = vmatpush1.msra.mxu0 %v2203_v63  ;;  %v1996_v26 = vsel %vm1233_vm8, %v4830_v40, %v4828_v14 }
 0x4f7   : > { %2461 = vmatpush1.msra.mxu1 %v2201_v12  ;;  %2533 = vmatprep.subr.mxu0 %v2161_v8 }
 0x4f8   : > { %v2149_v59 = vpop.permute.xlu1 %2148  ;;  %v2074_v22 = vpop.permute.xlu0 %2073 }
 0x4f9   : > { %v2160_v55 = vsel %vm1400_vm4, %v2149_v59, %v2151_v48  ;;  %v2159_v60 = vsel %vm1400_vm4, %v2147_v44, %v2149_v59  ;;  %v2084_v4 = vsel %vm1321_vm6, %v2074_v22, %v2076_v52 }
 0x4fa   : > { %2462 = vmatprep.subr.mxu1 %v2159_v60  ;;  %2534 = vmatpush1.msra.mxu0 %v2160_v55 }
 0x4fb   : > { %2463 = vmatpush1.msra.mxu1 %v2158_v1  ;;  %2535 = vmatprep.subr.mxu0 %v2118_v47 }
 0x4fc   : > { %2464 = vmatprep.subr.mxu1 %v2116_v10  ;;  %2536 = vmatpush1.msra.mxu0 %v2117_v20  ;;  %v2072_v43 = vpop.permute.xlu1 %2071  ;;  %v2027_v56 = vpop.permute.xlu0 %2026 }
 0x4fd   : > { %v2083_v24 = vsel %vm1321_vm6, %v2072_v43, %v2074_v22  ;;  %2465 = vmatpush1.msra.mxu1 %v2115_v16  ;;  %2537 = vmatprep.subr.mxu0 %v2084_v4  ;;  %v2082_v34 = vsel %vm1321_vm6, %v2070_v15, %v2072_v43  ;;  %v2038_v49 = vsel %vm1277_vm7, %v4798_v62, %v2027_v56 }
 0x4fe   : > { %2466 = vmatprep.subr.mxu1 %v2082_v34  ;;  %2538 = vmatpush1.msra.mxu0 %v2083_v24 }
 0x4ff   : > { %2467 = vmatpush1.msra.mxu1 %v2081_v29 }
 0x500   : > { %v2029_v45 = vpop.permute.xlu1 %2028  ;;  %v2031_v6 = vpop.permute.xlu0 %2030 }
 0x501   : > { %v2040_v9 = vsel %vm1277_vm7, %v2029_v45, %v2031_v6  ;;  %v2039_v50 = vsel %vm1277_vm7, %v2027_v56, %v2029_v45  ;;  %v2041_v11 = vsel %vm1277_vm7, %v2031_v6, %v2033_v38 }
 0x502   : > { %2468 = vmatprep.subr.mxu1 %v2039_v50  ;;  %2539 = vmatprep.subr.mxu0 %v2041_v11 }
 0x503   : > { %2469 = vmatpush1.msra.mxu1 %v2038_v49  ;;  %2540 = vmatpush1.msra.mxu0 %v2040_v9 }
 0x504   : > { %2470 = vmatprep.subr.mxu1 %v1996_v26  ;;  %v1990_v58 = vpop.permute.xlu1 %1989  ;;  %v1988_v27 = vpop.permute.xlu0 %1987 }
 0x505   : > { %2471 = vmatpush1.msra.mxu1 %v1995_v42  ;;  %v1997_v62 = vsel %vm1233_vm8, %v4828_v14, %v1988_v27  ;;  %v1998_v17 = vsel %vm1233_vm8, %v1988_v27, %v1990_v58 }
 0x506   : > { %2472 = vmatprep.subr.mxu1 %v1915_v28  ;;  %2541 = vmatprep.subr.mxu0 %v1998_v17 }
 0x507   : > { %2473 = vmatpush1.msra.mxu1 %v1914_v57  ;;  %2542 = vmatpush1.msra.mxu0 %v1997_v62 }
 0x508   : > { %2731 = vmatmul.mubr.msk.f32.vlgmr.msra.gmra.mxu1 %vm1546_vm9, %v4760_v30  ;;  %2543 = vmatprep.subr.mxu0 %v1917_v25 }
 0x509   : > { %2544 = vmatpush1.msra.mxu0 %v1916_v36 }
 0x50a   : > { %2732 = vmatmul.mubr.msk.f32.vlgmr.msra.gmra.mxu0 %vm1546_vm9, %v4760_v30 }
 0x511   : > { %v2295_v35 = vpop.permute.xlu0 %2294 }
 0x57c   : > { %v2366_v51 = vpop.f32.mrf.mxu1 }
 0x57d   : > { %v2367_v53 = vadd.f32 %v2366_v51, %v2295_v35 }
 0x57e   : > { %v2368_v14 = vpop.f32.mrf.mxu1 }
 0x57f   : > { %v2584_v40 = vmax.f32 %v2367_v53, 0.0  ;;  %v2369_v33 = vadd.f32 %v2368_v14, %v2295_v35 }
 0x581   : > { %2592 = vst [vmem:[%s4899_s2] sm:$0xff] %v2584_v40  ;;  %v2585_v61 = vmax.f32 %v2369_v33, 0.0 }
 0x583   : > { %2593 = vst [vmem:[%s4899_s2 + $0x8] sm:$0xff] %v2585_v61 }
 0x598   : > { %v2437_v31 = vpop.f32.mrf.mxu0 }
 0x599   : > { %v2438_v39 = vadd.f32 %v2437_v31, %v2295_v35 }
 0x59a   : > { %v2439_v46 = vpop.f32.mrf.mxu0 }
 0x59b   : > { %v2586_v30 = vmax.f32 %v2438_v39, 0.0  ;;  %v2440_v3 = vadd.f32 %v2439_v46, %v2295_v35 }
 0x59d   : > { %2594 = vst [vmem:[%s4899_s2 + $0x10] sm:$0xff] %v2586_v30  ;;  %v2587_v23 = vmax.f32 %v2440_v3, 0.0 }
 0x59f   : > { %2595 = vst [vmem:[%s4899_s2 + $0x18] sm:$0xff] %v2587_v23 }
 0x5c8   : > { %v2508_v52 = vpop.f32.mrf.mxu1 }
 0x5c9   : > { %v2509_v13 = vadd.f32 %v2508_v52, %v2295_v35 }
 0x5ca   : > { %v2510_v38 = vpop.f32.mrf.mxu1  ;;  %v2579_v44 = vpop.f32.mrf.mxu0 }
 0x5cb   : > { %v2588_v2 = vmax.f32 %v2509_v13, 0.0  ;;  %v2511_v48 = vadd.f32 %v2510_v38, %v2295_v35  ;;  %v2580_v32 = vadd.f32 %v2579_v44, %v2295_v35 }
 0x5cc   : > { %v2581_v19 = vpop.f32.mrf.mxu0 }
 0x5cd   : > { %2596 = vst [vmem:[%s4899_s2 + $0x20] sm:$0xff] %v2588_v2  ;;  %v2589_v0 = vmax.f32 %v2511_v48, 0.0  ;;  %v2590_v41 = vmax.f32 %v2580_v32, 0.0  ;;  %v2582_v5 = vadd.f32 %v2581_v19, %v2295_v35 }
 0x5cf   : > { %2597 = vst [vmem:[%s4899_s2 + $0x28] sm:$0xff] %v2589_v0  ;;  %2598 = vst [vmem:[%s4899_s2 + $0x30] sm:$0xff] %v2590_v41  ;;  %v2591_v54 = vmax.f32 %v2582_v5, 0.0 }
 0x5d1   : > { %2599 = vst [vmem:[%s4899_s2 + $0x38] sm:$0xff] %v2591_v54 }
 0x5d2   : > { %2972 = shalt.err (!%p2969_p12)
}
 0x5d3   : > { %s2973_s18 = scalar_lea.hbm %s2613_s29, 1024  ;;  %s2977_s23 = scalar_lea.hbm %s4952_s7, 2048 }
 0x5d4   : > { %p2974_p6 = scmp.ne.s32.totalorder %s2613_s29, %s2973_s18  ;;  %p2978_p13 = scmp.lt.s32.totalorder %s2613_s29, %s4952_s7 }
 0x5d5   : > { %p2979_p3 = scmp.lt.s32.totalorder %s2977_s23, %s2973_s18 }
 0x5d6   : > { %p2975_p7 = pnand %p2974_p6, %p5128_p0 }
 0x5d7   : > { %p2980_p8 = por %p2979_p3, %p2978_p13 }
 0x5d8   : > { %p2976_p11 = pneg %p2975_p7 }
 0x5da   : > { %p2981_p2 = pnand %p2980_p8, %p2976_p11 }
 0x5dc   : > { %2984 = shalt.err (!%p2981_p2)
}
 0x5dd   : > { %2800 = dma.vmem_to_hbm [thread:$0]  (%p5128_p0), %s2616_s12, 1024, %s2613_s29, %s2601_s17  }
 0x5de PF: > { %s2627_s22 = sand.u32 1, %s3015_s24   ;;  %p5129_p4 = scmp.ne.s32.totalorder %s5014_s14, 0 }
 0x5df   : > { %p5130_p5 = scmp.ge.s32.totalorder %s3027_s27, 2  ;;  %s2628_s15 = scalar_lea.sflag [#allocation6], %s2627_s22 }
 0x5e1   : > { %p2814_p9 = pnand %p5130_p5, %p5129_p4 }
 0x5e3   : > { %p2815_p10 = pneg %p2814_p9 }
 0x5e5   : > { %3010 = dma.done.wait (%p2815_p10), %s2628_s15, 1024  }
 0x5e6   : > { %3012 = vsyncadd (%p2815_p10), %s2628_s15, 4294966272  ;;  %p21_p1 = scmp.ge.s32.totalorder %s3118_s30, 4   ;;  %s5131_s24 = smov %s3019_s25 }
 0x5e7   : > { %s5132_s25 = smov %s3023_s26  ;;  %s5133_s26 = smov %s3130_s10 }
 0x5e8   : > { %s5134_s27 = smov %s3118_s30  ;;  %23 = sbr.rel (!%p21_p1) target bundleno = 8 (0x8), region = 102 }
 0x5ed   :  { %2633 = vsyncpa [#allocation5], 1 }
 0x5ee   :  { %2635 = vsyncpa [#allocation5 + $0x1], 1 }
 0x5ef   :  { %2636 = vsyncpa [#allocation8], 1 }
 0x5f0   :  { %2637 = vsyncpa [#allocation6], 1 }
 0x5f1   :  { %2639 = vsyncpa [#allocation6 + $0x1], 1 }

</bundles_post_ra>
